<compile_context>
chip_gen: v6e
topology: v6e:2x2x1
jax: 0.10.0
libtpu: 0.0.40
codegen_flags: <defaults>
</compile_context>

<pallas_src>
import functools

import jax
import jax.numpy as jnp
from jax import lax
from jax.experimental import pallas as pl
from jax.experimental.pallas import tpu as pltpu

LANE = 128
_PAD_L = 8  # halo offset inside the conv staging buffers (8-sublane aligned, f32)


def _round_up(x, m):
    return (x + m - 1) // m * m


# ----------------------------- Pallas kernels -----------------------------

def _backbone_kernel(x_ref, w1_ref, b1_ref, w2_ref, b2_ref, o_ref,
                     pad1, col1, pad2, col2, *, H, W, Cin):
    """Fused VGG-style backbone for ONE image:
         conv3x3 'same' + bias + ReLU + 2x2/s2 maxpool   (x2, back-to-back)

    x_ref : (1, H, W, Cin)              bf16 NHWC activations
    w1_ref: (9*Cin, C1)                 bf16 im2col-folded conv1 weights
    b1_ref: (1, C1)                     f32
    w2_ref: (9*C1, C2)                  bf16 im2col-folded conv2 weights
    b2_ref: (1, C2)                     f32
    o_ref : (1, H//4, W//4, C2)         bf16 pooled output (C2 padded to 128)
    pad1/pad2 : zero-halo staging buffers (VMEM, f32)
    col1/col2 : im2col staging buffers  (VMEM, bf16)
    """
    C1 = w1_ref.shape[1]
    C2 = o_ref.shape[-1]
    Hm, Wm = H // 2, W // 2          # after pool 1
    Ho, Wo = H // 4, W // 4          # after pool 2

    # Re-zero halos every grid step: the batch axis is "parallel" (megacore), so
    # a one-time pl.when(program_id==0) init would only run on one core.
    pad1[...] = jnp.zeros_like(pad1)
    pad2[...] = jnp.zeros_like(pad2)

    # ---------------- conv1 + bias + ReLU + 2x2/s2 max-pool -------------------
    pad1[1:H + 1, _PAD_L:_PAD_L + W, :] = x_ref[0].astype(jnp.float32)
    # im2col: one MXU matmul with K = 9*Cin instead of nine K=Cin dots.
    for dy in range(3):
        for dx in range(3):
            t = dy * 3 + dx
            patch = pad1[dy:dy + H, _PAD_L - 1 + dx:_PAD_L - 1 + dx + W, :]
            col1[:, t * Cin:(t + 1) * Cin] = (
                patch.reshape(H * W, Cin).astype(jnp.bfloat16))
    y = jnp.dot(col1[...], w1_ref[...], preferred_element_type=jnp.float32)
    y = jnp.maximum(y + b1_ref[...], 0.0)                 # bias + ReLU in f32
    y = y.reshape(H * Wm, 2, C1)
    y = jnp.maximum(y[:, 0, :], y[:, 1, :])               # pool along W
    y = y.reshape(Hm, 2, Wm, C1)
    y1 = jnp.maximum(y[:, 0], y[:, 1])                    # pool along H -> (Hm,Wm,C1)

    # ---------------- conv2 + bias + ReLU + pool (fed straight from VMEM) -----
    pad2[1:Hm + 1, _PAD_L:_PAD_L + Wm, :] = y1
    for dy in range(3):
        for dx in range(3):
            t = dy * 3 + dx
            patch = pad2[dy:dy + Hm, _PAD_L - 1 + dx:_PAD_L - 1 + dx + Wm, :]
            col2[:, t * C1:(t + 1) * C1] = (
                patch.reshape(Hm * Wm, C1).astype(jnp.bfloat16))
    y = jnp.dot(col2[...], w2_ref[...], preferred_element_type=jnp.float32)
    y = jnp.maximum(y + b2_ref[...], 0.0)
    y = y.reshape(Hm * Wo, 2, C2)
    y = jnp.maximum(y[:, 0, :], y[:, 1, :])
    y = y.reshape(Ho, 2, Wo, C2)
    y = jnp.maximum(y[:, 0], y[:, 1])                     # (Ho, Wo, C2)
    o_ref[0] = y.astype(o_ref.dtype)


def _head_kernel(x_ref, w1_ref, b1_ref, w2_ref, b2_ref, w3_ref, b3_ref,
                 o_ref, acc_ref):
    """Fused classifier head: cls1(+ReLU) [K-tiled accumulation] -> cls2(+ReLU)
    -> fc (embedding) -> row-wise L2 normalize.  Grid axis 0 = K tiles of cls1
    ("arbitrary" reduction); the small downstream weights stay resident."""
    k = pl.program_id(0)

    @pl.when(k == 0)
    def _init():
        acc_ref[...] = jnp.zeros_like(acc_ref)

    acc_ref[...] += jnp.dot(x_ref[...], w1_ref[...],
                            preferred_element_type=jnp.float32)

    @pl.when(k == pl.num_programs(0) - 1)
    def _finalize():
        h = jnp.maximum(acc_ref[...] + b1_ref[...], 0.0).astype(jnp.bfloat16)
        h = jnp.dot(h, w2_ref[...], preferred_element_type=jnp.float32)
        h = jnp.maximum(h + b2_ref[...], 0.0).astype(jnp.bfloat16)
        y = jnp.dot(h, w3_ref[...], preferred_element_type=jnp.float32)
        y = y + b3_ref[...]
        # L2 normalize (padding columns are exactly zero, so the padded sum of
        # squares equals the true one).
        ss = jnp.sum(y * y, axis=-1, keepdims=True) + 1e-12   # zero-row guard
        inv = lax.rsqrt(ss)                                   # EUP rsqrt ...
        inv = inv * (1.5 - 0.5 * ss * inv * inv)              # ... + 1 NR step
        o_ref[...] = (y * inv).astype(o_ref.dtype)


# ------------------------------ wrappers ----------------------------------

def vgg_backbone(x, w1, b1, w2, b2):
    """x: (N,H,W,Cin) bf16.  Returns (N, H/4, W/4, C2) bf16 (C2 lane-padded)."""
    N, H, W, Cin = x.shape
    C1 = w1.shape[1]
    C2 = w2.shape[1]
    Ho, Wo = H // 4, W // 4
    Hm, Wm = H // 2, W // 2
    kernel = functools.partial(_backbone_kernel, H=H, W=W, Cin=Cin)
    # TODO(synk): at real VGG19 spatial sizes (224x224) add a second grid axis
    # over output-row tiles with an overlapping-halo index_map; whole-image
    # blocks are fine at these small shapes.
    return pl.pallas_call(
        kernel,
        out_shape=jax.ShapeDtypeStruct((N, Ho, Wo, C2), jnp.bfloat16),
        grid_spec=pltpu.PrefetchScalarGridSpec(
            num_scalar_prefetch=0,
            grid=(N,),                                  # batch axis -> megacore
            in_specs=[
                pl.BlockSpec((1, H, W, Cin), lambda n: (n, 0, 0, 0)),
                pl.BlockSpec(w1.shape, lambda n: (0, 0)),
                pl.BlockSpec(b1.shape, lambda n: (0, 0)),
                pl.BlockSpec(w2.shape, lambda n: (0, 0)),
                pl.BlockSpec(b2.shape, lambda n: (0, 0)),
            ],
            out_specs=pl.BlockSpec((1, Ho, Wo, C2), lambda n: (n, 0, 0, 0)),
            scratch_shapes=[
                pltpu.VMEM((H + 2, W + 2 * _PAD_L, Cin), jnp.float32),
                pltpu.VMEM((H * W, 9 * Cin), jnp.bfloat16),
                pltpu.VMEM((Hm + 2, Wm + 2 * _PAD_L, C1), jnp.float32),
                pltpu.VMEM((Hm * Wm, 9 * C1), jnp.bfloat16),
            ],
        ),
        compiler_params=pltpu.CompilerParams(dimension_semantics=("parallel",)),
    )(x, w1, b1, w2, b2)


def mlp_head_l2norm(x, w1, b1, w2, b2, w3, b3, *, tk=512):
    """Fused cls1+ReLU+cls2+ReLU+fc+L2norm.  x:(M,K) bf16, weights pre-transposed
    (K,Fout) bf16, biases (1,Fout) f32.  Grid = K tiles of cls1 (reduction)."""
    M, K = x.shape
    HID = w1.shape[1]
    F2 = w2.shape[1]
    E = w3.shape[1]
    tk = tk if K % tk == 0 else K
    grid = (K // tk,)
    return pl.pallas_call(
        _head_kernel,
        out_shape=jax.ShapeDtypeStruct((M, E), jnp.float32),
        grid_spec=pltpu.PrefetchScalarGridSpec(
            num_scalar_prefetch=0,
            grid=grid,
            in_specs=[
                pl.BlockSpec((M, tk), lambda k: (0, k)),
                pl.BlockSpec((tk, HID), lambda k: (k, 0)),
                pl.BlockSpec((1, HID), lambda k: (0, 0)),
                pl.BlockSpec((HID, F2), lambda k: (0, 0)),
                pl.BlockSpec((1, F2), lambda k: (0, 0)),
                pl.BlockSpec((F2, E), lambda k: (0, 0)),
                pl.BlockSpec((1, E), lambda k: (0, 0)),
            ],
            out_specs=pl.BlockSpec((M, E), lambda k: (0, 0)),
            scratch_shapes=[pltpu.VMEM((M, HID), jnp.float32)],
        ),
        compiler_params=pltpu.CompilerParams(
            dimension_semantics=("arbitrary",)),
    )(x, w1, b1, w2, b2, w3, b3)


# -------------------- one-time host-side weight preparation ----------------

def prepare_params(params, *, hw):
    """Fold 3x3 taps into the im2col K axis, pad channels / features to the 128
    lane width, permute cls1 columns from NCHW-flatten to padded NHWC-flatten,
    pre-transpose Linear weights, and cast matmul operands to bf16.  Replaces
    all per-forward transposes / reshapes."""
    p = {}
    c_in = params["conv1_w"].shape[2]

    # conv1: (3,3,Cin,C1) -> (9*Cin, C1p) bf16, bias (1, C1p) f32
    c1 = params["conv1_w"].shape[-1]
    c1p = _round_up(c1, LANE)
    w = jnp.pad(params["conv1_w"], ((0, 0), (0, 0), (0, 0), (0, c1p - c1)))
    p["conv1_w"] = w.reshape(9 * c_in, c1p).astype(jnp.bfloat16)
    p["conv1_b"] = jnp.pad(params["conv1_b"], (0, c1p - c1)
                           ).reshape(1, c1p).astype(jnp.float32)

    # conv2: pad Cin to conv1's padded width and Cout to 128 (zero pads -> exact)
    c2 = params["conv2_w"].shape[-1]
    c2p = _round_up(c2, LANE)
    w = jnp.pad(params["conv2_w"],
                ((0, 0), (0, 0), (0, c1p - c1), (0, c2p - c2)))
    p["conv2_w"] = w.reshape(9 * c1p, c2p).astype(jnp.bfloat16)
    p["conv2_b"] = jnp.pad(params["conv2_b"], (0, c2p - c2)
                           ).reshape(1, c2p).astype(jnp.float32)

    # classifier layer 1: permute input columns NCHW-flatten -> padded NHWC-flatten
    hp = wp = hw // 4
    hidden = params["cls1_w"].shape[0]
    hid_p = _round_up(hidden, LANE)
    w = params["cls1_w"].reshape(hidden, c2, hp, wp)
    w = jnp.transpose(w, (0, 2, 3, 1))                      # (hid, hp, wp, c2)
    w = jnp.pad(w, ((0, hid_p - hidden), (0, 0), (0, 0), (0, c2p - c2)))
    p["cls1_w"] = w.reshape(hid_p, hp * wp * c2p).T.astype(jnp.bfloat16)
    p["cls1_b"] = jnp.pad(params["cls1_b"], (0, hid_p - hidden)
                          ).reshape(1, hid_p).astype(jnp.float32)

    # classifier layer 2
    feat = params["cls2_w"].shape[0]
    feat_p = _round_up(feat, LANE)
    w = jnp.pad(params["cls2_w"], ((0, feat_p - feat), (0, hid_p - hidden)))
    p["cls2_w"] = w.T.astype(jnp.bfloat16)
    p["cls2_b"] = jnp.pad(params["cls2_b"], (0, feat_p - feat)
                          ).reshape(1, feat_p).astype(jnp.float32)

    # final embedding fc
    embed = params["fc_w"].shape[0]
    embed_p = _round_up(embed, LANE)
    w = jnp.pad(params["fc_w"], ((0, embed_p - embed), (0, feat_p - feat)))
    p["fc_w"] = w.T.astype(jnp.bfloat16)
    p["fc_b"] = jnp.pad(params["fc_b"], (0, embed_p - embed)
                        ).reshape(1, embed_p).astype(jnp.float32)
    p["embed"] = embed
    return p


# ------------------------------ ImgEncoder --------------------------------

def img_encoder_forward(image_nchw, p):
    # NCHW (PyTorch) -> NHWC once; activations in bf16 (MXU operands), f32 inside.
    x = jnp.transpose(image_nchw, (0, 2, 3, 1)).astype(jnp.bfloat16)

    # frozen "features" backbone, fully fused (conv+ReLU+pool x2, one kernel)
    x = vgg_backbone(x, p["conv1_w"], p["conv1_b"],
                     p["conv2_w"], p["conv2_b"])             # (N, H/4, W/4, 128)

    # NHWC flatten is a pure reshape (cls1 weight columns were permuted at prep
    # time, so no per-forward NCHW transpose of the activations).
    n = x.shape[0]
    x = x.reshape(n, -1)

    # classifier (Dropout = identity) + embedding fc + L2 norm, fused; drop the
    # lane padding at the end.
    y = mlp_head_l2norm(x, p["cls1_w"], p["cls1_b"], p["cls2_w"], p["cls2_b"],
                        p["fc_w"], p["fc_b"])
    return y[:, :p["embed"]]


# pure-JAX reference (same numerics: bf16 matmul operands, f32 accumulation)
def reference_forward(image_nchw, params):
    bf = lambda a: a.astype(jnp.bfloat16)
    x = jnp.transpose(image_nchw, (0, 2, 3, 1)).astype(jnp.float32)

    def conv(x, w, b):
        y = lax.conv_general_dilated(bf(x), bf(w), (1, 1), "SAME",
                                     dimension_numbers=("NHWC", "HWIO", "NHWC"),
                                     preferred_element_type=jnp.float32)
        return jnp.maximum(y + b, 0.0)

    def pool(x):
        return lax.reduce_window(x, -jnp.inf, lax.max,
                                 (1, 2, 2, 1), (1, 2, 2, 1), "VALID")

    def lin(x, w, b):
        return jnp.dot(bf(x), bf(w).T, preferred_element_type=jnp.float32) + b

    x = pool(conv(x, params["conv1_w"], params["conv1_b"]))
    x = pool(conv(x, params["conv2_w"], params["conv2_b"]))
    x = jnp.transpose(x, (0, 3, 1, 2)).reshape(x.shape[0], -1)
    x = jnp.maximum(lin(x, params["cls1_w"], params["cls1_b"]), 0.0)
    x = jnp.maximum(lin(x, params["cls2_w"], params["cls2_b"]), 0.0)
    y = lin(x, params["fc_w"], params["fc_b"])
    return y / jnp.linalg.norm(y, axis=1, keepdims=True)


# --------------------------------- main ------------------------------------

if __name__ == "__main__":
    # small shapes: batch=2, in_channels=4, spatial=16, in_features=64, embed=32
    N, C_IN, HW = 2, 4, 16
    C1, C2 = 8, 16
    HIDDEN, IN_FEATURES, EMBED = 64, 64, 32
    FLAT = C2 * (HW // 4) * (HW // 4)  # 16 * 4 * 4 = 256

    key = jax.random.PRNGKey(0)
    ks = jax.random.split(key, 11)
    params = {
        "conv1_w": 0.10 * jax.random.normal(ks[0], (3, 3, C_IN, C1), jnp.float32),
        "conv1_b": 0.01 * jax.random.normal(ks[1], (C1,), jnp.float32),
        "conv2_w": 0.10 * jax.random.normal(ks[2], (3, 3, C1, C2), jnp.float32),
        "conv2_b": 0.01 * jax.random.normal(ks[3], (C2,), jnp.float32),
        "cls1_w": 0.05 * jax.random.normal(ks[4], (HIDDEN, FLAT), jnp.float32),
        "cls1_b": 0.01 * jax.random.normal(ks[5], (HIDDEN,), jnp.float32),
        "cls2_w": 0.05 * jax.random.normal(ks[6], (IN_FEATURES, HIDDEN), jnp.float32),
        "cls2_b": 0.01 * jax.random.normal(ks[7], (IN_FEATURES,), jnp.float32),
        "fc_w": 0.05 * jax.random.normal(ks[8], (EMBED, IN_FEATURES), jnp.float32),
        "fc_b": 0.01 * jax.random.normal(ks[9], (EMBED,), jnp.float32),
    }
    image = jax.random.normal(ks[10], (N, C_IN, HW, HW), jnp.float32)  # NCHW

    prepared = prepare_params(params, hw=HW)       # one-time weight prep
    out = img_encoder_forward(image, prepared)
    out = jax.block_until_ready(out)

    ref = reference_forward(image, params)
    assert out.shape == (N, EMBED), out.shape
    assert bool(jnp.all(jnp.isfinite(out)))
    assert bool(jnp.allclose(jnp.linalg.norm(out, axis=1), 1.0, atol=1e-3))
    assert bool(jnp.allclose(out, ref, atol=2e-3, rtol=2e-3))

    print("KERNEL_OK")
</pallas_src>

<mosaic_0001>
module attributes {stable_mosaic.version = 11 : i64} {
  func.func @_backbone_kernel(%arg0: i32, %arg1: memref<1x16x16x4xbf16, #tpu.memory_space<vmem>>, %arg2: memref<36x128xbf16, #tpu.memory_space<vmem>>, %arg3: memref<1x128xf32, #tpu.memory_space<vmem>>, %arg4: memref<1152x128xbf16, #tpu.memory_space<vmem>>, %arg5: memref<1x128xf32, #tpu.memory_space<vmem>>, %arg6: memref<1x4x4x128xbf16, #tpu.memory_space<vmem>>, %arg7: memref<18x32x4xf32, #tpu.memory_space<vmem>>, %arg8: memref<256x36xbf16, #tpu.memory_space<vmem>>, %arg9: memref<10x24x128xf32, #tpu.memory_space<vmem>>, %arg10: memref<64x1152xbf16, #tpu.memory_space<vmem>>) attributes {dimension_semantics = [#tpu.dimension_semantics<parallel>], iteration_bounds = array<i64: 2>, scalar_prefetch = 0 : i64, scratch_operands = 4 : i64, tpu.core_type = #tpu.core_type<tc>, window_params = [{transform_indices = @transform_0, window_bounds = array<i64: 1, 16, 16, 4>}, {pipeline_mode = #tpu.pipeline_mode<synchronous>, transform_indices = @transform_1, window_bounds = array<i64: 36, 128>}, {pipeline_mode = #tpu.pipeline_mode<synchronous>, transform_indices = @transform_2, window_bounds = array<i64: 1, 128>}, {pipeline_mode = #tpu.pipeline_mode<synchronous>, transform_indices = @transform_3, window_bounds = array<i64: 1152, 128>}, {pipeline_mode = #tpu.pipeline_mode<synchronous>, transform_indices = @transform_4, window_bounds = array<i64: 1, 128>}, {transform_indices = @transform_5, window_bounds = array<i64: 1, 4, 4, 128>}]} {
    %cst = arith.constant 0.000000e+00 : f32
    %0 = vector.broadcast %cst : f32 to vector<18x32x4xf32>
    %c0 = arith.constant 0 : index
    %c0_0 = arith.constant 0 : index
    %c0_1 = arith.constant 0 : index
    %1 = vector.load %arg7[%c0, %c0_0, %c0_1] : memref<18x32x4xf32, #tpu.memory_space<vmem>>, vector<18x32x4xf32>
    tpu.vector_store %arg7[%c0, %c0_0, %c0_1], %0 {strides = array<i32>} : memref<18x32x4xf32, #tpu.memory_space<vmem>>, vector<18x32x4xf32>,
    %cst_2 = arith.constant 0.000000e+00 : f32
    %2 = vector.broadcast %cst_2 : f32 to vector<10x24x128xf32>
    %c0_3 = arith.constant 0 : index
    %c0_4 = arith.constant 0 : index
    %c0_5 = arith.constant 0 : index
    %3 = vector.load %arg9[%c0_3, %c0_4, %c0_5] : memref<10x24x128xf32, #tpu.memory_space<vmem>>, vector<10x24x128xf32>
    tpu.vector_store %arg9[%c0_3, %c0_4, %c0_5], %2 {strides = array<i32>} : memref<10x24x128xf32, #tpu.memory_space<vmem>>, vector<10x24x128xf32>,
    %c0_6 = arith.constant 0 : index
    %c0_7 = arith.constant 0 : index
    %c0_8 = arith.constant 0 : index
    %c0_9 = arith.constant 0 : index
    %4 = vector.load %arg1[%c0_6, %c0_7, %c0_8, %c0_9] : memref<1x16x16x4xbf16, #tpu.memory_space<vmem>>, vector<1x16x16x4xbf16>
    %5 = vector.shape_cast %4 : vector<1x16x16x4xbf16> to vector<16x16x4xbf16>
    %6 = arith.extf %5 : vector<16x16x4xbf16> to vector<16x16x4xf32>
    %c1 = arith.constant 1 : index
    %c8 = arith.constant 8 : index
    %c0_10 = arith.constant 0 : index
    %7 = vector.load %arg7[%c1, %c8, %c0_10] : memref<18x32x4xf32, #tpu.memory_space<vmem>>, vector<16x16x4xf32>
    tpu.vector_store %arg7[%c1, %c8, %c0_10], %6 {strides = array<i32>} : memref<18x32x4xf32, #tpu.memory_space<vmem>>, vector<16x16x4xf32>,
    %c0_11 = arith.constant 0 : index
    %c7 = arith.constant 7 : index
    %c0_12 = arith.constant 0 : index
    %8 = vector.load %arg7[%c0_11, %c7, %c0_12] : memref<18x32x4xf32, #tpu.memory_space<vmem>>, vector<16x16x4xf32>
    %9 = vector.shape_cast %8 : vector<16x16x4xf32> to vector<256x4xf32>
    %10 = arith.truncf %9 : vector<256x4xf32> to vector<256x4xbf16>
    %c0_13 = arith.constant 0 : index
    %c0_14 = arith.constant 0 : index
    %11 = vector.load %arg8[%c0_13, %c0_14] : memref<256x36xbf16, #tpu.memory_space<vmem>>, vector<256x4xbf16>
    tpu.vector_store %arg8[%c0_13, %c0_14], %10 {strides = array<i32>} : memref<256x36xbf16, #tpu.memory_space<vmem>>, vector<256x4xbf16>,
    %c0_15 = arith.constant 0 : index
    %c8_16 = arith.constant 8 : index
    %c0_17 = arith.constant 0 : index
    %12 = vector.load %arg7[%c0_15, %c8_16, %c0_17] : memref<18x32x4xf32, #tpu.memory_space<vmem>>, vector<16x16x4xf32>
    %13 = vector.shape_cast %12 : vector<16x16x4xf32> to vector<256x4xf32>
    %14 = arith.truncf %13 : vector<256x4xf32> to vector<256x4xbf16>
    %c0_18 = arith.constant 0 : index
    %c4 = arith.constant 4 : index
    %15 = vector.load %arg8[%c0_18, %c4] : memref<256x36xbf16, #tpu.memory_space<vmem>>, vector<256x4xbf16>
    tpu.vector_store %arg8[%c0_18, %c4], %14 {strides = array<i32>} : memref<256x36xbf16, #tpu.memory_space<vmem>>, vector<256x4xbf16>,
    %c0_19 = arith.constant 0 : index
    %c9 = arith.constant 9 : index
    %c0_20 = arith.constant 0 : index
    %16 = vector.load %arg7[%c0_19, %c9, %c0_20] : memref<18x32x4xf32, #tpu.memory_space<vmem>>, vector<16x16x4xf32>
    %17 = vector.shape_cast %16 : vector<16x16x4xf32> to vector<256x4xf32>
    %18 = arith.truncf %17 : vector<256x4xf32> to vector<256x4xbf16>
    %c0_21 = arith.constant 0 : index
    %c8_22 = arith.constant 8 : index
    %19 = vector.load %arg8[%c0_21, %c8_22] : memref<256x36xbf16, #tpu.memory_space<vmem>>, vector<256x4xbf16>
    tpu.vector_store %arg8[%c0_21, %c8_22], %18 {strides = array<i32>} : memref<256x36xbf16, #tpu.memory_space<vmem>>, vector<256x4xbf16>,
    %c1_23 = arith.constant 1 : index
    %c7_24 = arith.constant 7 : index
    %c0_25 = arith.constant 0 : index
    %20 = vector.load %arg7[%c1_23, %c7_24, %c0_25] : memref<18x32x4xf32, #tpu.memory_space<vmem>>, vector<16x16x4xf32>
    %21 = vector.shape_cast %20 : vector<16x16x4xf32> to vector<256x4xf32>
    %22 = arith.truncf %21 : vector<256x4xf32> to vector<256x4xbf16>
    %c0_26 = arith.constant 0 : index
    %c12 = arith.constant 12 : index
    %23 = vector.load %arg8[%c0_26, %c12] : memref<256x36xbf16, #tpu.memory_space<vmem>>, vector<256x4xbf16>
    tpu.vector_store %arg8[%c0_26, %c12], %22 {strides = array<i32>} : memref<256x36xbf16, #tpu.memory_space<vmem>>, vector<256x4xbf16>,
    %c1_27 = arith.constant 1 : index
    %c8_28 = arith.constant 8 : index
    %c0_29 = arith.constant 0 : index
    %24 = vector.load %arg7[%c1_27, %c8_28, %c0_29] : memref<18x32x4xf32, #tpu.memory_space<vmem>>, vector<16x16x4xf32>
    %25 = vector.shape_cast %24 : vector<16x16x4xf32> to vector<256x4xf32>
    %26 = arith.truncf %25 : vector<256x4xf32> to vector<256x4xbf16>
    %c0_30 = arith.constant 0 : index
    %c16 = arith.constant 16 : index
    %27 = vector.load %arg8[%c0_30, %c16] : memref<256x36xbf16, #tpu.memory_space<vmem>>, vector<256x4xbf16>
    tpu.vector_store %arg8[%c0_30, %c16], %26 {strides = array<i32>} : memref<256x36xbf16, #tpu.memory_space<vmem>>, vector<256x4xbf16>,
    %c1_31 = arith.constant 1 : index
    %c9_32 = arith.constant 9 : index
    %c0_33 = arith.constant 0 : index
    %28 = vector.load %arg7[%c1_31, %c9_32, %c0_33] : memref<18x32x4xf32, #tpu.memory_space<vmem>>, vector<16x16x4xf32>
    %29 = vector.shape_cast %28 : vector<16x16x4xf32> to vector<256x4xf32>
    %30 = arith.truncf %29 : vector<256x4xf32> to vector<256x4xbf16>
    %c0_34 = arith.constant 0 : index
    %c20 = arith.constant 20 : index
    %31 = vector.load %arg8[%c0_34, %c20] : memref<256x36xbf16, #tpu.memory_space<vmem>>, vector<256x4xbf16>
    tpu.vector_store %arg8[%c0_34, %c20], %30 {strides = array<i32>} : memref<256x36xbf16, #tpu.memory_space<vmem>>, vector<256x4xbf16>,
    %c2 = arith.constant 2 : index
    %c7_35 = arith.constant 7 : index
    %c0_36 = arith.constant 0 : index
    %32 = vector.load %arg7[%c2, %c7_35, %c0_36] : memref<18x32x4xf32, #tpu.memory_space<vmem>>, vector<16x16x4xf32>
    %33 = vector.shape_cast %32 : vector<16x16x4xf32> to vector<256x4xf32>
    %34 = arith.truncf %33 : vector<256x4xf32> to vector<256x4xbf16>
    %c0_37 = arith.constant 0 : index
    %c24 = arith.constant 24 : index
    %35 = vector.load %arg8[%c0_37, %c24] : memref<256x36xbf16, #tpu.memory_space<vmem>>, vector<256x4xbf16>
    tpu.vector_store %arg8[%c0_37, %c24], %34 {strides = array<i32>} : memref<256x36xbf16, #tpu.memory_space<vmem>>, vector<256x4xbf16>,
    %c2_38 = arith.constant 2 : index
    %c8_39 = arith.constant 8 : index
    %c0_40 = arith.constant 0 : index
    %36 = vector.load %arg7[%c2_38, %c8_39, %c0_40] : memref<18x32x4xf32, #tpu.memory_space<vmem>>, vector<16x16x4xf32>
    %37 = vector.shape_cast %36 : vector<16x16x4xf32> to vector<256x4xf32>
    %38 = arith.truncf %37 : vector<256x4xf32> to vector<256x4xbf16>
    %c0_41 = arith.constant 0 : index
    %c28 = arith.constant 28 : index
    %39 = vector.load %arg8[%c0_41, %c28] : memref<256x36xbf16, #tpu.memory_space<vmem>>, vector<256x4xbf16>
    tpu.vector_store %arg8[%c0_41, %c28], %38 {strides = array<i32>} : memref<256x36xbf16, #tpu.memory_space<vmem>>, vector<256x4xbf16>,
    %c2_42 = arith.constant 2 : index
    %c9_43 = arith.constant 9 : index
    %c0_44 = arith.constant 0 : index
    %40 = vector.load %arg7[%c2_42, %c9_43, %c0_44] : memref<18x32x4xf32, #tpu.memory_space<vmem>>, vector<16x16x4xf32>
    %41 = vector.shape_cast %40 : vector<16x16x4xf32> to vector<256x4xf32>
    %42 = arith.truncf %41 : vector<256x4xf32> to vector<256x4xbf16>
    %c0_45 = arith.constant 0 : index
    %c32 = arith.constant 32 : index
    %43 = vector.load %arg8[%c0_45, %c32] : memref<256x36xbf16, #tpu.memory_space<vmem>>, vector<256x4xbf16>
    tpu.vector_store %arg8[%c0_45, %c32], %42 {strides = array<i32>} : memref<256x36xbf16, #tpu.memory_space<vmem>>, vector<256x4xbf16>,
    %c0_46 = arith.constant 0 : index
    %c0_47 = arith.constant 0 : index
    %44 = vector.load %arg8[%c0_46, %c0_47] : memref<256x36xbf16, #tpu.memory_space<vmem>>, vector<256x36xbf16>
    %c0_48 = arith.constant 0 : index
    %c0_49 = arith.constant 0 : index
    %45 = vector.load %arg2[%c0_48, %c0_49] : memref<36x128xbf16, #tpu.memory_space<vmem>>, vector<36x128xbf16>
    %cst_50 = arith.constant dense<0.000000e+00> : vector<256x128xf32>
    %46 = tpu.matmul %44, %45, %cst_50 {dimension_numbers = #tpu.dot_dimension_numbers<[1], [0], [0], [1], [0, 0, 1, 1], [], []>} : vector<256x36xbf16>, vector<36x128xbf16>, vector<256x128xf32> -> vector<256x128xf32>
    %c0_51 = arith.constant 0 : index
    %c0_52 = arith.constant 0 : index
    %47 = vector.load %arg3[%c0_51, %c0_52] : memref<1x128xf32, #tpu.memory_space<vmem>>, vector<1x128xf32>
    %48 = vector.broadcast %47 : vector<1x128xf32> to vector<256x128xf32>
    %49 = arith.addf %46, %48 : vector<256x128xf32>
    %cst_53 = arith.constant 0.000000e+00 : f32
    %50 = vector.broadcast %cst_53 : f32 to vector<256x128xf32>
    %51 = arith.maximumf %49, %50 : vector<256x128xf32>
    %52 = vector.shape_cast %51 : vector<256x128xf32> to vector<128x2x128xf32>
    %53 = vector.extract_strided_slice %52 {offsets = [0, 0, 0], sizes = [128, 1, 128], strides = [1, 1, 1]} : vector<128x2x128xf32> to vector<128x1x128xf32>
    %54 = vector.shape_cast %53 : vector<128x1x128xf32> to vector<128x128xf32>
    %55 = vector.extract_strided_slice %52 {offsets = [0, 1, 0], sizes = [128, 1, 128], strides = [1, 1, 1]} : vector<128x2x128xf32> to vector<128x1x128xf32>
    %56 = vector.shape_cast %55 : vector<128x1x128xf32> to vector<128x128xf32>
    %57 = arith.maximumf %54, %56 : vector<128x128xf32>
    %58 = vector.shape_cast %57 : vector<128x128xf32> to vector<8x2x8x128xf32>
    %59 = vector.extract_strided_slice %58 {offsets = [0, 0, 0, 0], sizes = [8, 1, 8, 128], strides = [1, 1, 1, 1]} : vector<8x2x8x128xf32> to vector<8x1x8x128xf32>
    %60 = vector.shape_cast %59 : vector<8x1x8x128xf32> to vector<8x8x128xf32>
    %61 = vector.extract_strided_slice %58 {offsets = [0, 1, 0, 0], sizes = [8, 1, 8, 128], strides = [1, 1, 1, 1]} : vector<8x2x8x128xf32> to vector<8x1x8x128xf32>
    %62 = vector.shape_cast %61 : vector<8x1x8x128xf32> to vector<8x8x128xf32>
    %63 = arith.maximumf %60, %62 : vector<8x8x128xf32>
    %c1_54 = arith.constant 1 : index
    %c8_55 = arith.constant 8 : index
    %c0_56 = arith.constant 0 : index
    %64 = vector.load %arg9[%c1_54, %c8_55, %c0_56] : memref<10x24x128xf32, #tpu.memory_space<vmem>>, vector<8x8x128xf32>
    tpu.vector_store %arg9[%c1_54, %c8_55, %c0_56], %63 {strides = array<i32>} : memref<10x24x128xf32, #tpu.memory_space<vmem>>, vector<8x8x128xf32>,
    %c0_57 = arith.constant 0 : index
    %c7_58 = arith.constant 7 : index
    %c0_59 = arith.constant 0 : index
    %65 = vector.load %arg9[%c0_57, %c7_58, %c0_59] : memref<10x24x128xf32, #tpu.memory_space<vmem>>, vector<8x8x128xf32>
    %66 = vector.shape_cast %65 : vector<8x8x128xf32> to vector<64x128xf32>
    %67 = arith.truncf %66 : vector<64x128xf32> to vector<64x128xbf16>
    %c0_60 = arith.constant 0 : index
    %c0_61 = arith.constant 0 : index
    %68 = vector.load %arg10[%c0_60, %c0_61] : memref<64x1152xbf16, #tpu.memory_space<vmem>>, vector<64x128xbf16>
    tpu.vector_store %arg10[%c0_60, %c0_61], %67 {strides = array<i32>} : memref<64x1152xbf16, #tpu.memory_space<vmem>>, vector<64x128xbf16>,
    %c0_62 = arith.constant 0 : index
    %c8_63 = arith.constant 8 : index
    %c0_64 = arith.constant 0 : index
    %69 = vector.load %arg9[%c0_62, %c8_63, %c0_64] : memref<10x24x128xf32, #tpu.memory_space<vmem>>, vector<8x8x128xf32>
    %70 = vector.shape_cast %69 : vector<8x8x128xf32> to vector<64x128xf32>
    %71 = arith.truncf %70 : vector<64x128xf32> to vector<64x128xbf16>
    %c0_65 = arith.constant 0 : index
    %c128 = arith.constant 128 : index
    %72 = vector.load %arg10[%c0_65, %c128] : memref<64x1152xbf16, #tpu.memory_space<vmem>>, vector<64x128xbf16>
    tpu.vector_store %arg10[%c0_65, %c128], %71 {strides = array<i32>} : memref<64x1152xbf16, #tpu.memory_space<vmem>>, vector<64x128xbf16>,
    %c0_66 = arith.constant 0 : index
    %c9_67 = arith.constant 9 : index
    %c0_68 = arith.constant 0 : index
    %73 = vector.load %arg9[%c0_66, %c9_67, %c0_68] : memref<10x24x128xf32, #tpu.memory_space<vmem>>, vector<8x8x128xf32>
    %74 = vector.shape_cast %73 : vector<8x8x128xf32> to vector<64x128xf32>
    %75 = arith.truncf %74 : vector<64x128xf32> to vector<64x128xbf16>
    %c0_69 = arith.constant 0 : index
    %c256 = arith.constant 256 : index
    %76 = vector.load %arg10[%c0_69, %c256] : memref<64x1152xbf16, #tpu.memory_space<vmem>>, vector<64x128xbf16>
    tpu.vector_store %arg10[%c0_69, %c256], %75 {strides = array<i32>} : memref<64x1152xbf16, #tpu.memory_space<vmem>>, vector<64x128xbf16>,
    %c1_70 = arith.constant 1 : index
    %c7_71 = arith.constant 7 : index
    %c0_72 = arith.constant 0 : index
    %77 = vector.load %arg9[%c1_70, %c7_71, %c0_72] : memref<10x24x128xf32, #tpu.memory_space<vmem>>, vector<8x8x128xf32>
    %78 = vector.shape_cast %77 : vector<8x8x128xf32> to vector<64x128xf32>
    %79 = arith.truncf %78 : vector<64x128xf32> to vector<64x128xbf16>
    %c0_73 = arith.constant 0 : index
    %c384 = arith.constant 384 : index
    %80 = vector.load %arg10[%c0_73, %c384] : memref<64x1152xbf16, #tpu.memory_space<vmem>>, vector<64x128xbf16>
    tpu.vector_store %arg10[%c0_73, %c384], %79 {strides = array<i32>} : memref<64x1152xbf16, #tpu.memory_space<vmem>>, vector<64x128xbf16>,
    %c1_74 = arith.constant 1 : index
    %c8_75 = arith.constant 8 : index
    %c0_76 = arith.constant 0 : index
    %81 = vector.load %arg9[%c1_74, %c8_75, %c0_76] : memref<10x24x128xf32, #tpu.memory_space<vmem>>, vector<8x8x128xf32>
    %82 = vector.shape_cast %81 : vector<8x8x128xf32> to vector<64x128xf32>
    %83 = arith.truncf %82 : vector<64x128xf32> to vector<64x128xbf16>
    %c0_77 = arith.constant 0 : index
    %c512 = arith.constant 512 : index
    %84 = vector.load %arg10[%c0_77, %c512] : memref<64x1152xbf16, #tpu.memory_space<vmem>>, vector<64x128xbf16>
    tpu.vector_store %arg10[%c0_77, %c512], %83 {strides = array<i32>} : memref<64x1152xbf16, #tpu.memory_space<vmem>>, vector<64x128xbf16>,
    %c1_78 = arith.constant 1 : index
    %c9_79 = arith.constant 9 : index
    %c0_80 = arith.constant 0 : index
    %85 = vector.load %arg9[%c1_78, %c9_79, %c0_80] : memref<10x24x128xf32, #tpu.memory_space<vmem>>, vector<8x8x128xf32>
    %86 = vector.shape_cast %85 : vector<8x8x128xf32> to vector<64x128xf32>
    %87 = arith.truncf %86 : vector<64x128xf32> to vector<64x128xbf16>
    %c0_81 = arith.constant 0 : index
    %c640 = arith.constant 640 : index
    %88 = vector.load %arg10[%c0_81, %c640] : memref<64x1152xbf16, #tpu.memory_space<vmem>>, vector<64x128xbf16>
    tpu.vector_store %arg10[%c0_81, %c640], %87 {strides = array<i32>} : memref<64x1152xbf16, #tpu.memory_space<vmem>>, vector<64x128xbf16>,
    %c2_82 = arith.constant 2 : index
    %c7_83 = arith.constant 7 : index
    %c0_84 = arith.constant 0 : index
    %89 = vector.load %arg9[%c2_82, %c7_83, %c0_84] : memref<10x24x128xf32, #tpu.memory_space<vmem>>, vector<8x8x128xf32>
    %90 = vector.shape_cast %89 : vector<8x8x128xf32> to vector<64x128xf32>
    %91 = arith.truncf %90 : vector<64x128xf32> to vector<64x128xbf16>
    %c0_85 = arith.constant 0 : index
    %c768 = arith.constant 768 : index
    %92 = vector.load %arg10[%c0_85, %c768] : memref<64x1152xbf16, #tpu.memory_space<vmem>>, vector<64x128xbf16>
    tpu.vector_store %arg10[%c0_85, %c768], %91 {strides = array<i32>} : memref<64x1152xbf16, #tpu.memory_space<vmem>>, vector<64x128xbf16>,
    %c2_86 = arith.constant 2 : index
    %c8_87 = arith.constant 8 : index
    %c0_88 = arith.constant 0 : index
    %93 = vector.load %arg9[%c2_86, %c8_87, %c0_88] : memref<10x24x128xf32, #tpu.memory_space<vmem>>, vector<8x8x128xf32>
    %94 = vector.shape_cast %93 : vector<8x8x128xf32> to vector<64x128xf32>
    %95 = arith.truncf %94 : vector<64x128xf32> to vector<64x128xbf16>
    %c0_89 = arith.constant 0 : index
    %c896 = arith.constant 896 : index
    %96 = vector.load %arg10[%c0_89, %c896] : memref<64x1152xbf16, #tpu.memory_space<vmem>>, vector<64x128xbf16>
    tpu.vector_store %arg10[%c0_89, %c896], %95 {strides = array<i32>} : memref<64x1152xbf16, #tpu.memory_space<vmem>>, vector<64x128xbf16>,
    %c2_90 = arith.constant 2 : index
    %c9_91 = arith.constant 9 : index
    %c0_92 = arith.constant 0 : index
    %97 = vector.load %arg9[%c2_90, %c9_91, %c0_92] : memref<10x24x128xf32, #tpu.memory_space<vmem>>, vector<8x8x128xf32>
    %98 = vector.shape_cast %97 : vector<8x8x128xf32> to vector<64x128xf32>
    %99 = arith.truncf %98 : vector<64x128xf32> to vector<64x128xbf16>
    %c0_93 = arith.constant 0 : index
    %c1024 = arith.constant 1024 : index
    %100 = vector.load %arg10[%c0_93, %c1024] : memref<64x1152xbf16, #tpu.memory_space<vmem>>, vector<64x128xbf16>
    tpu.vector_store %arg10[%c0_93, %c1024], %99 {strides = array<i32>} : memref<64x1152xbf16, #tpu.memory_space<vmem>>, vector<64x128xbf16>,
    %c0_94 = arith.constant 0 : index
    %c0_95 = arith.constant 0 : index
    %101 = vector.load %arg10[%c0_94, %c0_95] : memref<64x1152xbf16, #tpu.memory_space<vmem>>, vector<64x1152xbf16>
    %c0_96 = arith.constant 0 : index
    %c0_97 = arith.constant 0 : index
    %102 = vector.load %arg4[%c0_96, %c0_97] : memref<1152x128xbf16, #tpu.memory_space<vmem>>, vector<1152x128xbf16>
    %cst_98 = arith.constant dense<0.000000e+00> : vector<64x128xf32>
    %103 = tpu.matmul %101, %102, %cst_98 {dimension_numbers = #tpu.dot_dimension_numbers<[1], [0], [0], [1], [0, 0, 1, 1], [], []>} : vector<64x1152xbf16>, vector<1152x128xbf16>, vector<64x128xf32> -> vector<64x128xf32>
    %c0_99 = arith.constant 0 : index
    %c0_100 = arith.constant 0 : index
    %104 = vector.load %arg5[%c0_99, %c0_100] : memref<1x128xf32, #tpu.memory_space<vmem>>, vector<1x128xf32>
    %105 = vector.broadcast %104 : vector<1x128xf32> to vector<64x128xf32>
    %106 = arith.addf %103, %105 : vector<64x128xf32>
    %cst_101 = arith.constant 0.000000e+00 : f32
    %107 = vector.broadcast %cst_101 : f32 to vector<64x128xf32>
    %108 = arith.maximumf %106, %107 : vector<64x128xf32>
    %109 = vector.shape_cast %108 : vector<64x128xf32> to vector<32x2x128xf32>
    %110 = vector.extract_strided_slice %109 {offsets = [0, 0, 0], sizes = [32, 1, 128], strides = [1, 1, 1]} : vector<32x2x128xf32> to vector<32x1x128xf32>
    %111 = vector.shape_cast %110 : vector<32x1x128xf32> to vector<32x128xf32>
    %112 = vector.extract_strided_slice %109 {offsets = [0, 1, 0], sizes = [32, 1, 128], strides = [1, 1, 1]} : vector<32x2x128xf32> to vector<32x1x128xf32>
    %113 = vector.shape_cast %112 : vector<32x1x128xf32> to vector<32x128xf32>
    %114 = arith.maximumf %111, %113 : vector<32x128xf32>
    %115 = vector.shape_cast %114 : vector<32x128xf32> to vector<4x2x4x128xf32>
    %116 = vector.extract_strided_slice %115 {offsets = [0, 0, 0, 0], sizes = [4, 1, 4, 128], strides = [1, 1, 1, 1]} : vector<4x2x4x128xf32> to vector<4x1x4x128xf32>
    %117 = vector.shape_cast %116 : vector<4x1x4x128xf32> to vector<4x4x128xf32>
    %118 = vector.extract_strided_slice %115 {offsets = [0, 1, 0, 0], sizes = [4, 1, 4, 128], strides = [1, 1, 1, 1]} : vector<4x2x4x128xf32> to vector<4x1x4x128xf32>
    %119 = vector.shape_cast %118 : vector<4x1x4x128xf32> to vector<4x4x128xf32>
    %120 = arith.maximumf %117, %119 : vector<4x4x128xf32>
    %121 = arith.truncf %120 : vector<4x4x128xf32> to vector<4x4x128xbf16>
    %c0_102 = arith.constant 0 : index
    %c0_103 = arith.constant 0 : index
    %c0_104 = arith.constant 0 : index
    %c0_105 = arith.constant 0 : index
    %122 = vector.load %arg6[%c0_102, %c0_103, %c0_104, %c0_105] : memref<1x4x4x128xbf16, #tpu.memory_space<vmem>>, vector<1x4x4x128xbf16>
    %123 = vector.shape_cast %122 : vector<1x4x4x128xbf16> to vector<4x4x128xbf16>
    %124 = vector.shape_cast %121 : vector<4x4x128xbf16> to vector<1x4x4x128xbf16>
    tpu.vector_store %arg6[%c0_102, %c0_103, %c0_104, %c0_105], %124 {strides = array<i32>} : memref<1x4x4x128xbf16, #tpu.memory_space<vmem>>, vector<1x4x4x128xbf16>,
    return
  }
  func.func @transform_0(%arg0: i32) -> (i32, i32, i32, i32) {
    %c0_i32 = arith.constant 0 : i32
    %c0_i32_0 = arith.constant 0 : i32
    %c0_i32_1 = arith.constant 0 : i32
    %c0_i32_2 = arith.constant 0 : i32
    return %arg0, %c0_i32, %c0_i32_0, %c0_i32_1 : i32, i32, i32, i32
  }
  func.func @transform_1(%arg0: i32) -> (i32, i32) {
    %c0_i32 = arith.constant 0 : i32
    %c0_i32_0 = arith.constant 0 : i32
    %c0_i32_1 = arith.constant 0 : i32
    return %c0_i32, %c0_i32_0 : i32, i32
  }
  func.func @transform_2(%arg0: i32) -> (i32, i32) {
    %c0_i32 = arith.constant 0 : i32
    %c0_i32_0 = arith.constant 0 : i32
    %c0_i32_1 = arith.constant 0 : i32
    return %c0_i32, %c0_i32_0 : i32, i32
  }
  func.func @transform_3(%arg0: i32) -> (i32, i32) {
    %c0_i32 = arith.constant 0 : i32
    %c0_i32_0 = arith.constant 0 : i32
    %c0_i32_1 = arith.constant 0 : i32
    return %c0_i32, %c0_i32_0 : i32, i32
  }
  func.func @transform_4(%arg0: i32) -> (i32, i32) {
    %c0_i32 = arith.constant 0 : i32
    %c0_i32_0 = arith.constant 0 : i32
    %c0_i32_1 = arith.constant 0 : i32
    return %c0_i32, %c0_i32_0 : i32, i32
  }
  func.func @transform_5(%arg0: i32) -> (i32, i32, i32, i32) {
    %c0_i32 = arith.constant 0 : i32
    %c0_i32_0 = arith.constant 0 : i32
    %c0_i32_1 = arith.constant 0 : i32
    %c0_i32_2 = arith.constant 0 : i32
    return %arg0, %c0_i32, %c0_i32_0, %c0_i32_1 : i32, i32, i32, i32
  }
}

</mosaic_0001>

<bundles_post_ra>
// kernel: tpu_custom_call.1
= control target key start
LH: loop header
LB: loop body
LE: loop exit
PB: predicated region body
PF: predicated region fallthrough
CT: control target
= control target key end

     0   :  { %10 = vsyncpa [#allocation7], 0  ;;  %s10485_s0 = inlined_call_operand.vmem [shape: bf16[2,16,16,4], index: 0, kind: input, shape index: {}]   ;;  %s10486_s1 = inlined_call_operand.vmem [shape: bf16[36,128], index: 1, kind: input, shape index: {}]   ;;  %s10487_s2 = inlined_call_operand.vmem [shape: f32[1,128], index: 2, kind: input, shape index: {}]   ;;  %s10488_s3 = inlined_call_operand.hbm [shape: bf16[1152,128], index: 3, kind: input, shape index: {}]   ;;  %s10489_s4 = inlined_call_operand.vmem [shape: f32[1,128], index: 4, kind: input, shape index: {}]   ;;  %s10490_s5 = inlined_call_operand.hbm [shape: bf16[2,4,4,128], index: 5, kind: output, shape index: {}]  }
   0x1   :  { %11 = vsyncpa [#allocation8], 0 }
   0x2   :  { %13 = vsyncpa [#allocation8 + $0x1], 0  ;;  %s8795_s18 = smov 0   ;;  %s8797_s19 = smov 0  }
   0x3   :  { %s8799_s20 = smov 0   ;;  %s8801_s21 = smov 0  }
   0x4 LB: > { %s8816_s22 = sadd.s32 4294967295, %s8748_s21   ;;  %s7071_s23 = sadd.s32 4294967294, %s8748_s21   ;;  %s8748_s21 = sphi %s8801_s21, %s10509_s21   ;;  %s8744_s20 = sphi %s8799_s20, %s10508_s20   ;;  %s8740_s19 = sphi %s8797_s19, %s10507_s19   ;;  %s8736_s18 = sphi %s8795_s18, %s10506_s18  }
   0x5   : > { %s8820_s24 = sadd.s32 1, %s8748_s21   ;;  %s136_s25 = sadd.s32 1, %s8744_s20 }
   0x6   : > { %s133_s26 = ssub.s32 %s8748_s21, %s8820_s24  ;;  %p146_p0 = scmp.ne.s32.totalorder %s8744_s20, %s8740_s19 }
   0x7   : > { %p134_p1 = scmp.eq.s32.totalorder %s133_s26, 0  ;;  %p147_p2 = scmp.eq.s32.totalorder %s8816_s22, 1 }
   0x8   : > { %p152_p3 = scmp.ne.s32.totalorder %s8740_s19, %s8736_s18  ;;  %p153_p4 = scmp.eq.s32.totalorder %s7071_s23, 1 }
   0x9   : > { %s8831_s27 = scalar_select %p134_p1, %s8744_s20, %s136_s25  }
   0xa   : > { %p8833_p5 = por %p147_p2, %p146_p0  ;;  %p8837_p6 = por %p153_p4, %p152_p3 }
   0xb   : > { %p7072_p7 = scmp.ge.s32.totalorder %s8748_s21, 1  ;;  %p160_p8 = scmp.lt.s32.totalorder %s8748_s21, 3 }
   0xc   : > { %s10493_s29 = scalar_select %p8837_p6, 1, 0 }
   0xd   : > { %p8463_p9 = scmp.eq.s32.totalorder %s8816_s22, 0  ;;  %p8844_p10 = pnand %p7072_p7, %p160_p8 }
   0xe   : > { %s8750_s6 = smov [#allocation6]  }
   0xf   : > { %s178_s7 = sshll.u32 %s8750_s6, 4  ;;  %p8455_p11 = pneg %p8844_p10  ;;  %s179_s7 = int_to_ptr.vmem [resolvable:$true] %s178_s7 }
  0x10   : > { %s8669_s8 = scalar_lea.vmem %s179_s7, 9216  ;;  %p8677_p3 = scmp.lt.s32.totalorder %s179_s7, %s179_s7 }
  0x11   : > { %p8456_p12 = pnand %p8463_p9, %p8455_p11  ;;  %p8670_p0 = scmp.ne.s32.totalorder %s179_s7, %s8669_s8 }
  0x12   : > { %p8678_p4 = scmp.lt.s32.totalorder %s8669_s8, %s8669_s8 }
  0x13   : > { %p8660_p13 = pneg %p8456_p12 }
  0x14   : > { %p8679_p6 = por %p8678_p4, %p8677_p3 }
  0x15   : > { %p8672_p1 = pnand %p8670_p0, %p8660_p13 }
  0x17   : > { %p8673_p2 = pneg %p8672_p1 }
  0x19   : > { %p8680_p7 = pnand %p8679_p6, %p8673_p2 }
  0x1b   : > { %8683 = shalt.err (!%p8680_p7)
}
  0x1c   : > { %s8751_s9 = smov 64   ;;  %s8752_s10 = smov 4  }
  0x1d   : > { %8458 = dma.hbm_to_vmem [thread:$0]  (!%p8456_p12), %s10488_s3, 9216, %s179_s7, [#allocation7], %s8751_s9, %s8751_s9, %s8752_s10  }
  0x1e   : > { %205 = sbr.rel (%p8844_p10) target bundleno = 1259 (0x4eb), region = 40 }
  0x23   : > { %8727 = dma.done.wait (%p8463_p9), [#allocation7], 9216  }
  0x24   : > { %8729 = vsyncadd (%p8463_p9), [#allocation7], 4294958080  ;;  %vm239_vm0 = vcmask 31744   ;;  %v8753_v0 = vmov 0.0   ;;  %p233_p6 = scmp.lt.s32.totalorder %s8816_s22, 1  ;;  %vm599_vm1 = vcmask 27648  }
  0x25   : > { %241 = vst.msk [vmem:[#allocation2 + $0x8] sm:$0xff] %vm239_vm0, %v8753_v0  ;;  %240 = vst.msk [vmem:[#allocation2] sm:$0xff] %vm239_vm0, %v8753_v0  ;;  %s8754_s23 = smov 4   ;;  %s8755_s25 = smov 8   ;;  %vm2877_vm2 = vcmask 1041408   ;;  %vm856_vm3 = vcmask 60448  }
  0x26   : > { %242 = vst.msk [vmem:[#allocation2 + $0x10] sm:$0xff] %vm239_vm0, %v8753_v0  ;;  %243 = vst.msk [vmem:[#allocation2 + $0x18] sm:$0xff] %vm239_vm0, %v8753_v0  ;;  %s234_s13 = scalar_select %p233_p6, %s8816_s22, 1  ;;  %vm1113_vm4 = vcmask 93248   ;;  %vm1370_vm5 = vcmask 126048   ;;  %vm1627_vm6 = vcmask 158848  }
  0x27   : > { %244 = vst.msk [vmem:[#allocation2 + $0x20] sm:$0xff] %vm239_vm0, %v8753_v0  ;;  %245 = vst.msk [vmem:[#allocation2 + $0x28] sm:$0xff] %vm239_vm0, %v8753_v0  ;;  %s8756_s26 = smov 12   ;;  %s8757_s30 = smov 16   ;;  %vm1884_vm7 = vcmask 191648   ;;  %vm2142_vm8 = vcmask 224448  }
  0x28   : > { %246 = vst.msk [vmem:[#allocation2 + $0x30] sm:$0xff] %vm239_vm0, %v8753_v0  ;;  %247 = vst.msk [vmem:[#allocation2 + $0x38] sm:$0xff] %vm239_vm0, %v8753_v0  ;;  %s7754_s14 = sshll.u32 %s234_s13, 7  ;;  %s8758_s6 = smov 20   ;;  %vm2399_vm9 = vcmask 257248   ;;  %vm2656_vm10 = vcmask 290048  }
  0x29   : > { %248 = vst.msk [vmem:[#allocation2 + $0x40] sm:$0xff] %vm239_vm0, %v8753_v0  ;;  %249 = vst.msk [vmem:[#allocation2 + $0x48] sm:$0xff] %vm239_vm0, %v8753_v0  ;;  %s9032_s17 = scalar_lea.vmem %s10485_s0, %s7754_s14  ;;  %s8759_s7 = smov 24   ;;  %vm2828_vm11 = vcmask 293888   ;;  %vm4674_vm12 = vcmask 1041409   ;;  %vm4676_vm13 = vcmask 1042434  }
  0x2a   : > { %250 = vst.msk [vmem:[#allocation2 + $0x50] sm:$0xff] %vm239_vm0, %v8753_v0  ;;  %251 = vst.msk [vmem:[#allocation2 + $0x58] sm:$0xff] %vm239_vm0, %v8753_v0  ;;  %v8117_v1 = vld [vmem:[%s9032_s17] sm:$0xff]   ;;  %v8180_v2 = vld [vmem:[%s9032_s17 + $0x8] sm:$0xff]   ;;  %s8760_s8 = smov 28   ;;  %s8761_s13 = smov 32  }
  0x2b   : > { %252 = vst.msk [vmem:[#allocation2 + $0x60] sm:$0xff] %vm239_vm0, %v8753_v0  ;;  %253 = vst.msk [vmem:[#allocation2 + $0x68] sm:$0xff] %vm239_vm0, %v8753_v0  ;;  %v8181_v3 = vld [vmem:[%s9032_s17 + $0x10] sm:$0xff]   ;;  %v8118_v7 = vunpack.c.l.bf16 %v8117_v1  ;;  %v8119_v8 = vunpack.c.h.bf16 %v8117_v1  ;;  %v8122_v9 = vunpack.c.l.bf16 %v8180_v2  ;;  %v8123_v10 = vunpack.c.h.bf16 %v8180_v2  ;;  %v8182_v14 = vld [vmem:[%s9032_s17 + $0x18] sm:$0xff]   ;;  %s8115_s11 = sshll.u32 %s8816_s22, 7 }
  0x2c   : > { %254 = vst.msk [vmem:[#allocation2 + $0x70] sm:$0xff] %vm239_vm0, %v8753_v0  ;;  %255 = vst.msk [vmem:[#allocation2 + $0x78] sm:$0xff] %vm239_vm0, %v8753_v0  ;;  %v632_v4 = vld [vmem:[#allocation2 + $0x8] sm:$0xff]  ;;  %v8126_v13 = vunpack.c.l.bf16 %v8181_v3  ;;  %v8183_v15 = vld [vmem:[%s9032_s17 + $0x20] sm:$0xff]   ;;  %v8127_v18 = vunpack.c.h.bf16 %v8181_v3  ;;  %v8130_v19 = vunpack.c.l.bf16 %v8182_v14  ;;  %v8131_v20 = vunpack.c.h.bf16 %v8182_v14  ;;  %s10436_s16 = scalar_lea.hbm %s10490_s5, %s8115_s11 }
  0x2d   : > { %256 = vst.msk [vmem:[#allocation2 + $0x80] sm:$0xff] %vm239_vm0, %v8753_v0  ;;  %257 = vst.msk [vmem:[#allocation2 + $0x88] sm:$0xff] %vm239_vm0, %v8753_v0  ;;  %v633_v5 = vld [vmem:[#allocation2 + $0x10] sm:$0xff]  ;;  %v7787_v11 = vpack.c.bf16 %v632_v4, %v632_v4  ;;  %v439_v21 = vld [vmem:[#allocation2 + $0x7] sm:$0xff]  ;;  %v8134_v23 = vunpack.c.l.bf16 %v8183_v15  ;;  %v8135_v24 = vunpack.c.h.bf16 %v8183_v15  ;;  %vm10491_vm14 = vcmask 1043459  }
  0x2e   : > { %258 = vst.msk [vmem:[#allocation2 + $0x90] sm:$0xff] %vm239_vm0, %v8753_v0  ;;  %259 = vst.msk [vmem:[#allocation2 + $0x98] sm:$0xff] %vm239_vm0, %v8753_v0  ;;  %v890_v6 = vld [vmem:[#allocation2 + $0x11] sm:$0xff]  ;;  %v7788_v16 = vpack.c.bf16 %v633_v5, %v633_v5  ;;  %v889_v17 = vld [vmem:[#allocation2 + $0x9] sm:$0xff]  ;;  %v7755_v25 = vpack.c.bf16 %v439_v21, %v439_v21  ;;  %vm4680_vm15 = vcmask 1044484  }
  0x2f   : > { %260 = vst.msk [vmem:[#allocation2 + $0xa0] sm:$0xff] %vm239_vm0, %v8753_v0  ;;  %261 = vst.msk [vmem:[#allocation2 + $0xa8] sm:$0xff] %vm239_vm0, %v8753_v0  ;;  %v7820_v12 = vpack.c.bf16 %v890_v6, %v890_v6  ;;  %v440_v22 = vld [vmem:[#allocation2 + $0xf] sm:$0xff]  ;;  %760 = vrot.lane.b32.xlu0 %v7787_v11, %s8754_s23  ;;  %v7819_v27 = vpack.c.bf16 %v889_v17, %v889_v17 }
  0x30   : > { %262 = vst.msk [vmem:[#allocation2 + $0xb0] sm:$0xff] %vm239_vm0, %v8753_v0  ;;  %263 = vst.msk [vmem:[#allocation2 + $0xb8] sm:$0xff] %vm239_vm0, %v8753_v0  ;;  %v7756_v26 = vpack.c.bf16 %v440_v22, %v440_v22  ;;  %v8184_v56 = vld [vmem:[%s9032_s17 + $0x28] sm:$0xff]   ;;  %v8185_v6 = vld [vmem:[%s9032_s17 + $0x30] sm:$0xff]  }
  0x31   : > { %264 = vst.msk [vmem:[#allocation2 + $0xc0] sm:$0xff] %vm239_vm0, %v8753_v0  ;;  %265 = vst.msk [vmem:[#allocation2 + $0xc8] sm:$0xff] %vm239_vm0, %v8753_v0  ;;  %1019 = vrot.lane.b32.xlu1 %v7820_v12, %s8755_s25  ;;  %v8138_v57 = vunpack.c.l.bf16 %v8184_v56  ;;  %v8139_v58 = vunpack.c.h.bf16 %v8184_v56  ;;  %v8512_v17 = vld [vmem:[%s10486_s1 + $0x10] ss:$0 sps:$4 sm:$0x33]   ;;  %v8515_v22 = vld [vmem:[%s10486_s1] sm:$0xff]  }
  0x32   : > { %266 = vst.msk [vmem:[#allocation2 + $0xd0] sm:$0xff] %vm239_vm0, %v8753_v0  ;;  %267 = vst.msk [vmem:[#allocation2 + $0xd8] sm:$0xff] %vm239_vm0, %v8753_v0  ;;  %8448 = vmatprep.subr.msk.bf16.mxu0 %vm2877_vm2, %v8512_v17 }
  0x33   : > { %268 = vst.msk [vmem:[#allocation2 + $0xe0] sm:$0xff] %vm239_vm0, %v8753_v0  ;;  %269 = vst.msk [vmem:[#allocation2 + $0xe8] sm:$0xff] %vm239_vm0, %v8753_v0  ;;  %762 = vrot.lane.b32.xlu0 %v7788_v16, %s8754_s23 }
  0x34   : > { %270 = vst.msk [vmem:[#allocation2 + $0xf0] sm:$0xff] %vm239_vm0, %v8753_v0  ;;  %271 = vst.msk [vmem:[#allocation2 + $0xf8] sm:$0xff] %vm239_vm0, %v8753_v0 }
  0x35   : > { %272 = vst.msk [vmem:[#allocation2 + $0x100] sm:$0xff] %vm239_vm0, %v8753_v0  ;;  %273 = vst.msk [vmem:[#allocation2 + $0x108] sm:$0xff] %vm239_vm0, %v8753_v0 }
  0x36   : > { %274 = vst.msk [vmem:[#allocation2 + $0x110] sm:$0xff] %vm239_vm0, %v8753_v0  ;;  %275 = vst.msk [vmem:[#allocation2 + $0x118] sm:$0xff] %vm239_vm0, %v8753_v0 }
  0x37   : > { %276 = vst.msk [vmem:[#allocation2 + $0x120] sm:$0xff] %vm239_vm0, %v8753_v0  ;;  %277 = vst.msk [vmem:[#allocation2 + $0x128] sm:$0xff] %vm239_vm0, %v8753_v0  ;;  %1017 = vrot.lane.b32.xlu0 %v7819_v27, %s8755_s25 }
  0x38   : > { %278 = vst.msk [vmem:[#allocation2 + $0x130] sm:$0xff] %vm239_vm0, %v8753_v0  ;;  %279 = vst.msk [vmem:[#allocation2 + $0x138] sm:$0xff] %vm239_vm0, %v8753_v0 }
  0x39   : > { %280 = vst.msk [vmem:[#allocation2 + $0x140] sm:$0xff] %vm239_vm0, %v8753_v0  ;;  %281 = vst.msk [vmem:[#allocation2 + $0x148] sm:$0xff] %vm239_vm0, %v8753_v0 }
  0x3a   : > { %282 = vst.msk [vmem:[#allocation2 + $0x150] sm:$0xff] %vm239_vm0, %v8753_v0  ;;  %283 = vst.msk [vmem:[#allocation2 + $0x158] sm:$0xff] %vm239_vm0, %v8753_v0 }
  0x3b   : > { %284 = vst.msk [vmem:[#allocation2 + $0x160] sm:$0xff] %vm239_vm0, %v8753_v0  ;;  %285 = vst.msk [vmem:[#allocation2 + $0x168] sm:$0xff] %vm239_vm0, %v8753_v0 }
  0x3c   : > { %286 = vst.msk [vmem:[#allocation2 + $0x170] sm:$0xff] %vm239_vm0, %v8753_v0  ;;  %287 = vst.msk [vmem:[#allocation2 + $0x178] sm:$0xff] %vm239_vm0, %v8753_v0 }
  0x3d   : > { %288 = vst.msk [vmem:[#allocation2 + $0x180] sm:$0xff] %vm239_vm0, %v8753_v0  ;;  %289 = vst.msk [vmem:[#allocation2 + $0x188] sm:$0xff] %vm239_vm0, %v8753_v0 }
  0x3e   : > { %290 = vst.msk [vmem:[#allocation2 + $0x190] sm:$0xff] %vm239_vm0, %v8753_v0  ;;  %291 = vst.msk [vmem:[#allocation2 + $0x198] sm:$0xff] %vm239_vm0, %v8753_v0 }
  0x3f   : > { %292 = vst.msk [vmem:[#allocation2 + $0x1a0] sm:$0xff] %vm239_vm0, %v8753_v0  ;;  %293 = vst.msk [vmem:[#allocation2 + $0x1a8] sm:$0xff] %vm239_vm0, %v8753_v0 }
  0x40   : > { %294 = vst.msk [vmem:[#allocation2 + $0x1b0] sm:$0xff] %vm239_vm0, %v8753_v0  ;;  %295 = vst.msk [vmem:[#allocation2 + $0x1b8] sm:$0xff] %vm239_vm0, %v8753_v0 }
  0x41   : > { %296 = vst.msk [vmem:[#allocation2 + $0x1c0] sm:$0xff] %vm239_vm0, %v8753_v0  ;;  %297 = vst.msk [vmem:[#allocation2 + $0x1c8] sm:$0xff] %vm239_vm0, %v8753_v0 }
  0x42   : > { %298 = vst.msk [vmem:[#allocation2 + $0x1d0] sm:$0xff] %vm239_vm0, %v8753_v0  ;;  %299 = vst.msk [vmem:[#allocation2 + $0x1d8] sm:$0xff] %vm239_vm0, %v8753_v0 }
  0x43   : > { %300 = vst.msk [vmem:[#allocation2 + $0x1e0] sm:$0xff] %vm239_vm0, %v8753_v0  ;;  %301 = vst.msk [vmem:[#allocation2 + $0x1e8] sm:$0xff] %vm239_vm0, %v8753_v0 }
  0x44   : > { %302 = vst.msk [vmem:[#allocation2 + $0x1f0] sm:$0xff] %vm239_vm0, %v8753_v0  ;;  %303 = vst.msk [vmem:[#allocation2 + $0x1f8] sm:$0xff] %vm239_vm0, %v8753_v0 }
  0x45   : > { %304 = vst.msk [vmem:[#allocation2 + $0x200] sm:$0xff] %vm239_vm0, %v8753_v0  ;;  %305 = vst.msk [vmem:[#allocation2 + $0x208] sm:$0xff] %vm239_vm0, %v8753_v0 }
  0x46   : > { %306 = vst.msk [vmem:[#allocation2 + $0x210] sm:$0xff] %vm239_vm0, %v8753_v0  ;;  %307 = vst.msk [vmem:[#allocation2 + $0x218] sm:$0xff] %vm239_vm0, %v8753_v0 }
  0x47   : > { %308 = vst.msk [vmem:[#allocation2 + $0x220] sm:$0xff] %vm239_vm0, %v8753_v0  ;;  %309 = vst.msk [vmem:[#allocation2 + $0x228] sm:$0xff] %vm239_vm0, %v8753_v0 }
  0x48   : > { %310 = vst.msk [vmem:[#allocation2 + $0x230] sm:$0xff] %vm239_vm0, %v8753_v0  ;;  %311 = vst.msk [vmem:[#allocation2 + $0x238] sm:$0xff] %vm239_vm0, %v8753_v0 }
  0x49   : > { %312 = vst [vmem:[#allocation4] sm:$0xff] %v8753_v0  ;;  %313 = vst [vmem:[#allocation4 + $0x8] sm:$0xff] %v8753_v0 }
  0x4a   : > { %314 = vst [vmem:[#allocation4 + $0x10] sm:$0xff] %v8753_v0  ;;  %315 = vst [vmem:[#allocation4 + $0x18] sm:$0xff] %v8753_v0 }
  0x4b   : > { %317 = vst [vmem:[#allocation4 + $0x28] sm:$0xff] %v8753_v0  ;;  %318 = vst [vmem:[#allocation4 + $0x30] sm:$0xff] %v8753_v0 }
  0x4c   : > { %320 = vst [vmem:[#allocation4 + $0x40] sm:$0xff] %v8753_v0  ;;  %321 = vst [vmem:[#allocation4 + $0x48] sm:$0xff] %v8753_v0 }
  0x4d   : > { %323 = vst [vmem:[#allocation4 + $0x58] sm:$0xff] %v8753_v0  ;;  %324 = vst [vmem:[#allocation4 + $0x60] sm:$0xff] %v8753_v0 }
  0x4e   : > { %326 = vst [vmem:[#allocation4 + $0x70] sm:$0xff] %v8753_v0  ;;  %327 = vst [vmem:[#allocation4 + $0x78] sm:$0xff] %v8753_v0 }
  0x4f   : > { %329 = vst [vmem:[#allocation4 + $0x88] sm:$0xff] %v8753_v0  ;;  %330 = vst [vmem:[#allocation4 + $0x90] sm:$0xff] %v8753_v0 }
  0x50   : > { %332 = vst [vmem:[#allocation4 + $0xa0] sm:$0xff] %v8753_v0  ;;  %333 = vst [vmem:[#allocation4 + $0xa8] sm:$0xff] %v8753_v0 }
  0x51   : > { %335 = vst [vmem:[#allocation4 + $0xb8] sm:$0xff] %v8753_v0  ;;  %336 = vst [vmem:[#allocation4 + $0xc0] sm:$0xff] %v8753_v0 }
  0x52   : > { %338 = vst [vmem:[#allocation4 + $0xd0] sm:$0xff] %v8753_v0  ;;  %339 = vst [vmem:[#allocation4 + $0xd8] sm:$0xff] %v8753_v0 }
  0x53   : > { %340 = vst [vmem:[#allocation4 + $0xe0] sm:$0xff] %v8753_v0  ;;  %341 = vst [vmem:[#allocation4 + $0xe8] sm:$0xff] %v8753_v0 }
  0x54   : > { %407 = vst.msk [vmem:[#allocation2 + $0x28] sm:$0xff] %vm239_vm0, %v8118_v7  ;;  %408 = vst.msk [vmem:[#allocation2 + $0x30] sm:$0xff] %vm239_vm0, %v8119_v8  ;;  %v8142_v8 = vunpack.c.l.bf16 %v8185_v6 }
  0x55   : > { %409 = vst.msk [vmem:[#allocation2 + $0x48] sm:$0xff] %vm239_vm0, %v8122_v9  ;;  %410 = vst.msk [vmem:[#allocation2 + $0x50] sm:$0xff] %vm239_vm0, %v8123_v10  ;;  %v8143_v9 = vunpack.c.h.bf16 %v8185_v6 }
  0x56   : > { %411 = vst.msk [vmem:[#allocation2 + $0x68] sm:$0xff] %vm239_vm0, %v8126_v13  ;;  %412 = vst.msk [vmem:[#allocation2 + $0x70] sm:$0xff] %vm239_vm0, %v8127_v18 }
  0x57   : > { %413 = vst.msk [vmem:[#allocation2 + $0x88] sm:$0xff] %vm239_vm0, %v8130_v19  ;;  %414 = vst.msk [vmem:[#allocation2 + $0x90] sm:$0xff] %vm239_vm0, %v8131_v20  ;;  %v2879_v19 = vsel %vm2877_vm2, %v8512_v17, 0  ;;  %v8513_v20 = vld [vmem:[%s10486_s1 + $0x8] sm:$0xff]   ;;  %vm4684_vm2 = vcmask 1046534  }
  0x58   : > { %415 = vst.msk [vmem:[#allocation2 + $0xa8] sm:$0xff] %vm239_vm0, %v8134_v23  ;;  %416 = vst.msk [vmem:[#allocation2 + $0xb0] sm:$0xff] %vm239_vm0, %v8135_v24  ;;  %8387 = vmatpush3.bf16.msra.mxu0 %v2879_v19 }
  0x59   : > { %600 = vst.msk [vmem:[#allocation3] sm:$0xf] %vm599_vm1, %v7755_v25  ;;  %601 = vst.msk [vmem:[#allocation3 + $0x4] sm:$0xf] %vm599_vm1, %v7756_v26  ;;  %8388 = vmatprep.subr.bf16.mxu0 %v8513_v20  ;;  %v8186_v26 = vld [vmem:[%s9032_s17 + $0x38] sm:$0xff]  }
  0x5a   : > { %417 = vst.msk [vmem:[#allocation2 + $0xc8] sm:$0xff] %vm239_vm0, %v8138_v57  ;;  %418 = vst.msk [vmem:[#allocation2 + $0xd0] sm:$0xff] %vm239_vm0, %v8139_v58  ;;  %v8146_v27 = vunpack.c.l.bf16 %v8186_v26 }
  0x5b   : > { %v634_v28 = vld [vmem:[#allocation2 + $0x28] sm:$0xff]  ;;  %v635_v29 = vld [vmem:[#allocation2 + $0x30] sm:$0xff]  ;;  %419 = vst.msk [vmem:[#allocation2 + $0xe8] sm:$0xff] %vm239_vm0, %v8142_v8  ;;  %420 = vst.msk [vmem:[#allocation2 + $0xf0] sm:$0xff] %vm239_vm0, %v8143_v9 }
  0x5c   : > { %v7789_v30 = vpack.c.bf16 %v634_v28, %v634_v28  ;;  %v891_v31 = vld [vmem:[#allocation2 + $0x29] sm:$0xff]  ;;  %v7790_v39 = vpack.c.bf16 %v635_v29, %v635_v29  ;;  %v892_v42 = vld [vmem:[#allocation2 + $0x31] sm:$0xff]  ;;  %8389 = vmatpush3.bf16.msra.mxu0 %v8513_v20  ;;  %v8147_v28 = vunpack.c.h.bf16 %v8186_v26  ;;  %421 = vst.msk [vmem:[#allocation2 + $0x108] sm:$0xff] %vm239_vm0, %v8146_v27 }
  0x5d   : > { %v1147_v32 = vld [vmem:[#allocation2 + $0x2f] sm:$0xff]  ;;  %v1146_v33 = vld [vmem:[#allocation2 + $0x27] sm:$0xff]  ;;  %v7821_v34 = vpack.c.bf16 %v891_v31, %v891_v31  ;;  %v7822_v49 = vpack.c.bf16 %v892_v42, %v892_v42  ;;  %8390 = vmatprep.subr.bf16.mxu0 %v8515_v22 }
  0x5e   : > { %v7852_v35 = vpack.c.bf16 %v1147_v32, %v1147_v32  ;;  %v7851_v36 = vpack.c.bf16 %v1146_v33, %v1146_v33  ;;  %v1149_v37 = vld [vmem:[#allocation2 + $0x4f] sm:$0xff]  ;;  %v1148_v38 = vld [vmem:[#allocation2 + $0x47] sm:$0xff]  ;;  %764 = vrot.lane.b32.xlu1 %v7789_v30, %s8754_s23  ;;  %422 = vst.msk [vmem:[#allocation2 + $0x110] sm:$0xff] %vm239_vm0, %v8147_v28 }
  0x5f   : > { %v9056_v40 = vpack.c.bf16 %v1149_v37, %v1149_v37  ;;  %v9058_v41 = vpack.c.bf16 %v1148_v38, %v1148_v38  ;;  %v1921_v43 = vld [vmem:[#allocation2 + $0x6f] sm:$0xff]  ;;  %v1920_v44 = vld [vmem:[#allocation2 + $0x67] sm:$0xff]  ;;  %1021 = vrot.lane.b32.xlu0 %v7821_v34, %s8755_s25 }
  0x60   : > { %602 = vst.msk [vmem:[#allocation3 + $0x8] sm:$0xf] %vm599_vm1, %v7851_v36  ;;  %603 = vst.msk [vmem:[#allocation3 + $0xc] sm:$0xf] %vm599_vm1, %v7852_v35  ;;  %v9062_v45 = vpack.c.bf16 %v1921_v43, %v1921_v43  ;;  %v9064_v46 = vpack.c.bf16 %v1920_v44, %v1920_v44  ;;  %v1153_v47 = vld [vmem:[#allocation2 + $0x8f] sm:$0xff]  ;;  %v1152_v48 = vld [vmem:[#allocation2 + $0x87] sm:$0xff]  ;;  %8391 = vmatpush3.bf16.msra.mxu0 %v8515_v22 }
  0x61   : > { %605 = vst.msk [vmem:[#allocation3 + $0x14] sm:$0xf] %vm599_vm1, %v9056_v40  ;;  %604 = vst.msk [vmem:[#allocation3 + $0x10] sm:$0xf] %vm599_vm1, %v9058_v41  ;;  %v9072_v50 = vpack.c.bf16 %v1153_v47, %v1153_v47  ;;  %v9074_v51 = vpack.c.bf16 %v1152_v48, %v1152_v48  ;;  %v1925_v52 = vld [vmem:[#allocation2 + $0xaf] sm:$0xff]  ;;  %v1924_v53 = vld [vmem:[#allocation2 + $0xa7] sm:$0xff] }
  0x62   : > { %766 = vrot.lane.b32.xlu1 %v7790_v39, %s8754_s23  ;;  %607 = vst.msk [vmem:[#allocation3 + $0x1c] sm:$0xf] %vm599_vm1, %v9062_v45  ;;  %606 = vst.msk [vmem:[#allocation3 + $0x18] sm:$0xf] %vm599_vm1, %v9064_v46  ;;  %v9080_v54 = vpack.c.bf16 %v1925_v52, %v1925_v52  ;;  %v9082_v55 = vpack.c.bf16 %v1924_v53, %v1924_v53  ;;  %v1405_v59 = vld [vmem:[#allocation2 + $0x48] sm:$0xff]  ;;  %v1406_v60 = vld [vmem:[#allocation2 + $0x50] sm:$0xff] }
  0x63   : > { %609 = vst.msk [vmem:[#allocation3 + $0x24] sm:$0xf] %vm599_vm1, %v9072_v50  ;;  %608 = vst.msk [vmem:[#allocation3 + $0x20] sm:$0xf] %vm599_vm1, %v9074_v51  ;;  %1274 = vrot.lane.b32.xlu0 %v7851_v36, %s8756_s26  ;;  %v7885_v61 = vpack.c.bf16 %v1405_v59, %v1405_v59  ;;  %v1157_v62 = vld [vmem:[#allocation2 + $0xcf] sm:$0xff]  ;;  %v1156_v63 = vld [vmem:[#allocation2 + $0xc7] sm:$0xff]  ;;  %v7886_v2 = vpack.c.bf16 %v1406_v60, %v1406_v60 }
  0x64   : > { %611 = vst.msk [vmem:[#allocation3 + $0x2c] sm:$0xf] %vm599_vm1, %v9080_v54  ;;  %610 = vst.msk [vmem:[#allocation3 + $0x28] sm:$0xf] %vm599_vm1, %v9082_v55  ;;  %v9103_v0 = vpack.c.bf16 %v1157_v62, %v1157_v62  ;;  %v9105_v1 = vpack.c.bf16 %v1156_v63, %v1156_v63  ;;  %v1662_v3 = vld [vmem:[#allocation2 + $0x49] sm:$0xff]  ;;  %v1663_v4 = vld [vmem:[#allocation2 + $0x51] sm:$0xff] }
  0x65   : > { %v7917_v5 = vpack.c.bf16 %v1662_v3, %v1662_v3  ;;  %v7918_v7 = vpack.c.bf16 %v1663_v4, %v1663_v4  ;;  %v2177_v10 = vld [vmem:[#allocation2 + $0x68] sm:$0xff]  ;;  %v2178_v15 = vld [vmem:[#allocation2 + $0x70] sm:$0xff] }
  0x66   : > { %1023 = vrot.lane.b32.xlu1 %v7822_v49, %s8755_s25  ;;  %613 = vst.msk [vmem:[#allocation3 + $0x34] sm:$0xf] %vm599_vm1, %v9103_v0  ;;  %612 = vst.msk [vmem:[#allocation3 + $0x30] sm:$0xf] %vm599_vm1, %v9105_v1  ;;  %v1929_v11 = vld [vmem:[#allocation2 + $0xef] sm:$0xff]  ;;  %v1928_v12 = vld [vmem:[#allocation2 + $0xe7] sm:$0xff]  ;;  %v7981_v16 = vpack.c.bf16 %v2177_v10, %v2177_v10  ;;  %v7982_v18 = vpack.c.bf16 %v2178_v15, %v2178_v15 }
  0x67   : > { %1278 = vrot.lane.b32.xlu0 %v9058_v41, %s8756_s26  ;;  %v9127_v13 = vpack.c.bf16 %v1929_v11, %v1929_v11  ;;  %v9129_v14 = vpack.c.bf16 %v1928_v12, %v1928_v12  ;;  %v2434_v21 = vld [vmem:[#allocation2 + $0x69] sm:$0xff]  ;;  %v2435_v23 = vld [vmem:[#allocation2 + $0x71] sm:$0xff] }
  0x68   : > { %v8013_v24 = vpack.c.bf16 %v2434_v21, %v2434_v21  ;;  %v8014_v25 = vpack.c.bf16 %v2435_v23, %v2435_v23  ;;  %v1409_v29 = vld [vmem:[#allocation2 + $0x88] sm:$0xff]  ;;  %v2439_v62 = vld [vmem:[#allocation2 + $0xb1] sm:$0xff] }
  0x69   : > { %615 = vst.msk [vmem:[#allocation3 + $0x3c] sm:$0xf] %vm599_vm1, %v9127_v13  ;;  %614 = vst.msk [vmem:[#allocation3 + $0x38] sm:$0xf] %vm599_vm1, %v9129_v14  ;;  %v1160_v31 = vld [vmem:[#allocation2 + $0x107] sm:$0xff]  ;;  %v1414_v22 = vld [vmem:[#allocation2 + $0xd0] sm:$0xff] }
  0x6a   : > { %1276 = vrot.lane.b32.xlu1 %v7852_v35, %s8756_s26  ;;  %v9173_v33 = vpack.c.bf16 %v1160_v31, %v1160_v31  ;;  %v1410_v35 = vld [vmem:[#allocation2 + $0x90] sm:$0xff]  ;;  %v2181_v44 = vld [vmem:[#allocation2 + $0xa8] sm:$0xff] }
  0x6b   : > { %1531 = vrot.lane.b32.xlu0 %v7789_v30, %s8757_s30  ;;  %v1161_v30 = vld [vmem:[#allocation2 + $0x10f] sm:$0xff]  ;;  %v7890_v36 = vpack.c.bf16 %v1410_v35, %v1410_v35 }
  0x6c   : > { %v9171_v32 = vpack.c.bf16 %v1161_v30, %v1161_v30  ;;  %616 = vst.msk [vmem:[#allocation3 + $0x40] sm:$0xf] %vm599_vm1, %v9173_v33  ;;  %v1666_v37 = vld [vmem:[#allocation2 + $0x89] sm:$0xff] }
  0x6d   : > { %v9185_v38 = vpack.c.bf16 %v1666_v37, %v1666_v37  ;;  %v2438_v57 = vld [vmem:[#allocation2 + $0xa9] sm:$0xff] }
  0x6e   : > { %1280 = vrot.lane.b32.xlu1 %v9056_v40, %s8756_s26  ;;  %617 = vst.msk [vmem:[#allocation3 + $0x44] sm:$0xf] %vm599_vm1, %v9171_v32  ;;  %v9232_v60 = vpack.c.bf16 %v2438_v57, %v2438_v57  ;;  %v8188_v9 = vld [vmem:[%s9032_s17 + $0x48] sm:$0xff]   ;;  %v8189_v31 = vld [vmem:[%s9032_s17 + $0x50] sm:$0xff]  }
  0x6f   : > { %1535 = vrot.lane.b32.xlu0 %v7885_v61, %s8757_s30  ;;  %v8154_v10 = vunpack.c.l.bf16 %v8188_v9  ;;  %v8155_v11 = vunpack.c.h.bf16 %v8188_v9  ;;  %v8158_v35 = vunpack.c.l.bf16 %v8189_v31 }
  0x71   : > { %425 = vst.msk [vmem:[#allocation2 + $0x148] sm:$0xff] %vm239_vm0, %v8154_v10  ;;  %426 = vst.msk [vmem:[#allocation2 + $0x150] sm:$0xff] %vm239_vm0, %v8155_v11 }
  0x72   : > { %1533 = vrot.lane.b32.xlu1 %v7790_v39, %s8757_s30  ;;  %v1667_v39 = vld [vmem:[#allocation2 + $0x91] sm:$0xff]  ;;  %427 = vst.msk [vmem:[#allocation2 + $0x168] sm:$0xff] %vm239_vm0, %v8158_v35 }
  0x73   : > { %1788 = vrot.lane.b32.xlu0 %v7821_v34, %s8758_s6  ;;  %v7889_v34 = vpack.c.bf16 %v1409_v29, %v1409_v29  ;;  %v1671_v29 = vld [vmem:[#allocation2 + $0xd1] sm:$0xff] }
  0x76   : > { %1537 = vrot.lane.b32.xlu1 %v7886_v2, %s8757_s30 }
  0x77   : > { %1792 = vrot.lane.b32.xlu0 %v7917_v5, %s8758_s6 }
  0x7a   : > { %1790 = vrot.lane.b32.xlu1 %v7822_v49, %s8758_s6  ;;  %v9209_v49 = vpack.c.bf16 %v2181_v44, %v2181_v44 }
  0x7b   : > { %2046 = vrot.lane.b32.xlu0 %v9058_v41, %s8759_s7  ;;  %v9192_v41 = vpack.c.bf16 %v1667_v39, %v1667_v39 }
  0x7e   : > { %1794 = vrot.lane.b32.xlu1 %v7918_v7, %s8758_s6 }
  0x7f   : > { %2050 = vrot.lane.b32.xlu0 %v9064_v46, %s8759_s7 }
  0x82   : > { %2048 = vrot.lane.b32.xlu1 %v9056_v40, %s8759_s7  ;;  %v8187_v40 = vld [vmem:[%s9032_s17 + $0x40] sm:$0xff]  }
  0x83   : > { %2303 = vrot.lane.b32.xlu0 %v7885_v61, %s8760_s8  ;;  %v8150_v42 = vunpack.c.l.bf16 %v8187_v40  ;;  %v8151_v43 = vunpack.c.h.bf16 %v8187_v40 }
  0x85   : > { %423 = vst.msk [vmem:[#allocation2 + $0x128] sm:$0xff] %vm239_vm0, %v8150_v42  ;;  %424 = vst.msk [vmem:[#allocation2 + $0x130] sm:$0xff] %vm239_vm0, %v8151_v43 }
  0x86   : > { %2052 = vrot.lane.b32.xlu1 %v9062_v45, %s8759_s7 }
  0x87   : > { %2307 = vrot.lane.b32.xlu0 %v7981_v16, %s8760_s8 }
  0x8a   : > { %2305 = vrot.lane.b32.xlu1 %v7886_v2, %s8760_s8 }
  0x8b   : > { %2560 = vrot.lane.b32.xlu0 %v7917_v5, %s8761_s13 }
  0x8e   : > { %2309 = vrot.lane.b32.xlu1 %v7982_v18, %s8760_s8 }
  0x8f   : > { %768 = vrot.lane.b32.xlu0 %v7885_v61, %s8754_s23 }
  0x92   : > { %2562 = vrot.lane.b32.xlu1 %v7918_v7, %s8761_s13 }
  0x93   : > { %2564 = vrot.lane.b32.xlu0 %v8013_v24, %s8761_s13 }
  0x96   : > { %770 = vrot.lane.b32.xlu1 %v7886_v2, %s8754_s23  ;;  %v9241_v2 = vpack.c.bf16 %v2439_v62, %v2439_v62 }
  0x97   : > { %772 = vrot.lane.b32.xlu0 %v7981_v16, %s8754_s23 }
  0x9a   : > { %2566 = vrot.lane.b32.xlu1 %v8014_v25, %s8761_s13 }
  0x9b   : > { %1025 = vrot.lane.b32.xlu0 %v7917_v5, %s8755_s25 }
  0x9e   : > { %774 = vrot.lane.b32.xlu1 %v7982_v18, %s8754_s23 }
  0x9f   : > { %1029 = vrot.lane.b32.xlu0 %v8013_v24, %s8755_s25 }
  0xa2   : > { %1027 = vrot.lane.b32.xlu1 %v7918_v7, %s8755_s25 }
  0xa3   : > { %1282 = vrot.lane.b32.xlu0 %v9064_v46, %s8756_s26  ;;  %v1932_v46 = vld [vmem:[#allocation2 + $0x127] sm:$0xff]  ;;  %v1020_v52 = vpop.permute.xlu1 %1019 }
  0xa4   : > { %v9206_v48 = vpack.c.bf16 %v1932_v46, %v1932_v46 }
  0xa6   : > { %1031 = vrot.lane.b32.xlu1 %v8014_v25, %s8755_s25  ;;  %618 = vst.msk [vmem:[#allocation3 + $0x48] sm:$0xf] %vm599_vm1, %v9206_v48 }
  0xa7   : > { %1286 = vrot.lane.b32.xlu0 %v9074_v51, %s8756_s26 }
  0xaa   : > { %1284 = vrot.lane.b32.xlu1 %v9062_v45, %s8756_s26  ;;  %v1933_v45 = vld [vmem:[#allocation2 + $0x12f] sm:$0xff] }
  0xab   : > { %1539 = vrot.lane.b32.xlu0 %v7981_v16, %s8757_s30  ;;  %v9204_v47 = vpack.c.bf16 %v1933_v45, %v1933_v45  ;;  %v2186_v45 = vld [vmem:[#allocation2 + $0xf0] sm:$0xff] }
  0xad   : > { %619 = vst.msk [vmem:[#allocation3 + $0x4c] sm:$0xf] %vm599_vm1, %v9204_v47 }
  0xae   : > { %1288 = vrot.lane.b32.xlu1 %v9072_v50, %s8756_s26 }
  0xaf   : > { %1543 = vrot.lane.b32.xlu0 %v7889_v34, %s8757_s30 }
  0xb2   : > { %1541 = vrot.lane.b32.xlu1 %v7982_v18, %s8757_s30  ;;  %v1413_v18 = vld [vmem:[#allocation2 + $0xc8] sm:$0xff] }
  0xb3   : > { %1796 = vrot.lane.b32.xlu0 %v8013_v24, %s8758_s6  ;;  %v1670_v24 = vld [vmem:[#allocation2 + $0xc9] sm:$0xff] }
  0xb4   : > { %v9296_v27 = vpack.c.bf16 %v1670_v24, %v1670_v24 }
  0xb6   : > { %1545 = vrot.lane.b32.xlu1 %v7890_v36, %s8757_s30 }
  0xb7   : > { %1800 = vrot.lane.b32.xlu0 %v9185_v38, %s8758_s6 }
  0xba   : > { %1798 = vrot.lane.b32.xlu1 %v8014_v25, %s8758_s6 }
  0xbb   : > { %2054 = vrot.lane.b32.xlu0 %v9074_v51, %s8759_s7  ;;  %v2182_v51 = vld [vmem:[#allocation2 + $0xb0] sm:$0xff] }
  0xbc   : > { %v9221_v53 = vpack.c.bf16 %v2182_v51, %v2182_v51 }
  0xbe   : > { %1802 = vrot.lane.b32.xlu1 %v9192_v41, %s8758_s6 }
  0xbf   : > { %2058 = vrot.lane.b32.xlu0 %v9082_v55, %s8759_s7 }
  0xc2   : > { %2056 = vrot.lane.b32.xlu1 %v9072_v50, %s8759_s7  ;;  %v761_v50 = vpop.permute.xlu0 %760 }
  0xc3   : > { %2311 = vrot.lane.b32.xlu0 %v7889_v34, %s8760_s8  ;;  %857 = vst.msk [vmem:[#allocation3] sm:$0xf] %vm856_vm3, %v761_v50 }
  0xc6   : > { %2060 = vrot.lane.b32.xlu1 %v9080_v54, %s8759_s7  ;;  %v763_v56 = vpop.permute.xlu0 %762 }
  0xc7   : > { %2315 = vrot.lane.b32.xlu0 %v9209_v49, %s8760_s8  ;;  %858 = vst.msk [vmem:[#allocation3 + $0x4] sm:$0xf] %vm856_vm3, %v763_v56 }
  0xc8   : > { %1115 = vst.msk [vmem:[#allocation3 + $0x4] sm:$0xf] %vm1113_vm4, %v1020_v52  ;;  %v2442_v52 = vld [vmem:[#allocation2 + $0xe9] sm:$0xff] }
  0xc9   : > { %v9350_v57 = vpack.c.bf16 %v2442_v52, %v2442_v52 }
  0xca   : > { %2313 = vrot.lane.b32.xlu1 %v7890_v36, %s8760_s8  ;;  %v1018_v58 = vpop.permute.xlu0 %1017 }
  0xcb   : > { %2568 = vrot.lane.b32.xlu0 %v9185_v38, %s8761_s13  ;;  %1114 = vst.msk [vmem:[#allocation3] sm:$0xf] %vm1113_vm4, %v1018_v58 }
  0xce   : > { %2317 = vrot.lane.b32.xlu1 %v9221_v53, %s8760_s8 }
  0xcf   : > { %776 = vrot.lane.b32.xlu0 %v7889_v34, %s8754_s23  ;;  %v9307_v34 = vpack.c.bf16 %v1671_v29, %v1671_v29 }
  0xd0   : > { %v765_v59 = vpop.permute.xlu1 %764 }
  0xd1   : > { %859 = vst.msk [vmem:[#allocation3 + $0x8] sm:$0xf] %vm856_vm3, %v765_v59  ;;  %v1022_v61 = vpop.permute.xlu0 %1021  ;;  %v2443_v59 = vld [vmem:[#allocation2 + $0xf1] sm:$0xff] }
  0xd2   : > { %2570 = vrot.lane.b32.xlu1 %v9192_v41, %s8761_s13  ;;  %1116 = vst.msk [vmem:[#allocation3 + $0x8] sm:$0xf] %vm1113_vm4, %v1022_v61  ;;  %v9361_v62 = vpack.c.bf16 %v2443_v59, %v2443_v59 }
  0xd3   : > { %2572 = vrot.lane.b32.xlu0 %v9232_v60, %s8761_s13 }
  0xd4   : > { %v767_v63 = vpop.permute.xlu1 %766 }
  0xd5   : > { %860 = vst.msk [vmem:[#allocation3 + $0xc] sm:$0xf] %vm856_vm3, %v767_v63  ;;  %v1275_v3 = vpop.permute.xlu0 %1274 }
  0xd6   : > { %778 = vrot.lane.b32.xlu1 %v7890_v36, %s8754_s23  ;;  %1371 = vst.msk [vmem:[#allocation3] sm:$0xf] %vm1370_vm5, %v1275_v3  ;;  %v8159_v36 = vunpack.c.h.bf16 %v8189_v31 }
  0xd7   : > { %780 = vrot.lane.b32.xlu0 %v9209_v49, %s8754_s23 }
  0xd8   : > { %v1024_v4 = vpop.permute.xlu1 %1023  ;;  %428 = vst.msk [vmem:[#allocation2 + $0x170] sm:$0xff] %vm239_vm0, %v8159_v36 }
  0xd9   : > { %1117 = vst.msk [vmem:[#allocation3 + $0xc] sm:$0xf] %vm1113_vm4, %v1024_v4  ;;  %v1279_v5 = vpop.permute.xlu0 %1278 }
  0xda   : > { %2574 = vrot.lane.b32.xlu1 %v9241_v2, %s8761_s13  ;;  %1373 = vst.msk [vmem:[#allocation3 + $0x8] sm:$0xf] %vm1370_vm5, %v1279_v5 }
  0xdb   : > { %1033 = vrot.lane.b32.xlu0 %v9185_v38, %s8755_s25 }
  0xdc   : > { %v1277_v6 = vpop.permute.xlu1 %1276 }
  0xdd   : > { %1372 = vst.msk [vmem:[#allocation3 + $0x4] sm:$0xf] %vm1370_vm5, %v1277_v6  ;;  %v1532_v7 = vpop.permute.xlu0 %1531 }
  0xde   : > { %782 = vrot.lane.b32.xlu1 %v9221_v53, %s8754_s23  ;;  %1628 = vst.msk [vmem:[#allocation3] sm:$0xf] %vm1627_vm6, %v1532_v7  ;;  %v8190_v7 = vld [vmem:[%s9032_s17 + $0x58] sm:$0xff]  }
  0xdf   : > { %1037 = vrot.lane.b32.xlu0 %v9232_v60, %s8755_s25  ;;  %v8163_v9 = vunpack.c.h.bf16 %v8190_v7 }
  0xe0   : > { %v1281_v8 = vpop.permute.xlu1 %1280 }
  0xe1   : > { %1374 = vst.msk [vmem:[#allocation3 + $0xc] sm:$0xf] %vm1370_vm5, %v1281_v8  ;;  %v1536_v12 = vpop.permute.xlu0 %1535  ;;  %v8162_v8 = vunpack.c.l.bf16 %v8190_v7 }
  0xe2   : > { %1035 = vrot.lane.b32.xlu1 %v9192_v41, %s8755_s25  ;;  %1630 = vst.msk [vmem:[#allocation3 + $0x8] sm:$0xf] %vm1627_vm6, %v1536_v12  ;;  %v2185_v41 = vld [vmem:[#allocation2 + $0xe8] sm:$0xff] }
  0xe3   : > { %1290 = vrot.lane.b32.xlu0 %v9082_v55, %s8756_s26  ;;  %v9280_v55 = vpack.c.bf16 %v1413_v18, %v1413_v18  ;;  %429 = vst.msk [vmem:[#allocation2 + $0x188] sm:$0xff] %vm239_vm0, %v8162_v8  ;;  %430 = vst.msk [vmem:[#allocation2 + $0x190] sm:$0xff] %vm239_vm0, %v8163_v9  ;;  %v8192_v8 = vld [vmem:[%s9032_s17 + $0x68] sm:$0xff]  }
  0xe4   : > { %v1534_v15 = vpop.permute.xlu1 %1533  ;;  %v1421_v9 = vld [vmem:[#allocation2 + $0x148] sm:$0xff] }
  0xe5   : > { %1629 = vst.msk [vmem:[#allocation3 + $0x4] sm:$0xf] %vm1627_vm6, %v1534_v15  ;;  %v1789_v16 = vpop.permute.xlu0 %1788 }
  0xe6   : > { %1039 = vrot.lane.b32.xlu1 %v9241_v2, %s8755_s25  ;;  %1885 = vst.msk [vmem:[#allocation3] sm:$0xf] %vm1884_vm7, %v1789_v16  ;;  %v1417_v16 = vld [vmem:[#allocation2 + $0x108] sm:$0xff] }
  0xe7   : > { %1294 = vrot.lane.b32.xlu0 %v9105_v1, %s8756_s26 }
  0xe8   : > { %v1538_v17 = vpop.permute.xlu1 %1537 }
  0xe9   : > { %1631 = vst.msk [vmem:[#allocation3 + $0xc] sm:$0xf] %vm1627_vm6, %v1538_v17  ;;  %v1793_v19 = vpop.permute.xlu0 %1792 }
  0xea   : > { %1292 = vrot.lane.b32.xlu1 %v9080_v54, %s8756_s26  ;;  %1887 = vst.msk [vmem:[#allocation3 + $0x8] sm:$0xf] %vm1884_vm7, %v1793_v19  ;;  %v9290_v54 = vpack.c.bf16 %v1414_v22, %v1414_v22 }
  0xeb   : > { %1547 = vrot.lane.b32.xlu0 %v9209_v49, %s8757_s30 }
  0xec   : > { %v1791_v20 = vpop.permute.xlu1 %1790 }
  0xed   : > { %1886 = vst.msk [vmem:[#allocation3 + $0x4] sm:$0xf] %vm1884_vm7, %v1791_v20  ;;  %v2047_v21 = vpop.permute.xlu0 %2046  ;;  %v1418_v20 = vld [vmem:[#allocation2 + $0x110] sm:$0xff] }
  0xee   : > { %1296 = vrot.lane.b32.xlu1 %v9103_v0, %s8756_s26  ;;  %2143 = vst.msk [vmem:[#allocation3] sm:$0xf] %vm2142_vm8, %v2047_v21  ;;  %v1674_v21 = vld [vmem:[#allocation2 + $0x109] sm:$0xff] }
  0xef   : > { %1551 = vrot.lane.b32.xlu0 %v9280_v55, %s8757_s30 }
  0xf0   : > { %v1795_v23 = vpop.permute.xlu1 %1794 }
  0xf1   : > { %1888 = vst.msk [vmem:[#allocation3 + $0xc] sm:$0xf] %vm1884_vm7, %v1795_v23  ;;  %v2051_v25 = vpop.permute.xlu0 %2050 }
  0xf2   : > { %1549 = vrot.lane.b32.xlu1 %v9221_v53, %s8757_s30  ;;  %2145 = vst.msk [vmem:[#allocation3 + $0x8] sm:$0xf] %vm2142_vm8, %v2051_v25  ;;  %v1675_v25 = vld [vmem:[#allocation2 + $0x111] sm:$0xff] }
  0xf3   : > { %1804 = vrot.lane.b32.xlu0 %v9232_v60, %s8758_s6 }
  0xf4   : > { %v2049_v26 = vpop.permute.xlu1 %2048 }
  0xf5   : > { %2144 = vst.msk [vmem:[#allocation3 + $0x4] sm:$0xf] %vm2142_vm8, %v2049_v26  ;;  %v2304_v28 = vpop.permute.xlu0 %2303 }
  0xf6   : > { %1553 = vrot.lane.b32.xlu1 %v9290_v54, %s8757_s30  ;;  %2400 = vst.msk [vmem:[#allocation3] sm:$0xf] %vm2399_vm9, %v2304_v28  ;;  %v9427_v28 = vpack.c.bf16 %v1675_v25, %v1675_v25 }
  0xf7   : > { %1808 = vrot.lane.b32.xlu0 %v9296_v27, %s8758_s6 }
  0xf8   : > { %v2053_v30 = vpop.permute.xlu1 %2052 }
  0xf9   : > { %2146 = vst.msk [vmem:[#allocation3 + $0xc] sm:$0xf] %vm2142_vm8, %v2053_v30  ;;  %v2308_v37 = vpop.permute.xlu0 %2307 }
  0xfa   : > { %1806 = vrot.lane.b32.xlu1 %v9241_v2, %s8758_s6  ;;  %2402 = vst.msk [vmem:[#allocation3 + $0x8] sm:$0xf] %vm2399_vm9, %v2308_v37  ;;  %v2189_v37 = vld [vmem:[#allocation2 + $0x128] sm:$0xff] }
  0xfb   : > { %2062 = vrot.lane.b32.xlu0 %v9105_v1, %s8759_s7  ;;  %v9327_v1 = vpack.c.bf16 %v2185_v41, %v2185_v41  ;;  %v2190_v41 = vld [vmem:[#allocation2 + $0x130] sm:$0xff] }
  0xfc   : > { %v2306_v38 = vpop.permute.xlu1 %2305 }
  0xfd   : > { %2401 = vst.msk [vmem:[#allocation3 + $0x4] sm:$0xf] %vm2399_vm9, %v2306_v38  ;;  %v2561_v39 = vpop.permute.xlu0 %2560 }
  0xfe   : > { %1810 = vrot.lane.b32.xlu1 %v9307_v34, %s8758_s6  ;;  %2657 = vst.msk [vmem:[#allocation3] sm:$0xf] %vm2656_vm10, %v2561_v39 }
  0xff   : > { %2066 = vrot.lane.b32.xlu0 %v9129_v14, %s8759_s7 }
 0x100   : > { %v2310_v40 = vpop.permute.xlu1 %2309 }
 0x101   : > { %2403 = vst.msk [vmem:[#allocation3 + $0xc] sm:$0xf] %vm2399_vm9, %v2310_v40  ;;  %v769_v42 = vpop.permute.xlu0 %768 }
 0x102   : > { %2064 = vrot.lane.b32.xlu1 %v9103_v0, %s8759_s7  ;;  %861 = vst.msk [vmem:[#allocation3 + $0x10] sm:$0xf] %vm856_vm3, %v769_v42  ;;  %v9337_v0 = vpack.c.bf16 %v2186_v45, %v2186_v45  ;;  %v2446_v45 = vld [vmem:[#allocation2 + $0x129] sm:$0xff] }
 0x103   : > { %2319 = vrot.lane.b32.xlu0 %v9280_v55, %s8760_s8 }
 0x104   : > { %v2563_v43 = vpop.permute.xlu1 %2562 }
 0x105   : > { %2658 = vst.msk [vmem:[#allocation3 + $0x4] sm:$0xf] %vm2656_vm10, %v2563_v43  ;;  %v2565_v44 = vpop.permute.xlu0 %2564 }
 0x106   : > { %2068 = vrot.lane.b32.xlu1 %v9127_v13, %s8759_s7  ;;  %2659 = vst.msk [vmem:[#allocation3 + $0x8] sm:$0xf] %vm2656_vm10, %v2565_v44 }
 0x107   : > { %2323 = vrot.lane.b32.xlu0 %v9327_v1, %s8760_s8 }
 0x108   : > { %v771_v46 = vpop.permute.xlu1 %770 }
 0x109   : > { %862 = vst.msk [vmem:[#allocation3 + $0x14] sm:$0xf] %vm856_vm3, %v771_v46  ;;  %v773_v49 = vpop.permute.xlu0 %772 }
 0x10a   : > { %2321 = vrot.lane.b32.xlu1 %v9290_v54, %s8760_s8  ;;  %863 = vst.msk [vmem:[#allocation3 + $0x18] sm:$0xf] %vm856_vm3, %v773_v49  ;;  %v9470_v49 = vpack.c.bf16 %v2446_v45, %v2446_v45  ;;  %v8654_v45 = vld [vmem:[#allocation4] sm:$0xff] }
 0x10b   : > { %2576 = vrot.lane.b32.xlu0 %v9296_v27, %s8761_s13 }
 0x10c   : > { %v2567_v50 = vpop.permute.xlu1 %2566  ;;  %v8514_v51 = vld [vmem:[#allocation3] sm:$0xff]  }
 0x10d   : > { %2660 = vst.msk [vmem:[#allocation3 + $0xc] sm:$0xf] %vm2656_vm10, %v2567_v50  ;;  %8392 = vmatprep.mubr.msk.bf16.mxu0 %vm2828_vm11, %v8514_v51  ;;  %v1026_v53 = vpop.permute.xlu0 %1025  ;;  %v2447_v51 = vld [vmem:[#allocation2 + $0x131] sm:$0xff] }
 0x10e   : > { %2325 = vrot.lane.b32.xlu1 %v9337_v0, %s8760_s8  ;;  %1118 = vst.msk [vmem:[#allocation3 + $0x10] sm:$0xf] %vm1113_vm4, %v1026_v53 }
 0x10f   : > { %784 = vrot.lane.b32.xlu0 %v9280_v55, %s8754_s23 }
 0x110   : > { %v775_v56 = vpop.permute.xlu1 %774 }
 0x111   : > { %864 = vst.msk [vmem:[#allocation3 + $0x1c] sm:$0xf] %vm856_vm3, %v775_v56  ;;  %v1030_v58 = vpop.permute.xlu0 %1029  ;;  %v9481_v56 = vpack.c.bf16 %v2447_v51, %v2447_v51 }
 0x112   : > { %2578 = vrot.lane.b32.xlu1 %v9307_v34, %s8761_s13  ;;  %1120 = vst.msk [vmem:[#allocation3 + $0x18] sm:$0xf] %vm1113_vm4, %v1030_v58 }
 0x113   : > { %2580 = vrot.lane.b32.xlu0 %v9350_v57, %s8761_s13 }
 0x114   : > { %v1028_v60 = vpop.permute.xlu1 %1027  ;;  %v8516_v61 = vld [vmem:[#allocation3 + $0x8] sm:$0xff]  }
 0x115   : > { %1119 = vst.msk [vmem:[#allocation3 + $0x14] sm:$0xf] %vm1113_vm4, %v1028_v60  ;;  %8393 = vmatmul.mubr.msk.bf16.vlgmr.msra.gmra.mxu0 %vm2828_vm11, %v8516_v61  ;;  %v1283_v63 = vpop.permute.xlu0 %1282 }
 0x116   : > { %786 = vrot.lane.b32.xlu1 %v9290_v54, %s8754_s23  ;;  %1375 = vst.msk [vmem:[#allocation3 + $0x10] sm:$0xf] %vm1370_vm5, %v1283_v63  ;;  %v9416_v54 = vpack.c.bf16 %v1674_v21, %v1674_v21  ;;  %v1164_v63 = vld [vmem:[#allocation2 + $0x147] sm:$0xff] }
 0x117   : > { %788 = vrot.lane.b32.xlu0 %v9327_v1, %s8754_s23  ;;  %v1678_v21 = vld [vmem:[#allocation2 + $0x149] sm:$0xff] }
 0x118   : > { %v1032_v2 = vpop.permute.xlu1 %1031  ;;  %v9540_v25 = vpack.c.bf16 %v1678_v21, %v1678_v21 }
 0x119   : > { %1121 = vst.msk [vmem:[#allocation3 + $0x1c] sm:$0xf] %vm1113_vm4, %v1032_v2  ;;  %v1287_v3 = vpop.permute.xlu0 %1286 }
 0x11a   : > { %2582 = vrot.lane.b32.xlu1 %v9361_v62, %s8761_s13  ;;  %1377 = vst.msk [vmem:[#allocation3 + $0x18] sm:$0xf] %vm1370_vm5, %v1287_v3 }
 0x11b   : > { %1041 = vrot.lane.b32.xlu0 %v9296_v27, %s8755_s25  ;;  %v8191_v27 = vld [vmem:[%s9032_s17 + $0x60] sm:$0xff]  }
 0x11c   : > { %v1285_v4 = vpop.permute.xlu1 %1284  ;;  %v8166_v29 = vunpack.c.l.bf16 %v8191_v27  ;;  %v8167_v30 = vunpack.c.h.bf16 %v8191_v27 }
 0x11d   : > { %1376 = vst.msk [vmem:[#allocation3 + $0x14] sm:$0xf] %vm1370_vm5, %v1285_v4  ;;  %v1540_v5 = vpop.permute.xlu0 %1539  ;;  %v9505_v4 = vpack.c.bf16 %v1164_v63, %v1164_v63 }
 0x11e   : > { %790 = vrot.lane.b32.xlu1 %v9337_v0, %s8754_s23  ;;  %1632 = vst.msk [vmem:[#allocation3 + $0x10] sm:$0xf] %vm1627_vm6, %v1540_v5 }
 0x11f   : > { %1045 = vrot.lane.b32.xlu0 %v9350_v57, %s8755_s25  ;;  %431 = vst.msk [vmem:[#allocation2 + $0x1a8] sm:$0xff] %vm239_vm0, %v8166_v29  ;;  %432 = vst.msk [vmem:[#allocation2 + $0x1b0] sm:$0xff] %vm239_vm0, %v8167_v30  ;;  %v8530_v29 = vld [vmem:[#allocation6 + $0x20] sm:$0xff]  }
 0x120   : > { %v1289_v6 = vpop.permute.xlu1 %1288 }
 0x121   : > { %1378 = vst.msk [vmem:[#allocation3 + $0x1c] sm:$0xf] %vm1370_vm5, %v1289_v6  ;;  %v1544_v10 = vpop.permute.xlu0 %1543  ;;  %v1165_v6 = vld [vmem:[#allocation2 + $0x14f] sm:$0xff] }
 0x122   : > { %1043 = vrot.lane.b32.xlu1 %v9307_v34, %s8755_s25  ;;  %1634 = vst.msk [vmem:[#allocation3 + $0x18] sm:$0xf] %vm1627_vm6, %v1544_v10  ;;  %v8523_v10 = vld [vmem:[#allocation6 + $0x78] sm:$0xff]  }
 0x123   : > { %1298 = vrot.lane.b32.xlu0 %v9129_v14, %s8756_s26  ;;  %v9400_v14 = vpack.c.bf16 %v1417_v16, %v1417_v16  ;;  %v8524_v16 = vld [vmem:[#allocation6 + $0x38] sm:$0xff]   ;;  %8214 = vmatprep.subr.bf16.mxu1 %v8523_v10 }
 0x124   : > { %v1542_v11 = vpop.permute.xlu1 %1541  ;;  %8215 = vmatpush3.bf16.msra.mxu1 %v8524_v16  ;;  %v462_v16 = vld [vmem:[#allocation2 + $0x16f] sm:$0xff] }
 0x125   : > { %1633 = vst.msk [vmem:[#allocation3 + $0x14] sm:$0xf] %vm1627_vm6, %v1542_v11  ;;  %v1797_v12 = vpop.permute.xlu0 %1796  ;;  %v8170_v11 = vunpack.c.l.bf16 %v8192_v8 }
 0x126   : > { %1047 = vrot.lane.b32.xlu1 %v9361_v62, %s8755_s25  ;;  %1889 = vst.msk [vmem:[#allocation3 + $0x10] sm:$0xf] %vm1884_vm7, %v1797_v12  ;;  %v8171_v12 = vunpack.c.h.bf16 %v8192_v8 }
 0x127   : > { %1302 = vrot.lane.b32.xlu0 %v9173_v33, %s8756_s26  ;;  %433 = vst.msk [vmem:[#allocation2 + $0x1c8] sm:$0xff] %vm239_vm0, %v8170_v11  ;;  %v459_v11 = vld [vmem:[#allocation2 + $0x147] sm:$0xff] }
 0x128   : > { %v1546_v15 = vpop.permute.xlu1 %1545  ;;  %434 = vst.msk [vmem:[#allocation2 + $0x1d0] sm:$0xff] %vm239_vm0, %v8171_v12  ;;  %v2450_v12 = vld [vmem:[#allocation2 + $0x169] sm:$0xff] }
 0x129   : > { %1635 = vst.msk [vmem:[#allocation3 + $0x1c] sm:$0xf] %vm1627_vm6, %v1546_v15  ;;  %v1801_v17 = vpop.permute.xlu0 %1800 }
 0x12a   : > { %1300 = vrot.lane.b32.xlu1 %v9127_v13, %s8756_s26  ;;  %1891 = vst.msk [vmem:[#allocation3 + $0x18] sm:$0xf] %vm1884_vm7, %v1801_v17  ;;  %v9410_v13 = vpack.c.bf16 %v1418_v20, %v1418_v20  ;;  %v8526_v20 = vld [vmem:[#allocation6 + $0x30] sm:$0xff]  }
 0x12b   : > { %1555 = vrot.lane.b32.xlu0 %v9327_v1, %s8757_s30 }
 0x12c   : > { %v1799_v18 = vpop.permute.xlu1 %1798 }
 0x12d   : > { %1890 = vst.msk [vmem:[#allocation3 + $0x14] sm:$0xf] %vm1884_vm7, %v1799_v18  ;;  %v2055_v19 = vpop.permute.xlu0 %2054  ;;  %v8525_v18 = vld [vmem:[#allocation6 + $0x70] sm:$0xff]  }
 0x12e   : > { %1304 = vrot.lane.b32.xlu1 %v9171_v32, %s8756_s26  ;;  %2147 = vst.msk [vmem:[#allocation3 + $0x10] sm:$0xf] %vm2142_vm8, %v2055_v19  ;;  %v1422_v19 = vld [vmem:[#allocation2 + $0x150] sm:$0xff]  ;;  %8216 = vmatprep.subr.bf16.mxu1 %v8525_v18  ;;  %v7778_v18 = vpack.c.bf16 %v462_v16, %v462_v16 }
 0x12f   : > { %1559 = vrot.lane.b32.xlu0 %v9400_v14, %s8757_s30  ;;  %8217 = vmatpush3.bf16.msra.mxu1 %v8526_v20  ;;  %v461_v20 = vld [vmem:[#allocation2 + $0x167] sm:$0xff] }
 0x130   : > { %v1803_v55 = vpop.permute.xlu1 %1802  ;;  %623 = vst.msk [vmem:[#allocation3 + $0x5c] sm:$0xf] %vm599_vm1, %v7778_v18 }
 0x131   : > { %1892 = vst.msk [vmem:[#allocation3 + $0x1c] sm:$0xf] %vm1884_vm7, %v1803_v55  ;;  %v2059_v22 = vpop.permute.xlu0 %2058 }
 0x132   : > { %1557 = vrot.lane.b32.xlu1 %v9337_v0, %s8757_s30  ;;  %2149 = vst.msk [vmem:[#allocation3 + $0x18] sm:$0xf] %vm2142_vm8, %v2059_v22  ;;  %v8527_v22 = vld [vmem:[#allocation6 + $0x68] sm:$0xff]  }
 0x133   : > { %1812 = vrot.lane.b32.xlu0 %v9350_v57, %s8758_s6  ;;  %8218 = vmatprep.subr.bf16.mxu1 %v8527_v22  ;;  %v2451_v22 = vld [vmem:[#allocation2 + $0x171] sm:$0xff] }
 0x134   : > { %v2057_v23 = vpop.permute.xlu1 %2056 }
 0x135   : > { %2148 = vst.msk [vmem:[#allocation3 + $0x14] sm:$0xf] %vm2142_vm8, %v2057_v23  ;;  %v2312_v24 = vpop.permute.xlu0 %2311 }
 0x136   : > { %1561 = vrot.lane.b32.xlu1 %v9410_v13, %s8757_s30  ;;  %2404 = vst.msk [vmem:[#allocation3 + $0x10] sm:$0xf] %vm2399_vm9, %v2312_v24 }
 0x137   : > { %1816 = vrot.lane.b32.xlu0 %v9416_v54, %s8758_s6 }
 0x138   : > { %v2061_v26 = vpop.permute.xlu1 %2060 }
 0x139   : > { %2150 = vst.msk [vmem:[#allocation3 + $0x1c] sm:$0xf] %vm2142_vm8, %v2061_v26  ;;  %v2316_v31 = vpop.permute.xlu0 %2315  ;;  %v8529_v26 = vld [vmem:[#allocation6 + $0x60] sm:$0xff]  }
 0x13a   : > { %1814 = vrot.lane.b32.xlu1 %v9361_v62, %s8758_s6  ;;  %2406 = vst.msk [vmem:[#allocation3 + $0x18] sm:$0xf] %vm2399_vm9, %v2316_v31  ;;  %v8531_v31 = vld [vmem:[#allocation6 + $0x58] sm:$0xff]  }
 0x13b   : > { %2070 = vrot.lane.b32.xlu0 %v9173_v33, %s8759_s7  ;;  %v9447_v33 = vpack.c.bf16 %v2189_v37, %v2189_v37  ;;  %v8533_v37 = vld [vmem:[#allocation6 + $0x50] sm:$0xff]  }
 0x13c   : > { %v2314_v34 = vpop.permute.xlu1 %2313 }
 0x13d   : > { %2405 = vst.msk [vmem:[#allocation3 + $0x14] sm:$0xf] %vm2399_vm9, %v2314_v34  ;;  %v2569_v35 = vpop.permute.xlu0 %2568  ;;  %v8532_v34 = vld [vmem:[#allocation6 + $0x18] sm:$0xff]  }
 0x13e   : > { %1818 = vrot.lane.b32.xlu1 %v9427_v28, %s8758_s6  ;;  %2661 = vst.msk [vmem:[#allocation3 + $0x10] sm:$0xf] %vm2656_vm10, %v2569_v35 }
 0x13f   : > { %2074 = vrot.lane.b32.xlu0 %v9206_v48, %s8759_s7 }
 0x140   : > { %v2318_v36 = vpop.permute.xlu1 %2317 }
 0x141   : > { %2407 = vst.msk [vmem:[#allocation3 + $0x1c] sm:$0xf] %vm2399_vm9, %v2318_v36  ;;  %v777_v38 = vpop.permute.xlu0 %776  ;;  %v1936_v36 = vld [vmem:[#allocation2 + $0x167] sm:$0xff] }
 0x142   : > { %2072 = vrot.lane.b32.xlu1 %v9171_v32, %s8759_s7  ;;  %865 = vst.msk [vmem:[#allocation3 + $0x20] sm:$0xf] %vm856_vm3, %v777_v38  ;;  %v9457_v32 = vpack.c.bf16 %v2190_v41, %v2190_v41  ;;  %v8535_v41 = vld [vmem:[#allocation6 + $0x48] sm:$0xff]  }
 0x143   : > { %2327 = vrot.lane.b32.xlu0 %v9400_v14, %s8760_s8 }
 0x144   : > { %v2571_v39 = vpop.permute.xlu1 %2570 }
 0x145   : > { %2662 = vst.msk [vmem:[#allocation3 + $0x14] sm:$0xf] %vm2656_vm10, %v2571_v39  ;;  %v2573_v40 = vpop.permute.xlu0 %2572 }
 0x146   : > { %2076 = vrot.lane.b32.xlu1 %v9204_v47, %s8759_s7  ;;  %2663 = vst.msk [vmem:[#allocation3 + $0x18] sm:$0xf] %vm2656_vm10, %v2573_v40  ;;  %v8534_v40 = vld [vmem:[#allocation6 + $0x10] sm:$0xff]  }
 0x147   : > { %2331 = vrot.lane.b32.xlu0 %v9447_v33, %s8760_s8 }
 0x148   : > { %v779_v42 = vpop.permute.xlu1 %778 }
 0x149   : > { %866 = vst.msk [vmem:[#allocation3 + $0x24] sm:$0xf] %vm856_vm3, %v779_v42  ;;  %v781_v43 = vpop.permute.xlu0 %780 }
 0x14a   : > { %2329 = vrot.lane.b32.xlu1 %v9410_v13, %s8760_s8  ;;  %867 = vst.msk [vmem:[#allocation3 + $0x28] sm:$0xf] %vm856_vm3, %v781_v43  ;;  %v4754_v43 = vld [vmem:[#allocation4 + $0x7] sm:$0xff] }
 0x14b   : > { %2584 = vrot.lane.b32.xlu0 %v9416_v54, %s8761_s13 }
 0x14c   : > { %v2575_v1 = vpop.permute.xlu1 %2574  ;;  %v8517_v44 = vld [vmem:[#allocation3 + $0x10] sm:$0xff]  }
 0x14d   : > { %2664 = vst.msk [vmem:[#allocation3 + $0x1c] sm:$0xf] %vm2656_vm10, %v2575_v1  ;;  %8396 = vmatprep.mubr.msk.bf16.mxu0 %vm2828_vm11, %v8517_v44  ;;  %v1034_v46 = vpop.permute.xlu0 %1033  ;;  %v8043_v44 = vpack.c.bf16 %v4754_v43, %v4754_v43 }
 0x14e   : > { %2333 = vrot.lane.b32.xlu1 %v9457_v32, %s8760_s8  ;;  %1122 = vst.msk [vmem:[#allocation3 + $0x20] sm:$0xf] %vm1113_vm4, %v1034_v46  ;;  %v8051_v46 = vpack.c.bf16 %v8654_v45, %v8654_v45 }
 0x14f   : > { %792 = vrot.lane.b32.xlu0 %v9400_v14, %s8754_s23  ;;  %4794 = vst [vmem:[#allocation5] sm:$0xf] %v8043_v44  ;;  %v1426_v44 = vld [vmem:[#allocation2 + $0x190] sm:$0xff] }
 0x150   : > { %v783_v0 = vpop.permute.xlu1 %782  ;;  %4842 = vst [vmem:[#allocation5 + $0x4] sm:$0xf] %v8051_v46  ;;  %v9664_v46 = vpack.c.bf16 %v1426_v44, %v1426_v44 }
 0x151   : > { %868 = vst.msk [vmem:[#allocation3 + $0x2c] sm:$0xf] %vm856_vm3, %v783_v0  ;;  %v1038_v50 = vpop.permute.xlu0 %1037  ;;  %v4850_v0 = vld [vmem:[#allocation4 + $0x9] sm:$0xff] }
 0x152   : > { %2586 = vrot.lane.b32.xlu1 %v9427_v28, %s8761_s13  ;;  %1124 = vst.msk [vmem:[#allocation3 + $0x28] sm:$0xf] %vm1113_vm4, %v1038_v50  ;;  %v8193_v50 = vld [vmem:[%s9032_s17 + $0x70] sm:$0xff]   ;;  %v8059_v51 = vpack.c.bf16 %v4850_v0, %v4850_v0 }
 0x153   : > { %2588 = vrot.lane.b32.xlu0 %v9470_v49, %s8761_s13  ;;  %v1682_v0 = vld [vmem:[#allocation2 + $0x189] sm:$0xff] }
 0x154   : > { %v1036_v52 = vpop.permute.xlu1 %1035  ;;  %v8518_v53 = vld [vmem:[#allocation3 + $0x18] sm:$0xff]   ;;  %4890 = vst [vmem:[#allocation5 + $0x8] sm:$0xf] %v8059_v51  ;;  %v9670_v51 = vpack.c.bf16 %v1682_v0, %v1682_v0 }
 0x155   : > { %1123 = vst.msk [vmem:[#allocation3 + $0x24] sm:$0xf] %vm1113_vm4, %v1036_v52  ;;  %8397 = vmatmul.mubr.msk.bf16.gmra.mxu0 %vm2828_vm11, %v8518_v53  ;;  %v1291_v57 = vpop.permute.xlu0 %1290  ;;  %v2193_v53 = vld [vmem:[#allocation2 + $0x168] sm:$0xff] }
 0x156   : > { %794 = vrot.lane.b32.xlu1 %v9410_v13, %s8754_s23  ;;  %1379 = vst.msk [vmem:[#allocation3 + $0x20] sm:$0xf] %vm1370_vm5, %v1291_v57  ;;  %v9534_v13 = vpack.c.bf16 %v1422_v19, %v1422_v19  ;;  %v8174_v57 = vunpack.c.l.bf16 %v8193_v50  ;;  %v9604_v19 = vpack.c.bf16 %v2450_v12, %v2450_v12 }
 0x157   : > { %796 = vrot.lane.b32.xlu0 %v9447_v33, %s8754_s23 }
 0x158   : > { %v1040_v58 = vpop.permute.xlu1 %1039  ;;  %435 = vst.msk [vmem:[#allocation2 + $0x1e8] sm:$0xff] %vm239_vm0, %v8174_v57 }
 0x159   : > { %1125 = vst.msk [vmem:[#allocation3 + $0x2c] sm:$0xf] %vm1113_vm4, %v1040_v58  ;;  %v1295_v59 = vpop.permute.xlu0 %1294  ;;  %v8175_v58 = vunpack.c.h.bf16 %v8193_v50 }
 0x15a   : > { %2590 = vrot.lane.b32.xlu1 %v9481_v56, %s8761_s13  ;;  %1381 = vst.msk [vmem:[#allocation3 + $0x28] sm:$0xf] %vm1370_vm5, %v1295_v59 }
 0x15b   : > { %1049 = vrot.lane.b32.xlu0 %v9416_v54, %s8755_s25  ;;  %v8528_v54 = vld [vmem:[#allocation6 + $0x28] sm:$0xff]   ;;  %436 = vst.msk [vmem:[#allocation2 + $0x1f0] sm:$0xff] %vm239_vm0, %v8175_v58  ;;  %v1940_v58 = vld [vmem:[#allocation2 + $0x1a7] sm:$0xff] }
 0x15c   : > { %v1293_v60 = vpop.permute.xlu1 %1292  ;;  %8219 = vmatpush3.bf16.msra.mxu1 %v8528_v54 }
 0x15d   : > { %1380 = vst.msk [vmem:[#allocation3 + $0x24] sm:$0xf] %vm1370_vm5, %v1293_v60  ;;  %v1548_v61 = vpop.permute.xlu0 %1547  ;;  %8220 = vmatprep.subr.bf16.mxu1 %v8529_v26 }
 0x15e   : > { %798 = vrot.lane.b32.xlu1 %v9457_v32, %s8754_s23  ;;  %1636 = vst.msk [vmem:[#allocation3 + $0x20] sm:$0xf] %vm1627_vm6, %v1548_v61  ;;  %v9575_v61 = vpack.c.bf16 %v2193_v53, %v2193_v53  ;;  %v1683_v53 = vld [vmem:[#allocation2 + $0x191] sm:$0xff] }
 0x15f   : > { %1053 = vrot.lane.b32.xlu0 %v9470_v49, %s8755_s25  ;;  %v9680_v57 = vpack.c.bf16 %v1683_v53, %v1683_v53 }
 0x160   : > { %v1297_v62 = vpop.permute.xlu1 %1296  ;;  %8221 = vmatpush3.bf16.msra.mxu1 %v8530_v29 }
 0x161   : > { %1382 = vst.msk [vmem:[#allocation3 + $0x2c] sm:$0xf] %vm1370_vm5, %v1297_v62  ;;  %v1552_v2 = vpop.permute.xlu0 %1551  ;;  %8222 = vmatprep.subr.bf16.mxu1 %v8531_v31  ;;  %v8538_v62 = vld [vmem:[#allocation6] sm:$0xff]  }
 0x162   : > { %1051 = vrot.lane.b32.xlu1 %v9427_v28, %s8755_s25  ;;  %1638 = vst.msk [vmem:[#allocation3 + $0x28] sm:$0xf] %vm1627_vm6, %v1552_v2  ;;  %v1679_v28 = vld [vmem:[#allocation2 + $0x151] sm:$0xff] }
 0x163   : > { %1306 = vrot.lane.b32.xlu0 %v9206_v48, %s8756_s26  ;;  %v9516_v48 = vpack.c.bf16 %v1165_v6, %v1165_v6  ;;  %v9550_v35 = vpack.c.bf16 %v1679_v28, %v1679_v28  ;;  %v2194_v2 = vld [vmem:[#allocation2 + $0x170] sm:$0xff] }
 0x164   : > { %v1550_v3 = vpop.permute.xlu1 %1549  ;;  %8223 = vmatpush3.bf16.msra.mxu1 %v8532_v34  ;;  %v1945_v6 = vld [vmem:[#allocation2 + $0x1ef] sm:$0xff] }
 0x165   : > { %1637 = vst.msk [vmem:[#allocation3 + $0x24] sm:$0xf] %vm1627_vm6, %v1550_v3  ;;  %v1805_v5 = vpop.permute.xlu0 %1804  ;;  %8224 = vmatprep.subr.bf16.mxu1 %v8533_v37  ;;  %v1169_v37 = vld [vmem:[#allocation2 + $0x18f] sm:$0xff] }
 0x166   : > { %1055 = vrot.lane.b32.xlu1 %v9481_v56, %s8755_s25  ;;  %1893 = vst.msk [vmem:[#allocation3 + $0x20] sm:$0xf] %vm1884_vm7, %v1805_v5 }
 0x167   : > { %1310 = vrot.lane.b32.xlu0 %v9505_v4, %s8756_s26 }
 0x168   : > { %v1554_v7 = vpop.permute.xlu1 %1553  ;;  %8225 = vmatpush3.bf16.msra.mxu1 %v8534_v40  ;;  %v1425_v40 = vld [vmem:[#allocation2 + $0x188] sm:$0xff] }
 0x169   : > { %1639 = vst.msk [vmem:[#allocation3 + $0x2c] sm:$0xf] %vm1627_vm6, %v1554_v7  ;;  %v1809_v15 = vpop.permute.xlu0 %1808  ;;  %8226 = vmatprep.subr.bf16.mxu1 %v8535_v41  ;;  %v9655_v43 = vpack.c.bf16 %v1425_v40, %v1425_v40 }
 0x16a   : > { %1308 = vrot.lane.b32.xlu1 %v9204_v47, %s8756_s26  ;;  %1895 = vst.msk [vmem:[#allocation3 + $0x28] sm:$0xf] %vm1884_vm7, %v1809_v15  ;;  %v9524_v47 = vpack.c.bf16 %v1421_v9, %v1421_v9  ;;  %v460_v9 = vld [vmem:[#allocation2 + $0x14f] sm:$0xff]  ;;  %v7775_v15 = vpack.c.bf16 %v459_v11, %v459_v11 }
 0x16b   : > { %1563 = vrot.lane.b32.xlu0 %v9447_v33, %s8757_s30  ;;  %v9556_v33 = vpack.c.bf16 %v1936_v36, %v1936_v36  ;;  %v7776_v10 = vpack.c.bf16 %v460_v9, %v460_v9 }
 0x16c   : > { %v1807_v17 = vpop.permute.xlu1 %1806  ;;  %620 = vst.msk [vmem:[#allocation3 + $0x50] sm:$0xf] %vm599_vm1, %v7775_v15  ;;  %v463_v15 = vld [vmem:[#allocation2 + $0x187] sm:$0xff] }
 0x16d   : > { %1894 = vst.msk [vmem:[#allocation3 + $0x24] sm:$0xf] %vm1884_vm7, %v1807_v17  ;;  %v2063_v14 = vpop.permute.xlu0 %2062 }
 0x16e   : > { %1312 = vrot.lane.b32.xlu1 %v9516_v48, %s8756_s26  ;;  %2151 = vst.msk [vmem:[#allocation3 + $0x20] sm:$0xf] %vm2142_vm8, %v2063_v14 }
 0x16f   : > { %1567 = vrot.lane.b32.xlu0 %v9524_v47, %s8757_s30  ;;  %621 = vst.msk [vmem:[#allocation3 + $0x54] sm:$0xf] %vm599_vm1, %v7776_v10  ;;  %v2198_v10 = vld [vmem:[#allocation2 + $0x1b0] sm:$0xff] }
 0x170   : > { %v1811_v55 = vpop.permute.xlu1 %1810  ;;  %v9711_v16 = vpack.c.bf16 %v2198_v10, %v2198_v10 }
 0x171   : > { %1896 = vst.msk [vmem:[#allocation3 + $0x2c] sm:$0xf] %vm1884_vm7, %v1811_v55  ;;  %v2067_v23 = vpop.permute.xlu0 %2066  ;;  %v7777_v55 = vpack.c.bf16 %v461_v20, %v461_v20  ;;  %v2454_v20 = vld [vmem:[#allocation2 + $0x1a9] sm:$0xff] }
 0x172   : > { %1565 = vrot.lane.b32.xlu1 %v9457_v32, %s8757_s30  ;;  %2153 = vst.msk [vmem:[#allocation3 + $0x28] sm:$0xf] %vm2142_vm8, %v2067_v23  ;;  %v1937_v32 = vld [vmem:[#allocation2 + $0x16f] sm:$0xff] }
 0x173   : > { %1820 = vrot.lane.b32.xlu0 %v9470_v49, %s8758_s6  ;;  %v8536_v49 = vld [vmem:[#allocation6 + $0x8] sm:$0xff]   ;;  %v9567_v52 = vpack.c.bf16 %v1937_v32, %v1937_v32  ;;  %622 = vst.msk [vmem:[#allocation3 + $0x58] sm:$0xf] %vm599_vm1, %v7777_v55  ;;  %v466_v55 = vld [vmem:[#allocation2 + $0x1af] sm:$0xff] }
 0x174   : > { %v2065_v24 = vpop.permute.xlu1 %2064  ;;  %8227 = vmatpush3.bf16.msra.mxu1 %v8536_v49 }
 0x175   : > { %2152 = vst.msk [vmem:[#allocation3 + $0x24] sm:$0xf] %vm2142_vm8, %v2065_v24  ;;  %v2320_v27 = vpop.permute.xlu0 %2319 }
 0x176   : > { %1569 = vrot.lane.b32.xlu1 %v9534_v13, %s8757_s30  ;;  %2408 = vst.msk [vmem:[#allocation3 + $0x20] sm:$0xf] %vm2399_vm9, %v2320_v27 }
 0x177   : > { %1824 = vrot.lane.b32.xlu0 %v9540_v25, %s8758_s6 }
 0x178   : > { %v2069_v30 = vpop.permute.xlu1 %2068 }
 0x179   : > { %2154 = vst.msk [vmem:[#allocation3 + $0x2c] sm:$0xf] %vm2142_vm8, %v2069_v30  ;;  %v2324_v38 = vpop.permute.xlu0 %2323  ;;  %v1168_v30 = vld [vmem:[#allocation2 + $0x187] sm:$0xff] }
 0x17a   : > { %1822 = vrot.lane.b32.xlu1 %v9481_v56, %s8758_s6  ;;  %2410 = vst.msk [vmem:[#allocation3 + $0x28] sm:$0xf] %vm2399_vm9, %v2324_v38  ;;  %v8537_v56 = vld [vmem:[#allocation6 + $0x40] sm:$0xff]  }
 0x17b   : > { %2078 = vrot.lane.b32.xlu0 %v9505_v4, %s8759_s7  ;;  %8228 = vmatprep.subr.bf16.mxu1 %v8537_v56  ;;  %v9585_v4 = vpack.c.bf16 %v2194_v2, %v2194_v2 }
 0x17c   : > { %v2322_v39 = vpop.permute.xlu1 %2321  ;;  %8229 = vmatpush3.bf16.msra.mxu1 %v8538_v62 }
 0x17d   : > { %2409 = vst.msk [vmem:[#allocation3 + $0x24] sm:$0xf] %vm2399_vm9, %v2322_v39  ;;  %v2577_v42 = vpop.permute.xlu0 %2576  ;;  %v7874_v39 = vpack.c.bf16 %v1169_v37, %v1169_v37 }
 0x17e   : > { %1826 = vrot.lane.b32.xlu1 %v9550_v35, %s8758_s6  ;;  %2665 = vst.msk [vmem:[#allocation3 + $0x20] sm:$0xf] %vm2656_vm10, %v2577_v42 }
 0x17f   : > { %2082 = vrot.lane.b32.xlu0 %v9556_v33, %s8759_s7 }
 0x180   : > { %v2326_v1 = vpop.permute.xlu1 %2325 }
 0x181   : > { %2411 = vst.msk [vmem:[#allocation3 + $0x2c] sm:$0xf] %vm2399_vm9, %v2326_v1  ;;  %v785_v59 = vpop.permute.xlu0 %784 }
 0x182   : > { %2080 = vrot.lane.b32.xlu1 %v9516_v48, %s8759_s7  ;;  %869 = vst.msk [vmem:[#allocation3 + $0x30] sm:$0xf] %vm856_vm3, %v785_v59  ;;  %v9588_v48 = vpack.c.bf16 %v1945_v6, %v1945_v6 }
 0x183   : > { %2335 = vrot.lane.b32.xlu0 %v9524_v47, %s8760_s8 }
 0x184   : > { %v2579_v60 = vpop.permute.xlu1 %2578  ;;  %631 = vst.msk [vmem:[#allocation3 + $0x7c] sm:$0xf] %vm599_vm1, %v9588_v48 }
 0x185   : > { %2666 = vst.msk [vmem:[#allocation3 + $0x24] sm:$0xf] %vm2656_vm10, %v2579_v60  ;;  %v2581_v63 = vpop.permute.xlu0 %2580 }
 0x186   : > { %2084 = vrot.lane.b32.xlu1 %v9567_v52, %s8759_s7  ;;  %2667 = vst.msk [vmem:[#allocation3 + $0x28] sm:$0xf] %vm2656_vm10, %v2581_v63  ;;  %v1941_v63 = vld [vmem:[#allocation2 + $0x1af] sm:$0xff] }
 0x187   : > { %2339 = vrot.lane.b32.xlu0 %v9575_v61, %s8760_s8 }
 0x188   : > { %v787_v3 = vpop.permute.xlu1 %786 }
 0x189   : > { %870 = vst.msk [vmem:[#allocation3 + $0x34] sm:$0xf] %vm856_vm3, %v787_v3  ;;  %v789_v5 = vpop.permute.xlu0 %788  ;;  %v9694_v3 = vpack.c.bf16 %v1941_v63, %v1941_v63 }
 0x18a   : > { %2337 = vrot.lane.b32.xlu1 %v9534_v13, %s8760_s8  ;;  %871 = vst.msk [vmem:[#allocation3 + $0x38] sm:$0xf] %vm856_vm3, %v789_v5 }
 0x18b   : > { %2592 = vrot.lane.b32.xlu0 %v9540_v25, %s8761_s13 }
 0x18c   : > { %v2583_v7 = vpop.permute.xlu1 %2582  ;;  %v8519_v8 = vld [vmem:[#allocation3 + $0x20] sm:$0xff]  }
 0x18d   : > { %2668 = vst.msk [vmem:[#allocation3 + $0x2c] sm:$0xf] %vm2656_vm10, %v2583_v7  ;;  %8400 = vmatprep.mubr.msk.bf16.mxu0 %vm2828_vm11, %v8519_v8  ;;  %v1042_v17 = vpop.permute.xlu0 %1041  ;;  %v464_v8 = vld [vmem:[#allocation2 + $0x18f] sm:$0xff] }
 0x18e   : > { %2341 = vrot.lane.b32.xlu1 %v9585_v4, %s8760_s8  ;;  %1126 = vst.msk [vmem:[#allocation3 + $0x30] sm:$0xf] %vm1113_vm4, %v1042_v17  ;;  %v7780_v11 = vpack.c.bf16 %v464_v8, %v464_v8  ;;  %v7779_v17 = vpack.c.bf16 %v463_v15, %v463_v15 }
 0x18f   : > { %800 = vrot.lane.b32.xlu0 %v9524_v47, %s8754_s23  ;;  %v9617_v47 = vpack.c.bf16 %v2451_v22, %v2451_v22  ;;  %v8762_v22 = vmov 1983009808  }
 0x190   : > { %v791_v14 = vpop.permute.xlu1 %790  ;;  %625 = vst.msk [vmem:[#allocation3 + $0x64] sm:$0xf] %vm599_vm1, %v7780_v11  ;;  %624 = vst.msk [vmem:[#allocation3 + $0x60] sm:$0xf] %vm599_vm1, %v7779_v17 }
 0x191   : > { %872 = vst.msk [vmem:[#allocation3 + $0x3c] sm:$0xf] %vm856_vm3, %v791_v14  ;;  %v1046_v21 = vpop.permute.xlu0 %1045 }
 0x192   : > { %2594 = vrot.lane.b32.xlu1 %v9550_v35, %s8761_s13  ;;  %1128 = vst.msk [vmem:[#allocation3 + $0x38] sm:$0xf] %vm1113_vm4, %v1046_v21 }
 0x193   : > { %2596 = vrot.lane.b32.xlu0 %v9604_v19, %s8761_s13 }
 0x194   : > { %v1044_v23 = vpop.permute.xlu1 %1043  ;;  %v8520_v54 = vld [vmem:[#allocation3 + $0x28] sm:$0xff]  }
 0x195   : > { %1127 = vst.msk [vmem:[#allocation3 + $0x34] sm:$0xf] %vm1113_vm4, %v1044_v23  ;;  %8401 = vmatmul.mubr.msk.bf16.gmra.mxu0 %vm2828_vm11, %v8520_v54  ;;  %v1299_v24 = vpop.permute.xlu0 %1298  ;;  %v3108_v23 = vunpack.c.l.s4 %v8762_v22  ;;  %v3110_v54 = vlaneseq }
 0x196   : > { %802 = vrot.lane.b32.xlu1 %v9534_v13, %s8754_s23  ;;  %1383 = vst.msk [vmem:[#allocation3 + $0x30] sm:$0xf] %vm1370_vm5, %v1299_v24 }
 0x197   : > { %804 = vrot.lane.b32.xlu0 %v9575_v61, %s8754_s23 }
 0x198   : > { %v1048_v26 = vpop.permute.xlu1 %1047 }
 0x199   : > { %1129 = vst.msk [vmem:[#allocation3 + $0x3c] sm:$0xf] %vm1113_vm4, %v1048_v26  ;;  %v1303_v27 = vpop.permute.xlu0 %1302  ;;  %v9725_v26 = vpack.c.bf16 %v2454_v20, %v2454_v20  ;;  %v1172_v20 = vld [vmem:[#allocation2 + $0x1c7] sm:$0xff] }
 0x19a   : > { %2598 = vrot.lane.b32.xlu1 %v9617_v47, %s8761_s13  ;;  %1385 = vst.msk [vmem:[#allocation3 + $0x38] sm:$0xf] %vm1370_vm5, %v1303_v27  ;;  %v465_v27 = vld [vmem:[#allocation2 + $0x1a7] sm:$0xff] }
 0x19b   : > { %1057 = vrot.lane.b32.xlu0 %v9540_v25, %s8755_s25  ;;  %v7873_v25 = vpack.c.bf16 %v1168_v30, %v1168_v30 }
 0x19c   : > { %v1301_v28 = vpop.permute.xlu1 %1300 }
 0x19d   : > { %1384 = vst.msk [vmem:[#allocation3 + $0x34] sm:$0xf] %vm1370_vm5, %v1301_v28  ;;  %v1556_v13 = vpop.permute.xlu0 %1555  ;;  %v7781_v28 = vpack.c.bf16 %v465_v27, %v465_v27 }
 0x19e   : > { %806 = vrot.lane.b32.xlu1 %v9585_v4, %s8754_s23  ;;  %1640 = vst.msk [vmem:[#allocation3 + $0x30] sm:$0xf] %vm1627_vm6, %v1556_v13  ;;  %v3109_v13 = vunpack.c.0.s8 %v3108_v23 }
 0x19f   : > { %1061 = vrot.lane.b32.xlu0 %v9604_v19, %s8755_s25  ;;  %626 = vst.msk [vmem:[#allocation3 + $0x68] sm:$0xf] %vm599_vm1, %v7781_v28 }
 0x1a0   : > { %v1305_v29 = vpop.permute.xlu1 %1304 }
 0x1a1   : > { %1386 = vst.msk [vmem:[#allocation3 + $0x3c] sm:$0xf] %vm1370_vm5, %v1305_v29  ;;  %v1560_v31 = vpop.permute.xlu0 %1559  ;;  %v3111_v29 = vshrl.u32 %v3110_v54, 7 }
 0x1a2   : > { %1059 = vrot.lane.b32.xlu1 %v9550_v35, %s8755_s25  ;;  %1642 = vst.msk [vmem:[#allocation3 + $0x38] sm:$0xf] %vm1627_vm6, %v1560_v31  ;;  %v8194_v35 = vld [vmem:[%s9032_s17 + $0x78] sm:$0xff]  }
 0x1a3   : > { %1314 = vrot.lane.b32.xlu0 %v9556_v33, %s8756_s26  ;;  %v8178_v33 = vunpack.c.l.bf16 %v8194_v35  ;;  %v8179_v41 = vunpack.c.h.bf16 %v8194_v35  ;;  %v2455_v31 = vld [vmem:[#allocation2 + $0x1b1] sm:$0xff] }
 0x1a4   : > { %v1558_v34 = vpop.permute.xlu1 %1557 }
 0x1a5   : > { %1641 = vst.msk [vmem:[#allocation3 + $0x34] sm:$0xf] %vm1627_vm6, %v1558_v34  ;;  %v1813_v36 = vpop.permute.xlu0 %1812 }
 0x1a6   : > { %1063 = vrot.lane.b32.xlu1 %v9617_v47, %s8755_s25  ;;  %1897 = vst.msk [vmem:[#allocation3 + $0x30] sm:$0xf] %vm1884_vm7, %v1813_v36 }
 0x1a7   : > { %1318 = vrot.lane.b32.xlu0 %v7873_v25, %s8756_s26  ;;  %437 = vst.msk [vmem:[#allocation2 + $0x208] sm:$0xff] %vm239_vm0, %v8178_v33  ;;  %438 = vst.msk [vmem:[#allocation2 + $0x210] sm:$0xff] %vm239_vm0, %v8179_v41  ;;  %vm4682_vm0 = vcmask 1045509  }
 0x1a8   : > { %v1562_v38 = vpop.permute.xlu1 %1561 }
 0x1a9   : > { %1643 = vst.msk [vmem:[#allocation3 + $0x3c] sm:$0xf] %vm1627_vm6, %v1562_v38  ;;  %v1817_v42 = vpop.permute.xlu0 %1816  ;;  %v9743_v38 = vpack.c.bf16 %v2455_v31, %v2455_v31 }
 0x1aa   : > { %1316 = vrot.lane.b32.xlu1 %v9567_v52, %s8756_s26  ;;  %1899 = vst.msk [vmem:[#allocation3 + $0x38] sm:$0xf] %vm1884_vm7, %v1817_v42 }
 0x1ab   : > { %1571 = vrot.lane.b32.xlu0 %v9575_v61, %s8757_s30  ;;  %v9685_v61 = vpack.c.bf16 %v1940_v58, %v1940_v58 }
 0x1ac   : > { %v1815_v32 = vpop.permute.xlu1 %1814 }
 0x1ad   : > { %1898 = vst.msk [vmem:[#allocation3 + $0x34] sm:$0xf] %vm1884_vm7, %v1815_v32  ;;  %v2071_v1 = vpop.permute.xlu0 %2070 }
 0x1ae   : > { %1320 = vrot.lane.b32.xlu1 %v7874_v39, %s8756_s26  ;;  %2155 = vst.msk [vmem:[#allocation3 + $0x30] sm:$0xf] %vm2142_vm8, %v2071_v1 }
 0x1af   : > { %1575 = vrot.lane.b32.xlu0 %v9655_v43, %s8757_s30 }
 0x1b0   : > { %v1819_v45 = vpop.permute.xlu1 %1818 }
 0x1b1   : > { %1900 = vst.msk [vmem:[#allocation3 + $0x3c] sm:$0xf] %vm1884_vm7, %v1819_v45  ;;  %v2075_v49 = vpop.permute.xlu0 %2074 }
 0x1b2   : > { %1573 = vrot.lane.b32.xlu1 %v9585_v4, %s8757_s30  ;;  %2157 = vst.msk [vmem:[#allocation3 + $0x38] sm:$0xf] %vm2142_vm8, %v2075_v49  ;;  %v2197_v4 = vld [vmem:[#allocation2 + $0x1a8] sm:$0xff] }
 0x1b3   : > { %1828 = vrot.lane.b32.xlu0 %v9604_v19, %s8758_s6  ;;  %v9700_v7 = vpack.c.bf16 %v2197_v4, %v2197_v4 }
 0x1b4   : > { %v2073_v50 = vpop.permute.xlu1 %2072 }
 0x1b5   : > { %2156 = vst.msk [vmem:[#allocation3 + $0x34] sm:$0xf] %vm2142_vm8, %v2073_v50  ;;  %v2328_v52 = vpop.permute.xlu0 %2327 }
 0x1b6   : > { %1577 = vrot.lane.b32.xlu1 %v9664_v46, %s8757_s30  ;;  %2412 = vst.msk [vmem:[#allocation3 + $0x30] sm:$0xf] %vm2399_vm9, %v2328_v52 }
 0x1b7   : > { %1832 = vrot.lane.b32.xlu0 %v9670_v51, %s8758_s6 }
 0x1b8   : > { %v2077_v56 = vpop.permute.xlu1 %2076 }
 0x1b9   : > { %2158 = vst.msk [vmem:[#allocation3 + $0x3c] sm:$0xf] %vm2142_vm8, %v2077_v56  ;;  %v2332_v59 = vpop.permute.xlu0 %2331 }
 0x1ba   : > { %1830 = vrot.lane.b32.xlu1 %v9617_v47, %s8758_s6  ;;  %2414 = vst.msk [vmem:[#allocation3 + $0x38] sm:$0xf] %vm2399_vm9, %v2332_v59  ;;  %v7782_v47 = vpack.c.bf16 %v466_v55, %v466_v55 }
 0x1bb   : > { %2086 = vrot.lane.b32.xlu0 %v7873_v25, %s8759_s7  ;;  %v9733_v25 = vld [vmem:[%s10487_s2] ss:$0 sm:$0xff] }
 0x1bc   : > { %v2330_v60 = vpop.permute.xlu1 %2329  ;;  %627 = vst.msk [vmem:[#allocation3 + $0x6c] sm:$0xf] %vm599_vm1, %v7782_v47 }
 0x1bd   : > { %2413 = vst.msk [vmem:[#allocation3 + $0x34] sm:$0xf] %vm2399_vm9, %v2330_v60  ;;  %v2585_v62 = vpop.permute.xlu0 %2584 }
 0x1be   : > { %1834 = vrot.lane.b32.xlu1 %v9680_v57, %s8758_s6  ;;  %2669 = vst.msk [vmem:[#allocation3 + $0x30] sm:$0xf] %vm2656_vm10, %v2585_v62 }
 0x1bf   : > { %2090 = vrot.lane.b32.xlu0 %v9685_v61, %s8759_s7 }
 0x1c0   : > { %v2334_v2 = vpop.permute.xlu1 %2333 }
 0x1c1   : > { %2415 = vst.msk [vmem:[#allocation3 + $0x3c] sm:$0xf] %vm2399_vm9, %v2334_v2  ;;  %v793_v5 = vpop.permute.xlu0 %792 }
 0x1c2   : > { %2088 = vrot.lane.b32.xlu1 %v7874_v39, %s8759_s7  ;;  %873 = vst.msk [vmem:[#allocation3 + $0x40] sm:$0xf] %vm856_vm3, %v793_v5  ;;  %v9746_v39 = vsub.s32 %v3109_v13, %v3111_v29 }
 0x1c3   : > { %2343 = vrot.lane.b32.xlu0 %v9655_v43, %s8760_s8 }
 0x1c4   : > { %v2587_v6 = vpop.permute.xlu1 %2586 }
 0x1c5   : > { %2670 = vst.msk [vmem:[#allocation3 + $0x34] sm:$0xf] %vm2656_vm10, %v2587_v6  ;;  %v2589_v9 = vpop.permute.xlu0 %2588 }
 0x1c6   : > { %2092 = vrot.lane.b32.xlu1 %v9694_v3, %s8759_s7  ;;  %2671 = vst.msk [vmem:[#allocation3 + $0x38] sm:$0xf] %vm2656_vm10, %v2589_v9 }
 0x1c7   : > { %2347 = vrot.lane.b32.xlu0 %v9700_v7, %s8760_s8 }
 0x1c8   : > { %v795_v12 = vpop.permute.xlu1 %794 }
 0x1c9   : > { %874 = vst.msk [vmem:[#allocation3 + $0x44] sm:$0xf] %vm856_vm3, %v795_v12  ;;  %v797_v18 = vpop.permute.xlu0 %796  ;;  %v9767_v12 = vsub.s32 0, %v3111_v29 }
 0x1ca   : > { %2345 = vrot.lane.b32.xlu1 %v9664_v46, %s8760_s8  ;;  %875 = vst.msk [vmem:[#allocation3 + $0x48] sm:$0xf] %vm856_vm3, %v797_v18 }
 0x1cb   : > { %2600 = vrot.lane.b32.xlu0 %v9670_v51, %s8761_s13 }
 0x1cc   : > { %v2591_v14 = vpop.permute.xlu1 %2590  ;;  %v8521_v19 = vld [vmem:[#allocation3 + $0x30] sm:$0xff]  }
 0x1cd   : > { %2672 = vst.msk [vmem:[#allocation3 + $0x3c] sm:$0xf] %vm2656_vm10, %v2591_v14  ;;  %8404 = vmatprep.mubr.msk.bf16.mxu0 %vm2828_vm11, %v8521_v19  ;;  %v1050_v21 = vpop.permute.xlu0 %1049 }
 0x1ce   : > { %2349 = vrot.lane.b32.xlu1 %v9711_v16, %s8760_s8  ;;  %1130 = vst.msk [vmem:[#allocation3 + $0x40] sm:$0xf] %vm1113_vm4, %v1050_v21 }
 0x1cf   : > { %808 = vrot.lane.b32.xlu0 %v9655_v43, %s8754_s23 }
 0x1d0   : > { %v799_v24 = vpop.permute.xlu1 %798 }
 0x1d1   : > { %876 = vst.msk [vmem:[#allocation3 + $0x4c] sm:$0xf] %vm856_vm3, %v799_v24  ;;  %v1054_v30 = vpop.permute.xlu0 %1053 }
 0x1d2   : > { %2602 = vrot.lane.b32.xlu1 %v9680_v57, %s8761_s13  ;;  %1132 = vst.msk [vmem:[#allocation3 + $0x48] sm:$0xf] %vm1113_vm4, %v1054_v30 }
 0x1d3   : > { %2604 = vrot.lane.b32.xlu0 %v9725_v26, %s8761_s13 }
 0x1d4   : > { %v1052_v34 = vpop.permute.xlu1 %1051  ;;  %v8522_v36 = vld [vmem:[#allocation3 + $0x38] sm:$0xff]  }
 0x1d5   : > { %1131 = vst.msk [vmem:[#allocation3 + $0x44] sm:$0xf] %vm1113_vm4, %v1052_v34  ;;  %v8394_v37 = vpop.f32.mrf.mxu0  ;;  %8405 = vmatmul.mubr.msk.bf16.gmra.mxu0 %vm2828_vm11, %v8522_v36  ;;  %v1307_v40 = vpop.permute.xlu0 %1306 }
 0x1d6   : > { %810 = vrot.lane.b32.xlu1 %v9664_v46, %s8754_s23  ;;  %v2924_v35 = vadd.f32 %v8394_v37, %v9733_v25  ;;  %1387 = vst.msk [vmem:[#allocation3 + $0x40] sm:$0xf] %vm1370_vm5, %v1307_v40 }
 0x1d7   : > { %v2915_v41 = vpop.f32.mrf.mxu0  ;;  %812 = vrot.lane.b32.xlu0 %v9700_v7, %s8754_s23 }
 0x1d8   : > { %v1056_v33 = vpop.permute.xlu1 %1055  ;;  %v3044_v42 = vmax.f32 %v2924_v35, 0.0  ;;  %v2916_v32 = vadd.f32 %v9733_v25, %v2915_v41  ;;  %v1173_v41 = vld [vmem:[#allocation2 + $0x1cf] sm:$0xff] }
 0x1d9   : > { %1133 = vst.msk [vmem:[#allocation3 + $0x4c] sm:$0xf] %vm1113_vm4, %v1056_v33  ;;  %v8395_v43 = vpop.f32.mrf.mxu0  ;;  %v1311_v0 = vpop.permute.xlu0 %1310 }
 0x1da   : > { %2606 = vrot.lane.b32.xlu1 %v9743_v38, %s8761_s13  ;;  %v3140_v1 = vcombine.high %v3044_v42, %v3044_v42  ;;  %v3147_v44 = vrot.slane %v3044_v42, %v9746_v39  ;;  %v3042_v45 = vmax.f32 %v2916_v32, 0.0  ;;  %v2927_v46 = vadd.f32 %v8395_v43, %v9733_v25  ;;  %1389 = vst.msk [vmem:[#allocation3 + $0x48] sm:$0xf] %vm1370_vm5, %v1311_v0 }
 0x1db   : > { %1065 = vrot.lane.b32.xlu0 %v9670_v51, %s8755_s25  ;;  %v2918_v9 = vpop.f32.mrf.mxu0 }
 0x1dc   : > { %v1309_v49 = vpop.permute.xlu1 %1308  ;;  %v3154_v50 = vrot.slane %v3140_v1, %v9746_v39  ;;  %v3155_v52 = vcombine.high %v3147_v44, %v3147_v44  ;;  %v7412_v53 = vrot.slane %v3147_v44, 9  ;;  %v3106_v56 = vcombine.high %v3042_v45, %v3042_v45 }
 0x1dd   : > { %1388 = vst.msk [vmem:[#allocation3 + $0x44] sm:$0xf] %vm1370_vm5, %v1309_v49  ;;  %v3113_v58 = vrot.slane %v3042_v45, %v9746_v39  ;;  %v3045_v59 = vmax.f32 %v2927_v46, 0.0  ;;  %v1564_v2 = vpop.permute.xlu0 %1563  ;;  %v2919_v23 = vadd.f32 %v9733_v25, %v2918_v9 }
 0x1de   : > { %814 = vrot.lane.b32.xlu1 %v9711_v16, %s8754_s23  ;;  %v3156_v60 = vcombine.high %v3154_v50, %v3154_v50  ;;  %v7413_v62 = vrot.slane %v3155_v52, 9  ;;  %v7414_v63 = vrot.slane %v3154_v50, 9  ;;  %v3120_v4 = vrot.slane %v3106_v56, %v9746_v39  ;;  %1644 = vst.msk [vmem:[#allocation3 + $0x40] sm:$0xf] %vm1627_vm6, %v1564_v2 }
 0x1df   : > { %v3121_v5 = vcombine.high %v3113_v58, %v3113_v58  ;;  %v7404_v6 = vrot.slane %v3113_v58, 9  ;;  %v3157_v8 = vcombine.high %v3045_v59, %v3045_v59  ;;  %v4170_v11 = vmax.f32 %v3147_v44, %v7412_v53  ;;  %1069 = vrot.lane.b32.xlu0 %v9725_v26, %s8755_s25  ;;  %v1429_v44 = vld [vmem:[#allocation2 + $0x1c8] sm:$0xff] }
 0x1e0   : > { %v1313_v10 = vpop.permute.xlu1 %1312  ;;  %v7415_v51 = vrot.slane %v3156_v60, 9  ;;  %v3164_v15 = vrot.slane %v3045_v59, %v9746_v39  ;;  %v3122_v17 = vcombine.high %v3120_v4, %v3120_v4  ;;  %v7406_v14 = vrot.slane %v3120_v4, 9 }
 0x1e1   : > { %1390 = vst.msk [vmem:[#allocation3 + $0x4c] sm:$0xf] %vm1370_vm5, %v1313_v10  ;;  %v7405_v18 = vrot.slane %v3121_v5, 9  ;;  %v4162_v19 = vmax.f32 %v3113_v58, %v7404_v6  ;;  %v4171_v55 = vmax.f32 %v3155_v52, %v7413_v62  ;;  %v4172_v21 = vmax.f32 %v3154_v50, %v7414_v63  ;;  %v1568_v54 = vpop.permute.xlu0 %1567 }
 0x1e2   : > { %1067 = vrot.lane.b32.xlu1 %v9680_v57, %s8755_s25  ;;  %v3171_v22 = vrot.slane %v3157_v8, %v9746_v39  ;;  %v7407_v47 = vrot.slane %v3122_v17, 9  ;;  %v4164_v27 = vmax.f32 %v3120_v4, %v7406_v14  ;;  %1646 = vst.msk [vmem:[#allocation3 + $0x48] sm:$0xf] %vm1627_vm6, %v1568_v54  ;;  %v4173_v29 = vmax.f32 %v3156_v60, %v7415_v51 }
 0x1e3   : > { %v4163_v24 = vmax.f32 %v3121_v5, %v7405_v18  ;;  %v4290_v28 = vmax.f32 %v4162_v19, %v4170_v11  ;;  %1322 = vrot.lane.b32.xlu0 %v9685_v61, %s8756_s26  ;;  %v9781_v57 = vpack.c.bf16 %v1172_v20, %v1172_v20  ;;  %v3172_v36 = vcombine.high %v3164_v15, %v3164_v15  ;;  %v1430_v19 = vld [vmem:[#allocation2 + $0x1d0] sm:$0xff] }
 0x1e4   : > { %v1566_v13 = vpop.permute.xlu1 %1565  ;;  %v4165_v30 = vmax.f32 %v3122_v17, %v7407_v47  ;;  %v4292_v34 = vmax.f32 %v4164_v27, %v4172_v21  ;;  %v3173_v37 = vcombine.high %v3171_v22, %v3171_v22  ;;  %v7416_v35 = vrot.slane %v3164_v15, 9 }
 0x1e5   : > { %1645 = vst.msk [vmem:[#allocation3 + $0x44] sm:$0xf] %vm1627_vm6, %v1566_v13  ;;  %v4291_v31 = vmax.f32 %v4163_v24, %v4171_v55  ;;  %v3043_v40 = vmax.f32 %v2919_v23, 0.0  ;;  %v1821_v33 = vpop.permute.xlu0 %1820  ;;  %v4421_v32 = vrot.slane %v4290_v28, %v9767_v12  ;;  %v7417_v49 = vrot.slane %v3172_v36, 9  ;;  %v1686_v24 = vld [vmem:[#allocation2 + $0x1c9] sm:$0xff] }
 0x1e6   : > { %1071 = vrot.lane.b32.xlu1 %v9743_v38, %s8755_s25  ;;  %v4293_v42 = vmax.f32 %v4165_v30, %v4173_v29  ;;  %v4429_v43 = vrot.slane %v4292_v34, %v9767_v12  ;;  %1901 = vst.msk [vmem:[#allocation3 + $0x40] sm:$0xf] %vm1884_vm7, %v1821_v33  ;;  %v7418_v50 = vrot.slane %v3171_v22, 9  ;;  %v9796_v52 = vpack.c.bf16 %v1173_v41, %v1173_v41  ;;  %v1687_v33 = vld [vmem:[#allocation2 + $0x1d1] sm:$0xff] }
 0x1e7   : > { %v4425_v61 = vrot.slane %v4291_v31, %v9767_v12  ;;  %v3123_v45 = vcombine.high %v3043_v40, %v3043_v40  ;;  %v3130_v46 = vrot.slane %v3043_v40, %v9746_v39  ;;  %1326 = vrot.lane.b32.xlu0 %v9781_v57, %s8756_s26  ;;  %v9799_v60 = vpack.c.bf16 %v1429_v44, %v1429_v44 }
 0x1e8   : > { %v1570_v1 = vpop.permute.xlu1 %1569  ;;  %v4433_v62 = vrot.slane %v4293_v42, %v9767_v12  ;;  %v7419_v2 = vrot.slane %v3173_v37, 9  ;;  %v4174_v4 = vmax.f32 %v3164_v15, %v7416_v35  ;;  %v4175_v10 = vmax.f32 %v3172_v36, %v7417_v49 }
 0x1e9   : > { %1647 = vst.msk [vmem:[#allocation3 + $0x4c] sm:$0xf] %vm1627_vm6, %v1570_v1  ;;  %v4675_v0 = vsel %vm4674_vm12, %v4425_v61, %v4421_v32  ;;  %v3137_v53 = vrot.slane %v3123_v45, %v9746_v39  ;;  %v3138_v56 = vcombine.high %v3130_v46, %v3130_v46  ;;  %v7408_v58 = vrot.slane %v3130_v46, 9  ;;  %v1825_v59 = vpop.permute.xlu0 %1824  ;;  %v1944_v32 = vld [vmem:[#allocation2 + $0x1e7] sm:$0xff] }
 0x1ea   : > { %1324 = vrot.lane.b32.xlu1 %v9694_v3, %s8756_s26  ;;  %v4677_v63 = vsel %vm4676_vm13, %v4429_v43, %v4675_v0  ;;  %1903 = vst.msk [vmem:[#allocation3 + $0x48] sm:$0xf] %vm1884_vm7, %v1825_v59  ;;  %v4176_v51 = vmax.f32 %v3171_v22, %v7418_v50  ;;  %v4177_v20 = vmax.f32 %v3173_v37, %v7419_v2  ;;  %v2202_v2 = vld [vmem:[#allocation2 + $0x1f0] sm:$0xff] }
 0x1eb   : > { %v3139_v6 = vcombine.high %v3137_v53, %v3137_v53  ;;  %v7409_v3 = vrot.slane %v3138_v56, 9  ;;  %v7410_v8 = vrot.slane %v3137_v53, 9  ;;  %v4166_v9 = vmax.f32 %v3130_v46, %v7408_v58  ;;  %1579 = vrot.lane.b32.xlu0 %v9700_v7, %s8757_s30  ;;  %v2201_v58 = vld [vmem:[#allocation2 + $0x1e8] sm:$0xff] }
 0x1ec   : > { %v1823_v5 = vpop.permute.xlu1 %1822  ;;  %v4679_v55 = vsel %vm10491_vm14, %v4433_v62, %v4677_v63  ;;  %v9817_v47 = vpack.c.bf16 %v1430_v19, %v1430_v19  ;;  %vm4686_vm14 = vcmask 1047559   ;;  %v9846_v1 = vpack.c.bf16 %v1944_v32, %v1944_v32 }
 0x1ed   : > { %1902 = vst.msk [vmem:[#allocation3 + $0x44] sm:$0xf] %vm1884_vm7, %v1823_v5  ;;  %v7411_v11 = vrot.slane %v3139_v6, 9  ;;  %v4167_v17 = vmax.f32 %v3138_v56, %v7409_v3  ;;  %v4168_v15 = vmax.f32 %v3137_v53, %v7410_v8  ;;  %v4294_v18 = vmax.f32 %v4166_v9, %v4174_v4  ;;  %v2079_v14 = vpop.permute.xlu0 %2078  ;;  %v2458_v8 = vld [vmem:[#allocation2 + $0x1e9] sm:$0xff] }
 0x1ee   : > { %1328 = vrot.lane.b32.xlu1 %v9796_v52, %s8756_s26  ;;  %2159 = vst.msk [vmem:[#allocation3 + $0x40] sm:$0xf] %vm2142_vm8, %v2079_v14  ;;  %v9860_v63 = vpack.c.bf16 %v2201_v58, %v2201_v58  ;;  %v9870_v3 = vpack.c.bf16 %v2202_v2, %v2202_v2 }
 0x1ef   : > { %v4169_v23 = vmax.f32 %v3139_v6, %v7411_v11  ;;  %v4295_v7 = vmax.f32 %v4167_v17, %v4175_v10  ;;  %v4296_v54 = vmax.f32 %v4168_v15, %v4176_v51  ;;  %v4437_v22 = vrot.slane %v4294_v18, %v9767_v12  ;;  %1583 = vrot.lane.b32.xlu0 %v9799_v60, %s8757_s30  ;;  %v468_v11 = vld [vmem:[#allocation2 + $0x1cf] sm:$0xff]  ;;  %v467_v18 = vld [vmem:[#allocation2 + $0x1c7] sm:$0xff] }
 0x1f0   : > { %v1827_v21 = vpop.permute.xlu1 %1826  ;;  %v9876_v17 = vpack.c.bf16 %v2458_v8, %v2458_v8  ;;  %v7784_v15 = vpack.c.bf16 %v468_v11, %v468_v11  ;;  %v7783_v14 = vpack.c.bf16 %v467_v18, %v467_v18 }
 0x1f1   : > { %1904 = vst.msk [vmem:[#allocation3 + $0x4c] sm:$0xf] %vm1884_vm7, %v1827_v21  ;;  %v4297_v27 = vmax.f32 %v4169_v23, %v4177_v20  ;;  %v4441_v28 = vrot.slane %v4295_v7, %v9767_v12  ;;  %v4445_v13 = vrot.slane %v4296_v54, %v9767_v12  ;;  %v4681_v29 = vsel %vm4680_vm15, %v4437_v22, %v4679_v55  ;;  %v2083_v30 = vpop.permute.xlu0 %2082  ;;  %v2459_v20 = vld [vmem:[#allocation2 + $0x1f1] sm:$0xff]  ;;  %v469_v21 = vld [vmem:[#allocation2 + $0x1e7] sm:$0xff] }
 0x1f2   : > { %1581 = vrot.lane.b32.xlu1 %v9711_v16, %s8757_s30  ;;  %2161 = vst.msk [vmem:[#allocation3 + $0x48] sm:$0xf] %vm2142_vm8, %v2083_v30  ;;  %v9828_v16 = vpack.c.bf16 %v1686_v24, %v1686_v24  ;;  %v9889_v23 = vpack.c.bf16 %v2459_v20, %v2459_v20  ;;  %v7785_v7 = vpack.c.bf16 %v469_v21, %v469_v21 }
 0x1f3   : > { %v4449_v34 = vrot.slane %v4297_v27, %v9767_v12  ;;  %v4683_v36 = vsel %vm4682_vm0, %v4441_v28, %v4681_v29  ;;  %1836 = vrot.lane.b32.xlu0 %v9725_v26, %s8758_s6  ;;  %v9840_v26 = vpack.c.bf16 %v1687_v33, %v1687_v33  ;;  %629 = vst.msk [vmem:[#allocation3 + $0x74] sm:$0xf] %vm599_vm1, %v7784_v15  ;;  %628 = vst.msk [vmem:[#allocation3 + $0x70] sm:$0xf] %vm599_vm1, %v7783_v14 }
 0x1f4   : > { %v2081_v31 = vpop.permute.xlu1 %2080  ;;  %v4685_v37 = vsel %vm4684_vm2, %v4445_v13, %v4683_v36  ;;  %630 = vst.msk [vmem:[#allocation3 + $0x78] sm:$0xf] %vm599_vm1, %v7785_v7  ;;  %vm10495_vm1 = vcmask 1043459  }
 0x1f5   : > { %2160 = vst.msk [vmem:[#allocation3 + $0x44] sm:$0xf] %vm2142_vm8, %v2081_v31  ;;  %v4687_v35 = vsel %vm4686_vm14, %v4449_v34, %v4685_v37  ;;  %v2336_v40 = vpop.permute.xlu0 %2335 }
 0x1f6   : > { %1585 = vrot.lane.b32.xlu1 %v9817_v47, %s8757_s30  ;;  %4746 = vst [vmem:[#allocation4 + $0x20] sm:$0xff] %v4687_v35  ;;  %2416 = vst.msk [vmem:[#allocation3 + $0x40] sm:$0xf] %vm2399_vm9, %v2336_v40  ;;  %v8052_v42 = vpack.c.bf16 %v4687_v35, %v4687_v35 }
 0x1f7   : > { %1840 = vrot.lane.b32.xlu0 %v9828_v16, %s8758_s6 }
 0x1f8   : > { %v2085_v41 = vpop.permute.xlu1 %2084  ;;  %4843 = vst [vmem:[#allocation5 + $0x28] sm:$0xf] %v8052_v42 }
 0x1f9   : > { %2162 = vst.msk [vmem:[#allocation3 + $0x4c] sm:$0xf] %vm2142_vm8, %v2085_v41  ;;  %v2340_v61 = vpop.permute.xlu0 %2339 }
 0x1fa   : > { %1838 = vrot.lane.b32.xlu1 %v9743_v38, %s8758_s6  ;;  %2418 = vst.msk [vmem:[#allocation3 + $0x48] sm:$0xf] %vm2399_vm9, %v2340_v61 }
 0x1fb   : > { %2094 = vrot.lane.b32.xlu0 %v9781_v57, %s8759_s7 }
 0x1fc   : > { %v2338_v43 = vpop.permute.xlu1 %2337 }
 0x1fd   : > { %2417 = vst.msk [vmem:[#allocation3 + $0x44] sm:$0xf] %vm2399_vm9, %v2338_v43  ;;  %v2593_v44 = vpop.permute.xlu0 %2592  ;;  %v4755_v38 = vld [vmem:[#allocation4 + $0x1f] sm:$0xff] }
 0x1fe   : > { %1842 = vrot.lane.b32.xlu1 %v9840_v26, %s8758_s6  ;;  %v4946_v45 = vld [vmem:[#allocation4 + $0x20] sm:$0xff]  ;;  %2673 = vst.msk [vmem:[#allocation3 + $0x40] sm:$0xf] %vm2656_vm10, %v2593_v44  ;;  %v8044_v49 = vpack.c.bf16 %v4755_v38, %v4755_v38 }
 0x1ff   : > { %v4994_v46 = vld [vmem:[#allocation4 + $0x21] sm:$0xff]  ;;  %v8075_v50 = vpack.c.bf16 %v4946_v45, %v4946_v45  ;;  %2098 = vrot.lane.b32.xlu0 %v9846_v1, %s8759_s7  ;;  %v8541_v6 = vld [vmem:[#allocation5 + $0x4] ss:$36 sps:$4 sm:$0xff]  }
 0x200   : > { %v2342_v0 = vpop.permute.xlu1 %2341  ;;  %v8083_v53 = vpack.c.bf16 %v4994_v46, %v4994_v46  ;;  %v4898_v56 = vld [vmem:[#allocation4 + $0x1f] sm:$0xff]  ;;  %4795 = vst [vmem:[#allocation5 + $0x24] sm:$0xf] %v8044_v49  ;;  %6026 = vmatprep.mubr.bf16.mxu1 %v8541_v6  ;;  %v1176_v6 = vld [vmem:[#allocation2 + $0x207] sm:$0xff] }
 0x201   : > { %2419 = vst.msk [vmem:[#allocation3 + $0x4c] sm:$0xf] %vm2399_vm9, %v2342_v0  ;;  %v8067_v57 = vpack.c.bf16 %v4898_v56, %v4898_v56  ;;  %4986 = vst [vmem:[#allocation5 + $0x10] sm:$0xf] %v8075_v50  ;;  %v801_v59 = vpop.permute.xlu0 %800 }
 0x202   : > { %2096 = vrot.lane.b32.xlu1 %v9796_v52, %s8759_s7  ;;  %5034 = vst [vmem:[#allocation5 + $0x14] sm:$0xf] %v8083_v53  ;;  %4891 = vst [vmem:[#allocation5 + $0x2c] sm:$0xf] %v8083_v53 }
 0x203   : > { %4938 = vst [vmem:[#allocation5 + $0xc] sm:$0xf] %v8067_v57  ;;  %877 = vst.msk [vmem:[#allocation3 + $0x50] sm:$0xf] %vm856_vm3, %v801_v59  ;;  %2351 = vrot.lane.b32.xlu0 %v9799_v60, %s8760_s8 }
 0x204   : > { %v2595_v62 = vpop.permute.xlu1 %2594 }
 0x205   : > { %2674 = vst.msk [vmem:[#allocation3 + $0x44] sm:$0xf] %vm2656_vm10, %v2595_v62  ;;  %v2597_v52 = vpop.permute.xlu0 %2596 }
 0x206   : > { %2100 = vrot.lane.b32.xlu1 %v9588_v48, %s8759_s7  ;;  %2675 = vst.msk [vmem:[#allocation3 + $0x48] sm:$0xf] %vm2656_vm10, %v2597_v52 }
 0x207   : > { %v8539_v5 = vld [vmem:[#allocation5] ss:$36 sps:$4 sm:$0xff]   ;;  %2355 = vrot.lane.b32.xlu0 %v9860_v63, %s8760_s8 }
 0x208   : > { %v803_v4 = vpop.permute.xlu1 %802  ;;  %6027 = vmatmul.mubr.bf16.vlgmr.msra.gmra.mxu1 %v8539_v5 }
 0x209   : > { %878 = vst.msk [vmem:[#allocation3 + $0x54] sm:$0xf] %vm856_vm3, %v803_v4  ;;  %v805_v9 = vpop.permute.xlu0 %804 }
 0x20a   : > { %2353 = vrot.lane.b32.xlu1 %v9817_v47, %s8760_s8  ;;  %879 = vst.msk [vmem:[#allocation3 + $0x58] sm:$0xf] %vm856_vm3, %v805_v9 }
 0x20b   : > { %2608 = vrot.lane.b32.xlu0 %v9828_v16, %s8761_s13 }
 0x20c   : > { %v2599_v10 = vpop.permute.xlu1 %2598  ;;  %v8542_v51 = vld [vmem:[#allocation3 + $0x40] sm:$0xff]  }
 0x20d   : > { %2676 = vst.msk [vmem:[#allocation3 + $0x4c] sm:$0xf] %vm2656_vm10, %v2599_v10  ;;  %8408 = vmatprep.mubr.msk.bf16.mxu0 %vm2828_vm11, %v8542_v51  ;;  %v1058_v19 = vpop.permute.xlu0 %1057 }
 0x20e   : > { %2357 = vrot.lane.b32.xlu1 %v9870_v3, %s8760_s8  ;;  %1134 = vst.msk [vmem:[#allocation3 + $0x50] sm:$0xf] %vm1113_vm4, %v1058_v19 }
 0x20f   : > { %2612 = vrot.lane.b32.xlu0 %v9876_v17, %s8761_s13 }
 0x210   : > { %v807_v55 = vpop.permute.xlu1 %806 }
 0x211   : > { %880 = vst.msk [vmem:[#allocation3 + $0x5c] sm:$0xf] %vm856_vm3, %v807_v55  ;;  %v1062_v54 = vpop.permute.xlu0 %1061 }
 0x212   : > { %2610 = vrot.lane.b32.xlu1 %v9840_v26, %s8761_s13  ;;  %1136 = vst.msk [vmem:[#allocation3 + $0x58] sm:$0xf] %vm1113_vm4, %v1062_v54 }
 0x213   : > { %816 = vrot.lane.b32.xlu0 %v9799_v60, %s8754_s23 }
 0x214   : > { %v1060_v22 = vpop.permute.xlu1 %1059  ;;  %v8543_v24 = vld [vmem:[#allocation3 + $0x48] sm:$0xff]  }
 0x215   : > { %1135 = vst.msk [vmem:[#allocation3 + $0x54] sm:$0xf] %vm1113_vm4, %v1060_v22  ;;  %v8398_v27 = vpop.f32.mrf.mxu0  ;;  %8409 = vmatmul.mubr.msk.bf16.gmra.mxu0 %vm2828_vm11, %v8543_v24  ;;  %v1315_v13 = vpop.permute.xlu0 %1314 }
 0x216   : > { %2614 = vrot.lane.b32.xlu1 %v9889_v23, %s8761_s13  ;;  %v2940_v28 = vadd.f32 %v8398_v27, %v9733_v25  ;;  %1391 = vst.msk [vmem:[#allocation3 + $0x50] sm:$0xf] %vm1370_vm5, %v1315_v13  ;;  %v1177_v13 = vld [vmem:[#allocation2 + $0x20f] sm:$0xff] }
 0x217   : > { %v2931_v30 = vpop.f32.mrf.mxu0  ;;  %820 = vrot.lane.b32.xlu0 %v9860_v63, %s8754_s23 }
 0x218   : > { %v1064_v29 = vpop.permute.xlu1 %1063  ;;  %v3048_v31 = vmax.f32 %v2940_v28, 0.0  ;;  %v2932_v34 = vadd.f32 %v9733_v25, %v2931_v30 }
 0x219   : > { %1137 = vst.msk [vmem:[#allocation3 + $0x5c] sm:$0xf] %vm1113_vm4, %v1064_v29  ;;  %v8399_v60 = vpop.f32.mrf.mxu0  ;;  %v1319_v33 = vpop.permute.xlu0 %1318 }
 0x21a   : > { %818 = vrot.lane.b32.xlu1 %v9817_v47, %s8754_s23  ;;  %v3208_v36 = vcombine.high %v3048_v31, %v3048_v31  ;;  %v3215_v37 = vrot.slane %v3048_v31, %v9746_v39  ;;  %v3046_v35 = vmax.f32 %v2932_v34, 0.0  ;;  %v2943_v40 = vadd.f32 %v8399_v60, %v9733_v25  ;;  %1393 = vst.msk [vmem:[#allocation3 + $0x58] sm:$0xf] %vm1370_vm5, %v1319_v33  ;;  %v1433_v60 = vld [vmem:[#allocation2 + $0x208] sm:$0xff] }
 0x21b   : > { %1073 = vrot.lane.b32.xlu0 %v9828_v16, %s8755_s25  ;;  %v2934_v57 = vpop.f32.mrf.mxu0 }
 0x21c   : > { %v1317_v41 = vpop.permute.xlu1 %1316  ;;  %v3222_v42 = vrot.slane %v3208_v36, %v9746_v39  ;;  %v3223_v32 = vcombine.high %v3215_v37, %v3215_v37  ;;  %v7428_v61 = vrot.slane %v3215_v37, 9  ;;  %v3174_v43 = vcombine.high %v3046_v35, %v3046_v35 }
 0x21d   : > { %1392 = vst.msk [vmem:[#allocation3 + $0x54] sm:$0xf] %vm1370_vm5, %v1317_v41  ;;  %v3181_v47 = vrot.slane %v3046_v35, %v9746_v39  ;;  %v3049_v44 = vmax.f32 %v2943_v40, 0.0  ;;  %v1572_v0 = vpop.permute.xlu0 %1571  ;;  %v2935_v51 = vadd.f32 %v9733_v25, %v2934_v57  ;;  %v9946_v41 = vpack.c.bf16 %v1177_v13, %v1177_v13 }
 0x21e   : > { %822 = vrot.lane.b32.xlu1 %v9870_v3, %s8754_s23  ;;  %v3224_v38 = vcombine.high %v3222_v42, %v3222_v42  ;;  %v7429_v45 = vrot.slane %v3223_v32, 9  ;;  %v7430_v46 = vrot.slane %v3222_v42, 9  ;;  %v3188_v49 = vrot.slane %v3174_v43, %v9746_v39  ;;  %1648 = vst.msk [vmem:[#allocation3 + $0x50] sm:$0xf] %vm1627_vm6, %v1572_v0  ;;  %s8763_s23 = smov [#allocation9]  }
 0x21f   : > { %v3189_v50 = vcombine.high %v3181_v47, %v3181_v47  ;;  %v7420_v53 = vrot.slane %v3181_v47, 9  ;;  %v3225_v56 = vcombine.high %v3049_v44, %v3049_v44  ;;  %v4186_v59 = vmax.f32 %v3215_v37, %v7428_v61  ;;  %1077 = vrot.lane.b32.xlu0 %v9876_v17, %s8755_s25 }
 0x220   : > { %v1321_v58 = vpop.permute.xlu1 %1320  ;;  %v7431_v16 = vrot.slane %v3224_v38, 9  ;;  %v3232_v62 = vrot.slane %v3049_v44, %v9746_v39  ;;  %v3190_v52 = vcombine.high %v3188_v49, %v3188_v49  ;;  %v7422_v4 = vrot.slane %v3188_v49, 9 }
 0x221   : > { %1394 = vst.msk [vmem:[#allocation3 + $0x5c] sm:$0xf] %vm1370_vm5, %v1321_v58  ;;  %v7421_v2 = vrot.slane %v3189_v50, 9  ;;  %v4178_v5 = vmax.f32 %v3181_v47, %v7420_v53  ;;  %v4187_v8 = vmax.f32 %v3223_v32, %v7429_v45  ;;  %v4188_v9 = vmax.f32 %v3222_v42, %v7430_v46  ;;  %v1576_v11 = vpop.permute.xlu0 %1575 }
 0x222   : > { %1075 = vrot.lane.b32.xlu1 %v9840_v26, %s8755_s25  ;;  %v3239_v10 = vrot.slane %v3225_v56, %v9746_v39  ;;  %v7423_v15 = vrot.slane %v3190_v52, 9  ;;  %v4180_v14 = vmax.f32 %v3188_v49, %v7422_v4  ;;  %1650 = vst.msk [vmem:[#allocation3 + $0x58] sm:$0xf] %vm1627_vm6, %v1576_v11  ;;  %v4189_v55 = vmax.f32 %v3224_v38, %v7431_v16  ;;  %v1690_v11 = vld [vmem:[#allocation2 + $0x209] sm:$0xff] }
 0x223   : > { %v4179_v18 = vmax.f32 %v3189_v50, %v7421_v2  ;;  %v4298_v19 = vmax.f32 %v4178_v5, %v4186_v59  ;;  %1330 = vrot.lane.b32.xlu0 %v9846_v1, %s8756_s26  ;;  %v9931_v26 = vpack.c.bf16 %v1176_v6, %v1176_v6  ;;  %v3240_v25 = vcombine.high %v3232_v62, %v3232_v62  ;;  %v1434_v2 = vld [vmem:[#allocation2 + $0x210] sm:$0xff] }
 0x224   : > { %v1574_v20 = vpop.permute.xlu1 %1573  ;;  %v4181_v21 = vmax.f32 %v3190_v52, %v7423_v15  ;;  %v4300_v54 = vmax.f32 %v4180_v14, %v4188_v9  ;;  %v3241_v22 = vcombine.high %v3239_v10, %v3239_v10  ;;  %v7432_v24 = vrot.slane %v3232_v62, 9 }
 0x225   : > { %1649 = vst.msk [vmem:[#allocation3 + $0x54] sm:$0xf] %vm1627_vm6, %v1574_v20  ;;  %v4299_v7 = vmax.f32 %v4179_v18, %v4187_v8  ;;  %v3047_v27 = vmax.f32 %v2935_v51, 0.0  ;;  %v1829_v28 = vpop.permute.xlu0 %1828  ;;  %v4453_v30 = vrot.slane %v4298_v19, %v9767_v12  ;;  %v7433_v40 = vrot.slane %v3240_v25, 9 }
 0x226   : > { %1079 = vrot.lane.b32.xlu1 %v9889_v23, %s8755_s25  ;;  %v4301_v29 = vmax.f32 %v4181_v21, %v4189_v55  ;;  %v4461_v1 = vrot.slane %v4300_v54, %v9767_v12  ;;  %1905 = vst.msk [vmem:[#allocation3 + $0x50] sm:$0xf] %vm1884_vm7, %v1829_v28  ;;  %v7434_v33 = vrot.slane %v3239_v10, 9  ;;  %v9949_v47 = vpack.c.bf16 %v1433_v60, %v1433_v60  ;;  %v8553_v60 = vld [vmem:[#allocation6 + $0x170] sm:$0xff]   ;;  %s8688_s25 = sshll.u32 %s8763_s23, 4  ;;  %s8689_s25 = int_to_ptr.vmem [resolvable:$false] %s8688_s25 }
 0x227   : > { %v4457_v31 = vrot.slane %v4299_v7, %v9767_v12  ;;  %v3191_v36 = vcombine.high %v3047_v27, %v3047_v27  ;;  %v3198_v37 = vrot.slane %v3047_v27, %v9746_v39  ;;  %1334 = vrot.lane.b32.xlu0 %v9931_v26, %s8756_s26  ;;  %v7435_v45 = vrot.slane %v3241_v22, 9 }
 0x228   : > { %v1578_v34 = vpop.permute.xlu1 %1577  ;;  %v4465_v44 = vrot.slane %v4301_v29, %v9767_v12  ;;  %v4190_v46 = vmax.f32 %v3232_v62, %v7432_v24  ;;  %v4191_v56 = vmax.f32 %v3240_v25, %v7433_v40  ;;  %v4192_v57 = vmax.f32 %v3239_v10, %v7434_v33  ;;  %v1691_v24 = vld [vmem:[#allocation2 + $0x211] sm:$0xff]  ;;  %v1948_v29 = vld [vmem:[#allocation2 + $0x227] sm:$0xff] }
 0x229   : > { %1651 = vst.msk [vmem:[#allocation3 + $0x5c] sm:$0xf] %vm1627_vm6, %v1578_v34  ;;  %v4688_v35 = vsel %vm4674_vm12, %v4457_v31, %v4453_v30  ;;  %v3205_v42 = vrot.slane %v3191_v36, %v9746_v39  ;;  %v3206_v32 = vcombine.high %v3198_v37, %v3198_v37  ;;  %v7424_v61 = vrot.slane %v3198_v37, 9  ;;  %v1833_v43 = vpop.permute.xlu0 %1832  ;;  %v8552_v34 = vld [vmem:[#allocation6 + $0x138] sm:$0xff]  }
 0x22a   : > { %1332 = vrot.lane.b32.xlu1 %v9588_v48, %s8756_s26  ;;  %v4689_v38 = vsel %vm4676_vm13, %v4461_v1, %v4688_v35  ;;  %1907 = vst.msk [vmem:[#allocation3 + $0x58] sm:$0xf] %vm1884_vm7, %v1833_v43  ;;  %v4193_v4 = vmax.f32 %v3241_v22, %v7435_v45  ;;  %v9967_v51 = vpack.c.bf16 %v1434_v2, %v1434_v2  ;;  %v8555_v45 = vld [vmem:[#allocation6 + $0x168] sm:$0xff]  }
 0x22b   : > { %v3207_v49 = vcombine.high %v3205_v42, %v3205_v42  ;;  %v7425_v48 = vrot.slane %v3206_v32, 9  ;;  %v7426_v50 = vrot.slane %v3205_v42, 9  ;;  %v4182_v53 = vmax.f32 %v3198_v37, %v7424_v61  ;;  %1587 = vrot.lane.b32.xlu0 %v9860_v63, %s8757_s30 }
 0x22c   : > { %v1831_v0 = vpop.permute.xlu1 %1830  ;;  %v4690_v5 = vsel %vm10495_vm1, %v4465_v44, %v4689_v38  ;;  %v9990_v13 = vpack.c.bf16 %v1691_v24, %v1691_v24  ;;  %v7977_v1 = vpack.c.bf16 %v1948_v29, %v1948_v29  ;;  %v8554_v38 = vld [vmem:[#allocation6 + $0x130] sm:$0xff]  }
 0x22d   : > { %1906 = vst.msk [vmem:[#allocation3 + $0x54] sm:$0xf] %vm1884_vm7, %v1831_v0  ;;  %v7427_v58 = vrot.slane %v3207_v49, 9  ;;  %v4183_v16 = vmax.f32 %v3206_v32, %v7425_v48  ;;  %v4184_v59 = vmax.f32 %v3205_v42, %v7426_v50  ;;  %v4302_v62 = vmax.f32 %v4182_v53, %v4190_v46  ;;  %v2087_v52 = vpop.permute.xlu0 %2086  ;;  %v2205_v50 = vld [vmem:[#allocation2 + $0x228] sm:$0xff] }
 0x22e   : > { %1336 = vrot.lane.b32.xlu1 %v9946_v41, %s8756_s26  ;;  %2163 = vst.msk [vmem:[#allocation3 + $0x50] sm:$0xf] %vm2142_vm8, %v2087_v52  ;;  %v2462_v52 = vld [vmem:[#allocation2 + $0x229] sm:$0xff]  ;;  %s8690_s26 = scalar_lea.vmem %s8689_s25, 256 }
 0x22f   : > { %v4185_v8 = vmax.f32 %v3207_v49, %v7427_v58  ;;  %v4303_v9 = vmax.f32 %v4183_v16, %v4191_v56  ;;  %v4304_v63 = vmax.f32 %v4184_v59, %v4192_v57  ;;  %v4469_v10 = vrot.slane %v4302_v62, %v9767_v12  ;;  %1591 = vrot.lane.b32.xlu0 %v9949_v47, %s8757_s30  ;;  %v8556_v57 = vld [vmem:[#allocation6 + $0x128] sm:$0xff]   ;;  %v2206_v16 = vld [vmem:[#allocation2 + $0x230] sm:$0xff] }
 0x230   : > { %v1835_v6 = vpop.permute.xlu1 %1834  ;;  %v8010_v62 = vpack.c.bf16 %v2206_v16, %v2206_v16 }
 0x231   : > { %1908 = vst.msk [vmem:[#allocation3 + $0x5c] sm:$0xf] %vm1884_vm7, %v1835_v6  ;;  %v4305_v15 = vmax.f32 %v4185_v8, %v4193_v4  ;;  %v4473_v18 = vrot.slane %v4303_v9, %v9767_v12  ;;  %v4477_v14 = vrot.slane %v4304_v63, %v9767_v12  ;;  %v4691_v19 = vsel %vm4680_vm15, %v4469_v10, %v4690_v5  ;;  %v2091_v20 = vpop.permute.xlu0 %2090  ;;  %v8557_v5 = vld [vmem:[#allocation6 + $0x160] sm:$0xff]  }
 0x232   : > { %1589 = vrot.lane.b32.xlu1 %v9870_v3, %s8757_s30  ;;  %2165 = vst.msk [vmem:[#allocation3 + $0x58] sm:$0xf] %vm2142_vm8, %v2091_v20  ;;  %v9978_v3 = vpack.c.bf16 %v1690_v11, %v1690_v11  ;;  %v8041_v6 = vpack.c.bf16 %v2462_v52, %v2462_v52  ;;  %v8558_v8 = vld [vmem:[#allocation6 + $0x120] sm:$0xff]   ;;  %v8560_v11 = vld [vmem:[#allocation6 + $0x118] sm:$0xff]   ;;  %v8562_v20 = vld [vmem:[#allocation6 + $0x150] sm:$0xff]  }
 0x233   : > { %v4481_v21 = vrot.slane %v4305_v15, %v9767_v12  ;;  %v4692_v7 = vsel %vm4682_vm0, %v4473_v18, %v4691_v19  ;;  %1844 = vrot.lane.b32.xlu0 %v9876_v17, %s8758_s6  ;;  %v8551_v17 = vld [vmem:[#allocation6 + $0x178] sm:$0xff]   ;;  %v2463_v63 = vld [vmem:[#allocation2 + $0x231] sm:$0xff] }
 0x234   : > { %v2089_v55 = vpop.permute.xlu1 %2088  ;;  %v4693_v54 = vsel %vm4684_vm2, %v4477_v14, %v4692_v7  ;;  %8294 = vmatprep.subr.bf16.mxu0 %v8551_v17  ;;  %v8042_v15 = vpack.c.bf16 %v2463_v63, %v2463_v63 }
 0x235   : > { %2164 = vst.msk [vmem:[#allocation3 + $0x54] sm:$0xf] %vm2142_vm8, %v2089_v55  ;;  %v4694_v25 = vsel %vm4686_vm14, %v4481_v21, %v4693_v54  ;;  %v2344_v22 = vpop.permute.xlu0 %2343  ;;  %8295 = vmatpush3.bf16.msra.mxu0 %v8552_v34  ;;  %v8563_v55 = vld [vmem:[#allocation6 + $0x110] sm:$0xff]   ;;  %v8565_v21 = vld [vmem:[#allocation6 + $0x148] sm:$0xff]  }
 0x236   : > { %1593 = vrot.lane.b32.xlu1 %v9967_v51, %s8757_s30  ;;  %4747 = vst [vmem:[#allocation4 + $0x38] sm:$0xff] %v4694_v25  ;;  %2420 = vst.msk [vmem:[#allocation3 + $0x50] sm:$0xf] %vm2399_vm9, %v2344_v22  ;;  %v8053_v28 = vpack.c.bf16 %v4694_v25, %v4694_v25  ;;  %8296 = vmatprep.subr.bf16.mxu0 %v8553_v60 }
 0x237   : > { %1848 = vrot.lane.b32.xlu0 %v9978_v3, %s8758_s6 }
 0x238   : > { %v2093_v27 = vpop.permute.xlu1 %2092  ;;  %4844 = vst [vmem:[#allocation5 + $0x4c] sm:$0xf] %v8053_v28 }
 0x239   : > { %2166 = vst.msk [vmem:[#allocation3 + $0x5c] sm:$0xf] %vm2142_vm8, %v2093_v27  ;;  %v2348_v30 = vpop.permute.xlu0 %2347  ;;  %8297 = vmatpush3.bf16.msra.mxu0 %v8554_v38  ;;  %v8566_v27 = vld [vmem:[#allocation6 + $0x108] sm:$0xff]  }
 0x23a   : > { %1846 = vrot.lane.b32.xlu1 %v9889_v23, %s8758_s6  ;;  %2422 = vst.msk [vmem:[#allocation3 + $0x58] sm:$0xf] %vm2399_vm9, %v2348_v30  ;;  %v1949_v23 = vld [vmem:[#allocation2 + $0x22f] sm:$0xff]  ;;  %8298 = vmatprep.subr.bf16.mxu0 %v8555_v45 }
 0x23b   : > { %2102 = vrot.lane.b32.xlu0 %v9931_v26, %s8759_s7  ;;  %v7978_v48 = vpack.c.bf16 %v1949_v23, %v1949_v23 }
 0x23c   : > { %v2346_v31 = vpop.permute.xlu1 %2345 }
 0x23d   : > { %2421 = vst.msk [vmem:[#allocation3 + $0x54] sm:$0xf] %vm2399_vm9, %v2346_v31  ;;  %v2601_v36 = vpop.permute.xlu0 %2600  ;;  %v4756_v37 = vld [vmem:[#allocation4 + $0x37] sm:$0xff]  ;;  %8299 = vmatpush3.bf16.msra.mxu0 %v8556_v57 }
 0x23e   : > { %1850 = vrot.lane.b32.xlu1 %v9990_v13, %s8758_s6  ;;  %v4947_v35 = vld [vmem:[#allocation4 + $0x38] sm:$0xff]  ;;  %2677 = vst.msk [vmem:[#allocation3 + $0x50] sm:$0xf] %vm2656_vm10, %v2601_v36  ;;  %v8045_v42 = vpack.c.bf16 %v4756_v37, %v4756_v37  ;;  %8300 = vmatprep.subr.bf16.mxu0 %v8557_v5 }
 0x23f   : > { %v4995_v40 = vld [vmem:[#allocation4 + $0x39] sm:$0xff]  ;;  %v8076_v32 = vpack.c.bf16 %v4947_v35, %v4947_v35  ;;  %2106 = vrot.lane.b32.xlu0 %v7977_v1, %s8759_s7 }
 0x240   : > { %v2350_v33 = vpop.permute.xlu1 %2349  ;;  %v8084_v61 = vpack.c.bf16 %v4995_v40, %v4995_v40  ;;  %v4899_v26 = vld [vmem:[#allocation4 + $0x37] sm:$0xff]  ;;  %4796 = vst [vmem:[#allocation5 + $0x48] sm:$0xf] %v8045_v42 }
 0x241   : > { %v5091_v43 = vld [vmem:[#allocation4 + $0x38] sm:$0xff]  ;;  %2423 = vst.msk [vmem:[#allocation3 + $0x5c] sm:$0xf] %vm2399_vm9, %v2350_v33  ;;  %v8068_v46 = vpack.c.bf16 %v4899_v26, %v4899_v26  ;;  %4987 = vst [vmem:[#allocation5 + $0x34] sm:$0xf] %v8076_v32  ;;  %v809_v53 = vpop.permute.xlu0 %808  ;;  %8301 = vmatpush3.bf16.msra.mxu0 %v8558_v8  ;;  %v8570_v40 = vld [vmem:[#allocation6 + $0x140] sm:$0xff]  }
 0x242   : > { %v5139_v44 = vld [vmem:[#allocation4 + $0x39] sm:$0xff]  ;;  %v8099_v0 = vpack.c.bf16 %v5091_v43, %v5091_v43  ;;  %2104 = vrot.lane.b32.xlu1 %v9946_v41, %s8759_s7  ;;  %5035 = vst [vmem:[#allocation5 + $0x38] sm:$0xf] %v8084_v61  ;;  %4892 = vst [vmem:[#allocation5 + $0x50] sm:$0xf] %v8084_v61  ;;  %v8009_v41 = vpack.c.bf16 %v2205_v50, %v2205_v50  ;;  %v8571_v32 = vld [vmem:[#allocation6 + $0x100] sm:$0xff]  }
 0x243   : > { %v8107_v49 = vpack.c.bf16 %v5139_v44, %v5139_v44  ;;  %4939 = vst [vmem:[#allocation5 + $0x30] sm:$0xf] %v8068_v46  ;;  %5083 = vst [vmem:[#allocation5 + $0x18] sm:$0xf] %v8068_v46  ;;  %2359 = vrot.lane.b32.xlu0 %v9949_v47, %s8760_s8 }
 0x244   : > { %5131 = vst [vmem:[#allocation5 + $0x1c] sm:$0xf] %v8099_v0  ;;  %v2603_v56 = vpop.permute.xlu1 %2602  ;;  %881 = vst.msk [vmem:[#allocation3 + $0x60] sm:$0xf] %vm856_vm3, %v809_v53 }
 0x245   : > { %5179 = vst [vmem:[#allocation5 + $0x20] sm:$0xf] %v8107_v49  ;;  %2678 = vst.msk [vmem:[#allocation3 + $0x54] sm:$0xf] %vm2656_vm10, %v2603_v56  ;;  %v2605_v58 = vpop.permute.xlu0 %2604 }
 0x246   : > { %2108 = vrot.lane.b32.xlu1 %v7978_v48, %s8759_s7  ;;  %2679 = vst.msk [vmem:[#allocation3 + $0x58] sm:$0xf] %vm2656_vm10, %v2605_v58 }
 0x247   : > { %2363 = vrot.lane.b32.xlu0 %v8009_v41, %s8760_s8 }
 0x248   : > { %v811_v59 = vpop.permute.xlu1 %810 }
 0x249   : > { %882 = vst.msk [vmem:[#allocation3 + $0x64] sm:$0xf] %vm856_vm3, %v811_v59  ;;  %v813_v47 = vpop.permute.xlu0 %812 }
 0x24a   : > { %2361 = vrot.lane.b32.xlu1 %v9967_v51, %s8760_s8  ;;  %883 = vst.msk [vmem:[#allocation3 + $0x68] sm:$0xf] %vm856_vm3, %v813_v47  ;;  %v8559_v51 = vld [vmem:[#allocation6 + $0x158] sm:$0xff]  }
 0x24b   : > { %2616 = vrot.lane.b32.xlu0 %v9978_v3, %s8761_s13  ;;  %8302 = vmatprep.subr.bf16.mxu0 %v8559_v51  ;;  %v10031_v3 = vld [vmem:[%s10487_s2] ss:$0 sm:$0xff] }
 0x24c   : > { %v2607_v2 = vpop.permute.xlu1 %2606  ;;  %v8544_v4 = vld [vmem:[#allocation3 + $0x50] sm:$0xff]   ;;  %8303 = vmatpush3.bf16.msra.mxu0 %v8560_v11 }
 0x24d   : > { %2680 = vst.msk [vmem:[#allocation3 + $0x5c] sm:$0xf] %vm2656_vm10, %v2607_v2  ;;  %8412 = vmatprep.mubr.msk.bf16.mxu0 %vm2828_vm11, %v8544_v4  ;;  %v1066_v9 = vpop.permute.xlu0 %1065  ;;  %8304 = vmatprep.subr.bf16.mxu0 %v8562_v20 }
 0x24e   : > { %2365 = vrot.lane.b32.xlu1 %v8010_v62, %s8760_s8  ;;  %1138 = vst.msk [vmem:[#allocation3 + $0x60] sm:$0xf] %vm1113_vm4, %v1066_v9  ;;  %s230_s8 = sand.u32 1, %s8740_s19  }
 0x24f   : > { %2620 = vrot.lane.b32.xlu0 %v8041_v6, %s8761_s13  ;;  %s7077_s9 = sshll.u32 %s230_s8, 3  ;;  %s10443_s22 = scalar_lea.sflag [#allocation8], %s230_s8 }
 0x250   : > { %v815_v10 = vpop.permute.xlu1 %814  ;;  %8305 = vmatpush3.bf16.msra.mxu0 %v8563_v55  ;;  %s10386_s10 = scalar_lea.vmem [#allocation9], %s7077_s9 }
 0x251   : > { %884 = vst.msk [vmem:[#allocation3 + $0x6c] sm:$0xf] %vm856_vm3, %v815_v10  ;;  %v1070_v18 = vpop.permute.xlu0 %1069  ;;  %8306 = vmatprep.subr.bf16.mxu0 %v8565_v21  ;;  %s6997_s12 = sshll.u32 %s10386_s10, 4  ;;  %s10438_s12 = int_to_ptr.vmem [resolvable:$true] %s6997_s12 }
 0x252   : > { %2618 = vrot.lane.b32.xlu1 %v9990_v13, %s8761_s13  ;;  %1140 = vst.msk [vmem:[#allocation3 + $0x68] sm:$0xf] %vm1113_vm4, %v1070_v18  ;;  %s8684_s17 = scalar_lea.vmem %s10438_s12, 128  ;;  %p8691_p11 = scmp.lt.s32.totalorder %s10438_s12, %s8689_s25 }
 0x253   : > { %p8685_p8 = scmp.ne.s32.totalorder %s10438_s12, %s8684_s17  ;;  %p8692_p12 = scmp.lt.s32.totalorder %s8690_s26, %s8684_s17 }
 0x254   : > { %v1068_v14 = vpop.permute.xlu1 %1067  ;;  %v8545_v19 = vld [vmem:[#allocation3 + $0x58] sm:$0xff]   ;;  %8307 = vmatpush3.bf16.msra.mxu0 %v8566_v27 }
 0x255   : > { %1139 = vst.msk [vmem:[#allocation3 + $0x64] sm:$0xf] %vm1113_vm4, %v1068_v14  ;;  %v8402_v7 = vpop.f32.mrf.mxu0  ;;  %8413 = vmatmul.mubr.msk.bf16.gmra.mxu0 %vm2828_vm11, %v8545_v19  ;;  %v1323_v25 = vpop.permute.xlu0 %1322  ;;  %8308 = vmatprep.subr.bf16.mxu0 %v8570_v40  ;;  %p8686_p9 = pnand %p8685_p8, %p8833_p5  ;;  %p8693_p13 = por %p8692_p12, %p8691_p11 }
 0x256   : > { %2622 = vrot.lane.b32.xlu1 %v8042_v15, %s8761_s13  ;;  %v2956_v54 = vadd.f32 %v10031_v3, %v8402_v7  ;;  %1395 = vst.msk [vmem:[#allocation3 + $0x60] sm:$0xf] %vm1370_vm5, %v1323_v25 }
 0x257   : > { %v2947_v24 = vpop.f32.mrf.mxu0  ;;  %p8687_p10 = pneg %p8686_p9 }
 0x258   : > { %v1072_v22 = vpop.permute.xlu1 %1071  ;;  %v3052_v28 = vmax.f32 %v2956_v54, 0.0  ;;  %v2948_v17 = vadd.f32 %v10031_v3, %v2947_v24  ;;  %8309 = vmatpush3.bf16.msra.mxu0 %v8571_v32 }
 0x259   : > { %1141 = vst.msk [vmem:[#allocation3 + $0x6c] sm:$0xf] %vm1113_vm4, %v1072_v22  ;;  %v8403_v13 = vpop.f32.mrf.mxu0  ;;  %v1327_v34 = vpop.permute.xlu0 %1326  ;;  %p8694_p0 = pnand %p8693_p13, %p8687_p10 }
 0x25a   : > { %v3276_v29 = vcombine.high %v3052_v28, %v3052_v28  ;;  %v3283_v30 = vrot.slane %v3052_v28, %v9746_v39  ;;  %v3050_v31 = vmax.f32 %v2948_v17, 0.0  ;;  %v2959_v1 = vadd.f32 %v10031_v3, %v8403_v13  ;;  %1397 = vst.msk [vmem:[#allocation3 + $0x68] sm:$0xf] %vm1370_vm5, %v1327_v34 }
 0x25b   : > { %v2950_v49 = vpop.f32.mrf.mxu0 }
 0x25c   : > { %v1325_v60 = vpop.permute.xlu1 %1324  ;;  %v3290_v23 = vrot.slane %v3276_v29, %v9746_v39  ;;  %v3291_v36 = vcombine.high %v3283_v30, %v3283_v30  ;;  %v7444_v37 = vrot.slane %v3283_v30, 9  ;;  %v3242_v35 = vcombine.high %v3050_v31, %v3050_v31 }
 0x25d   : > { %1396 = vst.msk [vmem:[#allocation3 + $0x64] sm:$0xf] %vm1370_vm5, %v1325_v60  ;;  %v3249_v33 = vrot.slane %v3050_v31, %v9746_v39  ;;  %v3053_v42 = vmax.f32 %v2959_v1, 0.0  ;;  %v1580_v44 = vpop.permute.xlu0 %1579  ;;  %v2951_v47 = vadd.f32 %v10031_v3, %v2950_v49 }
 0x25e   : > { %v3292_v61 = vcombine.high %v3290_v23, %v3290_v23  ;;  %v7445_v26 = vrot.slane %v3291_v36, 9  ;;  %v7446_v43 = vrot.slane %v3290_v23, 9  ;;  %v3256_v38 = vrot.slane %v3242_v35, %v9746_v39  ;;  %1652 = vst.msk [vmem:[#allocation3 + $0x60] sm:$0xf] %vm1627_vm6, %v1580_v44 }
 0x25f   : > { %v3257_v45 = vcombine.high %v3249_v33, %v3249_v33  ;;  %v7436_v46 = vrot.slane %v3249_v33, 9  ;;  %v3293_v0 = vcombine.high %v3053_v42, %v3053_v42  ;;  %v4202_v53 = vmax.f32 %v3283_v30, %v7444_v37 }
 0x260   : > { %v1329_v48 = vpop.permute.xlu1 %1328  ;;  %v7447_v50 = vrot.slane %v3292_v61, 9  ;;  %v3300_v56 = vrot.slane %v3053_v42, %v9746_v39  ;;  %v3258_v41 = vcombine.high %v3256_v38, %v3256_v38  ;;  %v7438_v58 = vrot.slane %v3256_v38, 9 }
 0x261   : > { %1398 = vst.msk [vmem:[#allocation3 + $0x6c] sm:$0xf] %vm1370_vm5, %v1329_v48  ;;  %v7437_v57 = vrot.slane %v3257_v45, 9  ;;  %v4194_v16 = vmax.f32 %v3249_v33, %v7436_v46  ;;  %v4203_v59 = vmax.f32 %v3291_v36, %v7445_v26  ;;  %v4204_v62 = vmax.f32 %v3290_v23, %v7446_v43  ;;  %v1584_v2 = vpop.permute.xlu0 %1583 }
 0x262   : > { %v3307_v52 = vrot.slane %v3293_v0, %v9746_v39  ;;  %v7439_v4 = vrot.slane %v3258_v41, 9  ;;  %v4196_v6 = vmax.f32 %v3256_v38, %v7438_v58  ;;  %1654 = vst.msk [vmem:[#allocation3 + $0x68] sm:$0xf] %vm1627_vm6, %v1584_v2  ;;  %v4205_v63 = vmax.f32 %v3292_v61, %v7447_v50 }
 0x263   : > { %v4195_v5 = vmax.f32 %v3257_v45, %v7437_v57  ;;  %v4306_v8 = vmax.f32 %v4194_v16, %v4202_v53  ;;  %v3308_v15 = vcombine.high %v3300_v56, %v3300_v56  ;;  %v7448_v14 = vrot.slane %v3300_v56, 9 }
 0x264   : > { %v1582_v9 = vpop.permute.xlu1 %1581  ;;  %v4197_v10 = vmax.f32 %v3258_v41, %v7439_v4  ;;  %v4308_v11 = vmax.f32 %v4196_v6, %v4204_v62  ;;  %v3309_v18 = vcombine.high %v3307_v52, %v3307_v52  ;;  %v3051_v19 = vmax.f32 %v2951_v47, 0.0 }
 0x265   : > { %1653 = vst.msk [vmem:[#allocation3 + $0x64] sm:$0xf] %vm1627_vm6, %v1582_v9  ;;  %v4307_v51 = vmax.f32 %v4195_v5, %v4203_v59  ;;  %v1837_v20 = vpop.permute.xlu0 %1836  ;;  %v4485_v21 = vrot.slane %v4306_v8, %v9767_v12  ;;  %v7449_v28 = vrot.slane %v3308_v15, 9  ;;  %v7450_v17 = vrot.slane %v3307_v52, 9 }
 0x266   : > { %v4309_v55 = vmax.f32 %v4197_v10, %v4205_v63  ;;  %v4493_v54 = vrot.slane %v4308_v11, %v9767_v12  ;;  %1909 = vst.msk [vmem:[#allocation3 + $0x60] sm:$0xf] %vm1884_vm7, %v1837_v20  ;;  %v3259_v22 = vcombine.high %v3051_v19, %v3051_v19  ;;  %v3266_v24 = vrot.slane %v3051_v19, %v9746_v39 }
 0x267   : > { %v4489_v7 = vrot.slane %v4307_v51, %v9767_v12  ;;  %v7451_v60 = vrot.slane %v3309_v18, 9  ;;  %v4206_v23 = vmax.f32 %v3300_v56, %v7448_v14  ;;  %v4207_v42 = vmax.f32 %v3308_v15, %v7449_v28 }
 0x268   : > { %v1586_v25 = vpop.permute.xlu1 %1585  ;;  %v3273_v13 = vrot.slane %v3259_v22, %v9746_v39  ;;  %v3274_v29 = vcombine.high %v3266_v24, %v3266_v24  ;;  %v7440_v30 = vrot.slane %v3266_v24, 9  ;;  %v4497_v1 = vrot.slane %v4309_v55, %v9767_v12 }
 0x269   : > { %1655 = vst.msk [vmem:[#allocation3 + $0x6c] sm:$0xf] %vm1627_vm6, %v1586_v25  ;;  %v4695_v27 = vsel %vm4674_vm12, %v4489_v7, %v4485_v21  ;;  %v1841_v31 = vpop.permute.xlu0 %1840  ;;  %v4208_v32 = vmax.f32 %v3307_v52, %v7450_v17  ;;  %v4209_v45 = vmax.f32 %v3309_v18, %v7451_v60 }
 0x26a   : > { %v4696_v34 = vsel %vm4676_vm13, %v4493_v54, %v4695_v27  ;;  %1911 = vst.msk [vmem:[#allocation3 + $0x68] sm:$0xf] %vm1884_vm7, %v1841_v31  ;;  %v3275_v37 = vcombine.high %v3273_v13, %v3273_v13  ;;  %v7441_v35 = vrot.slane %v3274_v29, 9  ;;  %v7442_v40 = vrot.slane %v3273_v13, 9 }
 0x26b   : > { %v4198_v33 = vmax.f32 %v3266_v24, %v7440_v30  ;;  %v4697_v46 = vsel %vm10495_vm1, %v4497_v1, %v4696_v34 }
 0x26c   : > { %v1839_v36 = vpop.permute.xlu1 %1838  ;;  %v7443_v61 = vrot.slane %v3275_v37, 9  ;;  %v4199_v26 = vmax.f32 %v3274_v29, %v7441_v35  ;;  %v4200_v43 = vmax.f32 %v3273_v13, %v7442_v40 }
 0x26d   : > { %1910 = vst.msk [vmem:[#allocation3 + $0x64] sm:$0xf] %vm1884_vm7, %v1839_v36  ;;  %v4310_v44 = vmax.f32 %v4198_v33, %v4206_v23  ;;  %v2095_v38 = vpop.permute.xlu0 %2094 }
 0x26e   : > { %2167 = vst.msk [vmem:[#allocation3 + $0x60] sm:$0xf] %vm2142_vm8, %v2095_v38  ;;  %v4201_v49 = vmax.f32 %v3275_v37, %v7443_v61  ;;  %v4311_v48 = vmax.f32 %v4199_v26, %v4207_v42  ;;  %v4312_v50 = vmax.f32 %v4200_v43, %v4208_v32 }
 0x26f   : > { %v4501_v53 = vrot.slane %v4310_v44, %v9767_v12 }
 0x270   : > { %v1843_v0 = vpop.permute.xlu1 %1842  ;;  %v4313_v56 = vmax.f32 %v4201_v49, %v4209_v45  ;;  %v4505_v41 = vrot.slane %v4311_v48, %v9767_v12  ;;  %v4509_v57 = vrot.slane %v4312_v50, %v9767_v12 }
 0x271   : > { %1912 = vst.msk [vmem:[#allocation3 + $0x6c] sm:$0xf] %vm1884_vm7, %v1843_v0  ;;  %v4698_v58 = vsel %vm4680_vm15, %v4501_v53, %v4697_v46  ;;  %v2099_v16 = vpop.permute.xlu0 %2098 }
 0x272   : > { %2169 = vst.msk [vmem:[#allocation3 + $0x68] sm:$0xf] %vm2142_vm8, %v2099_v16  ;;  %v4513_v62 = vrot.slane %v4313_v56, %v9767_v12  ;;  %v4699_v52 = vsel %vm4682_vm0, %v4505_v41, %v4698_v58 }
 0x273   : > { %v4700_v47 = vsel %vm4684_vm2, %v4509_v57, %v4699_v52 }
 0x274   : > { %v2097_v59 = vpop.permute.xlu1 %2096  ;;  %v4701_v2 = vsel %vm4686_vm14, %v4513_v62, %v4700_v47 }
 0x275   : > { %2168 = vst.msk [vmem:[#allocation3 + $0x64] sm:$0xf] %vm2142_vm8, %v2097_v59  ;;  %v2352_v4 = vpop.permute.xlu0 %2351  ;;  %4748 = vst [vmem:[#allocation4 + $0x50] sm:$0xff] %v4701_v2  ;;  %v8054_v6 = vpack.c.bf16 %v4701_v2, %v4701_v2 }
 0x276   : > { %2424 = vst.msk [vmem:[#allocation3 + $0x60] sm:$0xf] %vm2399_vm9, %v2352_v4 }
 0x277   : > { %4845 = vst [vmem:[#allocation5 + $0x70] sm:$0xf] %v8054_v6  ;;  %4988 = vst [vmem:[#allocation5 + $0x58] sm:$0xf] %v8054_v6 }
 0x278   : > { %v2101_v5 = vpop.permute.xlu1 %2100 }
 0x279   : > { %2170 = vst.msk [vmem:[#allocation3 + $0x6c] sm:$0xf] %vm2142_vm8, %v2101_v5  ;;  %v2356_v8 = vpop.permute.xlu0 %2355 }
 0x27a   : > { %2426 = vst.msk [vmem:[#allocation3 + $0x68] sm:$0xf] %vm2399_vm9, %v2356_v8 }
 0x27c   : > { %v2354_v9 = vpop.permute.xlu1 %2353  ;;  %v4757_v10 = vld [vmem:[#allocation4 + $0x4f] sm:$0xff] }
 0x27d   : > { %2425 = vst.msk [vmem:[#allocation3 + $0x64] sm:$0xf] %vm2399_vm9, %v2354_v9  ;;  %v2609_v63 = vpop.permute.xlu0 %2608  ;;  %v4996_v51 = vld [vmem:[#allocation4 + $0x51] sm:$0xff]  ;;  %v8046_v18 = vpack.c.bf16 %v4757_v10, %v4757_v10 }
 0x27e   : > { %v4900_v11 = vld [vmem:[#allocation4 + $0x4f] sm:$0xff]  ;;  %2681 = vst.msk [vmem:[#allocation3 + $0x60] sm:$0xf] %vm2656_vm10, %v2609_v63  ;;  %v8085_v14 = vpack.c.bf16 %v4996_v51, %v4996_v51  ;;  %v8546_v27 = vld [vmem:[#allocation5 + $0x4c] ss:$36 sps:$4 sm:$0xff]  }
 0x27f   : > { %v8069_v19 = vpack.c.bf16 %v4900_v11, %v4900_v11  ;;  %v5092_v20 = vld [vmem:[#allocation4 + $0x50] sm:$0xff]  ;;  %4797 = vst [vmem:[#allocation5 + $0x6c] sm:$0xf] %v8046_v18  ;;  %6034 = vmatprep.mubr.bf16.mxu1 %v8546_v27 }
 0x280   : > { %v2358_v15 = vpop.permute.xlu1 %2357  ;;  %v5140_v55 = vld [vmem:[#allocation4 + $0x51] sm:$0xff]  ;;  %v8100_v21 = vpack.c.bf16 %v5092_v20, %v5092_v20  ;;  %5036 = vst [vmem:[#allocation5 + $0x5c] sm:$0xf] %v8085_v14  ;;  %4893 = vst [vmem:[#allocation5 + $0x74] sm:$0xf] %v8085_v14 }
 0x281   : > { %2427 = vst.msk [vmem:[#allocation3 + $0x6c] sm:$0xf] %vm2399_vm9, %v2358_v15  ;;  %v8108_v7 = vpack.c.bf16 %v5140_v55, %v5140_v55  ;;  %4940 = vst [vmem:[#allocation5 + $0x54] sm:$0xf] %v8069_v19  ;;  %v2613_v54 = vpop.permute.xlu0 %2612 }
 0x282   : > { %5084 = vst [vmem:[#allocation5 + $0x3c] sm:$0xf] %v8069_v19  ;;  %5132 = vst [vmem:[#allocation5 + $0x40] sm:$0xf] %v8100_v21 }
 0x283   : > { %5180 = vst [vmem:[#allocation5 + $0x44] sm:$0xf] %v8108_v7  ;;  %2683 = vst.msk [vmem:[#allocation3 + $0x68] sm:$0xf] %vm2656_vm10, %v2613_v54 }
 0x284   : > { %v2611_v25 = vpop.permute.xlu1 %2610 }
 0x285   : > { %2682 = vst.msk [vmem:[#allocation3 + $0x64] sm:$0xf] %vm2656_vm10, %v2611_v25  ;;  %v817_v22 = vpop.permute.xlu0 %816 }
 0x286   : > { %885 = vst.msk [vmem:[#allocation3 + $0x70] sm:$0xf] %vm856_vm3, %v817_v22  ;;  %v8548_v28 = vld [vmem:[#allocation5 + $0x48] ss:$36 sps:$4 sm:$0xff]  }
 0x287   : > { %6035 = vmatmul.mubr.bf16.gmra.mxu1 %v8548_v28 }
 0x288   : > { %v2615_v24 = vpop.permute.xlu1 %2614 }
 0x289   : > { %2684 = vst.msk [vmem:[#allocation3 + $0x6c] sm:$0xf] %vm2656_vm10, %v2615_v24  ;;  %v821_v17 = vpop.permute.xlu0 %820 }
 0x28a   : > { %887 = vst.msk [vmem:[#allocation3 + $0x78] sm:$0xf] %vm856_vm3, %v821_v17 }
 0x28c   : > { %v819_v13 = vpop.permute.xlu1 %818  ;;  %v8549_v29 = vld [vmem:[#allocation3 + $0x60] sm:$0xff]  }
 0x28d   : > { %886 = vst.msk [vmem:[#allocation3 + $0x74] sm:$0xf] %vm856_vm3, %v819_v13  ;;  %8416 = vmatprep.mubr.msk.bf16.mxu0 %vm2828_vm11, %v8549_v29  ;;  %v1074_v30 = vpop.permute.xlu0 %1073 }
 0x28e   : > { %1142 = vst.msk [vmem:[#allocation3 + $0x70] sm:$0xf] %vm1113_vm4, %v1074_v30 }
 0x290   : > { %v823_v31 = vpop.permute.xlu1 %822  ;;  %v8550_v1 = vld [vmem:[#allocation3 + $0x68] sm:$0xff]  }
 0x291   : > { %888 = vst.msk [vmem:[#allocation3 + $0x7c] sm:$0xf] %vm856_vm3, %v823_v31  ;;  %8417 = vmatmul.mubr.msk.bf16.gmra.mxu0 %vm2828_vm11, %v8550_v1  ;;  %v1078_v34 = vpop.permute.xlu0 %1077  ;;  %vm10496_vm3 = vmmov %vm10495_vm1 }
 0x292   : > { %1144 = vst.msk [vmem:[#allocation3 + $0x78] sm:$0xf] %vm1113_vm4, %v1078_v34 }
 0x294   : > { %v1076_v60 = vpop.permute.xlu1 %1075 }
 0x295   : > { %1143 = vst.msk [vmem:[#allocation3 + $0x74] sm:$0xf] %vm1113_vm4, %v1076_v60  ;;  %v8406_v23 = vpop.f32.mrf.mxu0  ;;  %v1331_v37 = vpop.permute.xlu0 %1330 }
 0x296   : > { %v2972_v36 = vadd.f32 %v10031_v3, %v8406_v23  ;;  %1399 = vst.msk [vmem:[#allocation3 + $0x70] sm:$0xf] %vm1370_vm5, %v1331_v37 }
 0x297   : > { %v2963_v40 = vpop.f32.mrf.mxu0 }
 0x298   : > { %v1080_v35 = vpop.permute.xlu1 %1079  ;;  %v3056_v33 = vmax.f32 %v2972_v36, 0.0  ;;  %v2964_v42 = vadd.f32 %v10031_v3, %v2963_v40 }
 0x299   : > { %1145 = vst.msk [vmem:[#allocation3 + $0x7c] sm:$0xf] %vm1113_vm4, %v1080_v35  ;;  %v8407_v32 = vpop.f32.mrf.mxu0  ;;  %v1335_v38 = vpop.permute.xlu0 %1334  ;;  %vm10497_vm4 = vmmov %vm10495_vm1 }
 0x29a   : > { %v3344_v61 = vcombine.high %v3056_v33, %v3056_v33  ;;  %v3351_v26 = vrot.slane %v3056_v33, %v9746_v39  ;;  %v3054_v43 = vmax.f32 %v2964_v42, 0.0  ;;  %v2975_v44 = vadd.f32 %v10031_v3, %v8407_v32  ;;  %1401 = vst.msk [vmem:[#allocation3 + $0x78] sm:$0xf] %vm1370_vm5, %v1335_v38 }
 0x29b   : > { %v2966_v47 = vpop.f32.mrf.mxu0 }
 0x29c   : > { %v1333_v45 = vpop.permute.xlu1 %1332  ;;  %v3358_v46 = vrot.slane %v3344_v61, %v9746_v39  ;;  %v3359_v0 = vcombine.high %v3351_v26, %v3351_v26  ;;  %v7460_v49 = vrot.slane %v3351_v26, 9  ;;  %v3310_v48 = vcombine.high %v3054_v43, %v3054_v43 }
 0x29d   : > { %1400 = vst.msk [vmem:[#allocation3 + $0x74] sm:$0xf] %vm1370_vm5, %v1333_v45  ;;  %v3317_v50 = vrot.slane %v3054_v43, %v9746_v39  ;;  %v3057_v53 = vmax.f32 %v2975_v44, 0.0  ;;  %v1588_v58 = vpop.permute.xlu0 %1587  ;;  %v2967_v18 = vadd.f32 %v10031_v3, %v2966_v47 }
 0x29e   : > { %v3360_v56 = vcombine.high %v3358_v46, %v3358_v46  ;;  %v7461_v41 = vrot.slane %v3359_v0, 9  ;;  %v7462_v57 = vrot.slane %v3358_v46, 9  ;;  %v3324_v16 = vrot.slane %v3310_v48, %v9746_v39  ;;  %1656 = vst.msk [vmem:[#allocation3 + $0x70] sm:$0xf] %vm1627_vm6, %v1588_v58 }
 0x29f   : > { %v3325_v59 = vcombine.high %v3317_v50, %v3317_v50  ;;  %v7452_v62 = vrot.slane %v3317_v50, 9  ;;  %v3361_v52 = vcombine.high %v3057_v53, %v3057_v53  ;;  %v4218_v5 = vmax.f32 %v3351_v26, %v7460_v49 }
 0x2a0   : > { %v1337_v2 = vpop.permute.xlu1 %1336  ;;  %v7463_v4 = vrot.slane %v3360_v56, 9  ;;  %v3368_v6 = vrot.slane %v3057_v53, %v9746_v39  ;;  %v3326_v8 = vcombine.high %v3324_v16, %v3324_v16  ;;  %v7454_v63 = vrot.slane %v3324_v16, 9 }
 0x2a1   : > { %1402 = vst.msk [vmem:[#allocation3 + $0x7c] sm:$0xf] %vm1370_vm5, %v1337_v2  ;;  %v7453_v9 = vrot.slane %v3325_v59, 9  ;;  %v4210_v10 = vmax.f32 %v3317_v50, %v7452_v62  ;;  %v4219_v51 = vmax.f32 %v3359_v0, %v7461_v41  ;;  %v4220_v11 = vmax.f32 %v3358_v46, %v7462_v57  ;;  %v1592_v14 = vpop.permute.xlu0 %1591  ;;  %vm10498_vm5 = vmmov %vm10495_vm1 }
 0x2a2   : > { %v3375_v15 = vrot.slane %v3361_v52, %v9746_v39  ;;  %v7455_v19 = vrot.slane %v3326_v8, 9  ;;  %v4212_v55 = vmax.f32 %v3324_v16, %v7454_v63  ;;  %1658 = vst.msk [vmem:[#allocation3 + $0x78] sm:$0xf] %vm1627_vm6, %v1592_v14  ;;  %v4221_v54 = vmax.f32 %v3360_v56, %v7463_v4 }
 0x2a3   : > { %v4211_v20 = vmax.f32 %v3325_v59, %v7453_v9  ;;  %v4314_v21 = vmax.f32 %v4210_v10, %v4218_v5  ;;  %v3376_v27 = vcombine.high %v3368_v6, %v3368_v6  ;;  %v7464_v17 = vrot.slane %v3368_v6, 9 }
 0x2a4   : > { %v1590_v7 = vpop.permute.xlu1 %1589  ;;  %v4213_v25 = vmax.f32 %v3326_v8, %v7455_v19  ;;  %v4316_v24 = vmax.f32 %v4212_v55, %v4220_v11  ;;  %v3377_v28 = vcombine.high %v3375_v15, %v3375_v15  ;;  %v3055_v13 = vmax.f32 %v2967_v18, 0.0 }
 0x2a5   : > { %1657 = vst.msk [vmem:[#allocation3 + $0x74] sm:$0xf] %vm1627_vm6, %v1590_v7  ;;  %v4315_v22 = vmax.f32 %v4211_v20, %v4219_v51  ;;  %v1845_v29 = vpop.permute.xlu0 %1844  ;;  %v4517_v31 = vrot.slane %v4314_v21, %v9767_v12  ;;  %v7465_v35 = vrot.slane %v3376_v27, 9  ;;  %v7466_v40 = vrot.slane %v3375_v15, 9 }
 0x2a6   : > { %v4317_v30 = vmax.f32 %v4213_v25, %v4221_v54  ;;  %v4525_v34 = vrot.slane %v4316_v24, %v9767_v12  ;;  %1913 = vst.msk [vmem:[#allocation3 + $0x70] sm:$0xf] %vm1884_vm7, %v1845_v29  ;;  %v3327_v23 = vcombine.high %v3055_v13, %v3055_v13  ;;  %v3334_v36 = vrot.slane %v3055_v13, %v9746_v39 }
 0x2a7   : > { %v4521_v1 = vrot.slane %v4315_v22, %v9767_v12  ;;  %v7467_v44 = vrot.slane %v3377_v28, 9  ;;  %v4222_v38 = vmax.f32 %v3368_v6, %v7464_v17  ;;  %v4223_v50 = vmax.f32 %v3376_v27, %v7465_v35  ;;  %v8569_v35 = vld [vmem:[#allocation5 + $0x14] ss:$36 sps:$4 sm:$0xff]  }
 0x2a8   : > { %v1594_v60 = vpop.permute.xlu1 %1593  ;;  %v3341_v33 = vrot.slane %v3327_v23, %v9746_v39  ;;  %v3342_v42 = vcombine.high %v3334_v36, %v3334_v36  ;;  %v7456_v32 = vrot.slane %v3334_v36, 9  ;;  %v4529_v26 = vrot.slane %v4317_v30, %v9767_v12 }
 0x2a9   : > { %1659 = vst.msk [vmem:[#allocation3 + $0x7c] sm:$0xf] %vm1627_vm6, %v1594_v60  ;;  %v4702_v37 = vsel %vm4674_vm12, %v4521_v1, %v4517_v31  ;;  %v1849_v61 = vpop.permute.xlu0 %1848  ;;  %v4224_v53 = vmax.f32 %v3375_v15, %v7466_v40  ;;  %v4225_v59 = vmax.f32 %v3377_v28, %v7467_v44  ;;  %vm10499_vm6 = vmmov %vm10495_vm1 }
 0x2aa   : > { %v4703_v43 = vsel %vm4676_vm13, %v4525_v34, %v4702_v37  ;;  %1915 = vst.msk [vmem:[#allocation3 + $0x78] sm:$0xf] %vm1884_vm7, %v1849_v61  ;;  %v3343_v46 = vcombine.high %v3341_v33, %v3341_v33  ;;  %v7457_v0 = vrot.slane %v3342_v42, 9  ;;  %v7458_v49 = vrot.slane %v3341_v33, 9 }
 0x2ab   : > { %v4214_v48 = vmax.f32 %v3334_v36, %v7456_v32  ;;  %v4704_v62 = vsel %vm10496_vm3, %v4529_v26, %v4703_v43 }
 0x2ac   : > { %v1847_v45 = vpop.permute.xlu1 %1846  ;;  %v7459_v56 = vrot.slane %v3343_v46, 9  ;;  %v4215_v41 = vmax.f32 %v3342_v42, %v7457_v0  ;;  %v4216_v57 = vmax.f32 %v3341_v33, %v7458_v49  ;;  %v8567_v42 = vld [vmem:[#allocation5 + $0x10] ss:$36 sps:$4 sm:$0xff]  }
 0x2ad   : > { %1914 = vst.msk [vmem:[#allocation3 + $0x74] sm:$0xf] %vm1884_vm7, %v1847_v45  ;;  %v4318_v58 = vmax.f32 %v4214_v48, %v4222_v38  ;;  %v2103_v16 = vpop.permute.xlu0 %2102 }
 0x2ae   : > { %2171 = vst.msk [vmem:[#allocation3 + $0x70] sm:$0xf] %vm2142_vm8, %v2103_v16  ;;  %v4217_v47 = vmax.f32 %v3343_v46, %v7459_v56  ;;  %v4319_v2 = vmax.f32 %v4215_v41, %v4223_v50  ;;  %v4320_v4 = vmax.f32 %v4216_v57, %v4224_v53 }
 0x2af   : > { %v4533_v5 = vrot.slane %v4318_v58, %v9767_v12 }
 0x2b0   : > { %v1851_v52 = vpop.permute.xlu1 %1850  ;;  %v4321_v6 = vmax.f32 %v4217_v47, %v4225_v59  ;;  %v4537_v8 = vrot.slane %v4319_v2, %v9767_v12  ;;  %v4541_v9 = vrot.slane %v4320_v4, %v9767_v12 }
 0x2b1   : > { %1916 = vst.msk [vmem:[#allocation3 + $0x7c] sm:$0xf] %vm1884_vm7, %v1851_v52  ;;  %v4705_v63 = vsel %vm4680_vm15, %v4533_v5, %v4704_v62  ;;  %v2107_v10 = vpop.permute.xlu0 %2106  ;;  %vm10500_vm7 = vmmov %vm10495_vm1 }
 0x2b2   : > { %2173 = vst.msk [vmem:[#allocation3 + $0x78] sm:$0xf] %vm2142_vm8, %v2107_v10  ;;  %v4545_v11 = vrot.slane %v4321_v6, %v9767_v12  ;;  %v4706_v15 = vsel %vm4682_vm0, %v4537_v8, %v4705_v63 }
 0x2b3   : > { %v4707_v18 = vsel %vm4684_vm2, %v4541_v9, %v4706_v15 }
 0x2b4   : > { %v2105_v51 = vpop.permute.xlu1 %2104  ;;  %v4708_v14 = vsel %vm4686_vm14, %v4545_v11, %v4707_v18 }
 0x2b5   : > { %2172 = vst.msk [vmem:[#allocation3 + $0x74] sm:$0xf] %vm2142_vm8, %v2105_v51  ;;  %v2360_v19 = vpop.permute.xlu0 %2359  ;;  %4749 = vst [vmem:[#allocation4 + $0x68] sm:$0xff] %v4708_v14  ;;  %v8078_v55 = vpack.c.bf16 %v4708_v14, %v4708_v14 }
 0x2b6   : > { %2428 = vst.msk [vmem:[#allocation3 + $0x70] sm:$0xf] %vm2399_vm9, %v2360_v19 }
 0x2b7   : > { %4989 = vst [vmem:[#allocation5 + $0x7c] sm:$0xf] %v8078_v55  ;;  %4846 = vst [vmem:[#allocation5 + $0x94] sm:$0xf] %v8078_v55 }
 0x2b8   : > { %v2109_v20 = vpop.permute.xlu1 %2108 }
 0x2b9   : > { %2174 = vst.msk [vmem:[#allocation3 + $0x7c] sm:$0xf] %vm2142_vm8, %v2109_v20  ;;  %v2364_v21 = vpop.permute.xlu0 %2363  ;;  %vm10501_vm8 = vmmov %vm10495_vm1 }
 0x2ba   : > { %2430 = vst.msk [vmem:[#allocation3 + $0x78] sm:$0xf] %vm2399_vm9, %v2364_v21 }
 0x2bc   : > { %v2362_v7 = vpop.permute.xlu1 %2361  ;;  %v4997_v25 = vld [vmem:[#allocation4 + $0x69] sm:$0xff] }
 0x2bd   : > { %2429 = vst.msk [vmem:[#allocation3 + $0x74] sm:$0xf] %vm2399_vm9, %v2362_v7  ;;  %v2617_v54 = vpop.permute.xlu0 %2616  ;;  %v4758_v22 = vld [vmem:[#allocation4 + $0x67] sm:$0xff]  ;;  %v8086_v28 = vpack.c.bf16 %v4997_v25, %v4997_v25 }
 0x2be   : > { %v5141_v24 = vld [vmem:[#allocation4 + $0x69] sm:$0xff]  ;;  %2685 = vst.msk [vmem:[#allocation3 + $0x70] sm:$0xf] %vm2656_vm10, %v2617_v54  ;;  %v8047_v17 = vpack.c.bf16 %v4758_v22, %v4758_v22 }
 0x2bf   : > { %v8109_v13 = vpack.c.bf16 %v5141_v24, %v5141_v24  ;;  %v5045_v29 = vld [vmem:[#allocation4 + $0x67] sm:$0xff]  ;;  %5037 = vst [vmem:[#allocation5 + $0x80] sm:$0xf] %v8086_v28  ;;  %4894 = vst [vmem:[#allocation5 + $0x98] sm:$0xf] %v8086_v28 }
 0x2c0   : > { %v2366_v27 = vpop.permute.xlu1 %2365  ;;  %v5093_v30 = vld [vmem:[#allocation4 + $0x68] sm:$0xff]  ;;  %v8093_v31 = vpack.c.bf16 %v5045_v29, %v5045_v29  ;;  %4798 = vst [vmem:[#allocation5 + $0x90] sm:$0xf] %v8047_v17  ;;  %4941 = vst [vmem:[#allocation5 + $0x78] sm:$0xf] %v8047_v17 }
 0x2c1   : > { %2431 = vst.msk [vmem:[#allocation3 + $0x7c] sm:$0xf] %vm2399_vm9, %v2366_v27  ;;  %v8101_v1 = vpack.c.bf16 %v5093_v30, %v5093_v30  ;;  %5181 = vst [vmem:[#allocation5 + $0x68] sm:$0xf] %v8109_v13  ;;  %v2621_v34 = vpop.permute.xlu0 %2620  ;;  %v8574_v4 = vld [vmem:[#allocation5 + $0x58] ss:$36 sps:$4 sm:$0xff]  }
 0x2c2   : > { %5085 = vst [vmem:[#allocation5 + $0x60] sm:$0xf] %v8093_v31  ;;  %2687 = vst.msk [vmem:[#allocation3 + $0x78] sm:$0xf] %vm2656_vm10, %v2621_v34 }
 0x2c3   : > { %5133 = vst [vmem:[#allocation5 + $0x64] sm:$0xf] %v8101_v1  ;;  %vm10502_vm9 = vmmov %vm10495_vm1 }
 0x2c4   : > { %v2619_v60 = vpop.permute.xlu1 %2618 }
 0x2c5   : > { %2686 = vst.msk [vmem:[#allocation3 + $0x74] sm:$0xf] %vm2656_vm10, %v2619_v60 }
 0x2c6   : > { %v8572_v43 = vld [vmem:[#allocation5 + $0x5c] ss:$36 sps:$4 sm:$0xff]  }
 0x2c8   : > { %v2623_v23 = vpop.permute.xlu1 %2622 }
 0x2c9   : > { %2688 = vst.msk [vmem:[#allocation3 + $0x7c] sm:$0xf] %vm2656_vm10, %v2623_v23  ;;  %vm10503_vm10 = vmmov %vm10495_vm1 }
 0x2cc   : > { %v8561_v36 = vld [vmem:[#allocation3 + $0x70] sm:$0xff]  }
 0x2cd   : > { %8420 = vmatprep.mubr.msk.bf16.mxu0 %vm2828_vm11, %v8561_v36 }
 0x2d0   : > { %v8564_v37 = vld [vmem:[#allocation3 + $0x78] sm:$0xff]  }
 0x2d1   : > { %8421 = vmatmul.mubr.msk.bf16.gmra.mxu0 %vm2828_vm11, %v8564_v37  ;;  %vm10504_vm11 = vmmov %vm10495_vm1 }
 0x2d2   : > { %6156 = vmatprep.mubr.bf16.mxu0 %v8569_v35 }
 0x2d5   : > { %v8410_v40 = vpop.f32.mrf.mxu0 }
 0x2d6   : > { %v2988_v33 = vadd.f32 %v10031_v3, %v8410_v40 }
 0x2d7   : > { %v2979_v32 = vpop.f32.mrf.mxu0 }
 0x2d8   : > { %v3060_v61 = vmax.f32 %v2988_v33, 0.0  ;;  %v2980_v26 = vadd.f32 %v10031_v3, %v2979_v32 }
 0x2d9   : > { %v8411_v44 = vpop.f32.mrf.mxu0  ;;  %6157 = vmatmul.mubr.bf16.vlgmr.msra.gmra.mxu0 %v8567_v42 }
 0x2da   : > { %v3412_v38 = vcombine.high %v3060_v61, %v3060_v61  ;;  %v3419_v45 = vrot.slane %v3060_v61, %v9746_v39  ;;  %v3058_v46 = vmax.f32 %v2980_v26, 0.0  ;;  %v2991_v0 = vadd.f32 %v10031_v3, %v8411_v44  ;;  %6164 = vmatprep.mubr.bf16.mxu0 %v8572_v43 }
 0x2db   : > { %v2982_v2 = vpop.f32.mrf.mxu0 }
 0x2dc   : > { %v3426_v49 = vrot.slane %v3412_v38, %v9746_v39  ;;  %v3427_v48 = vcombine.high %v3419_v45, %v3419_v45  ;;  %v7476_v50 = vrot.slane %v3419_v45, 9  ;;  %v3378_v53 = vcombine.high %v3058_v46, %v3058_v46 }
 0x2dd   : > { %v3385_v56 = vrot.slane %v3058_v46, %v9746_v39  ;;  %v3061_v41 = vmax.f32 %v2991_v0, 0.0  ;;  %v2983_v14 = vadd.f32 %v10031_v3, %v2982_v2 }
 0x2de   : > { %v3428_v57 = vcombine.high %v3426_v49, %v3426_v49  ;;  %v7477_v58 = vrot.slane %v3427_v48, 9  ;;  %v7478_v16 = vrot.slane %v3426_v49, 9  ;;  %v3392_v59 = vrot.slane %v3378_v53, %v9746_v39 }
 0x2df   : > { %v3393_v62 = vcombine.high %v3385_v56, %v3385_v56  ;;  %v7468_v52 = vrot.slane %v3385_v56, 9  ;;  %v3429_v47 = vcombine.high %v3061_v41, %v3061_v41  ;;  %v4234_v6 = vmax.f32 %v3419_v45, %v7476_v50  ;;  %v8581_v50 = vld [vmem:[#allocation6 + $0xf8] sm:$0xff]  }
 0x2e0   : > { %v7479_v5 = vrot.slane %v3428_v57, 9  ;;  %v3436_v8 = vrot.slane %v3061_v41, %v9746_v39  ;;  %v3394_v9 = vcombine.high %v3392_v59, %v3392_v59  ;;  %v7470_v10 = vrot.slane %v3392_v59, 9  ;;  %v8582_v41 = vld [vmem:[#allocation6 + $0xb8] sm:$0xff]   ;;  %8254 = vmatprep.subr.bf16.mxu1 %v8581_v50 }
 0x2e1   : > { %v7469_v63 = vrot.slane %v3393_v62, 9  ;;  %v4226_v51 = vmax.f32 %v3385_v56, %v7468_v52  ;;  %6165 = vmatmul.mubr.bf16.gmra.mxu0 %v8574_v4  ;;  %v4235_v11 = vmax.f32 %v3427_v48, %v7477_v58  ;;  %v4236_v15 = vmax.f32 %v3426_v49, %v7478_v16  ;;  %8255 = vmatpush3.bf16.msra.mxu1 %v8582_v41  ;;  %v8583_v4 = vld [vmem:[#allocation6 + $0xf0] sm:$0xff]  }
 0x2e2   : > { %v3443_v18 = vrot.slane %v3429_v47, %v9746_v39  ;;  %v7471_v19 = vrot.slane %v3394_v9, 9  ;;  %v4228_v55 = vmax.f32 %v3392_v59, %v7470_v10  ;;  %v4237_v7 = vmax.f32 %v3428_v57, %v7479_v5  ;;  %v8584_v5 = vld [vmem:[#allocation6 + $0xb0] sm:$0xff]   ;;  %8256 = vmatprep.subr.bf16.mxu1 %v8583_v4  ;;  %v8586_v10 = vld [vmem:[#allocation6 + $0xa8] sm:$0xff]  }
 0x2e3   : > { %v4227_v20 = vmax.f32 %v3393_v62, %v7469_v63  ;;  %v4322_v21 = vmax.f32 %v4226_v51, %v4234_v6  ;;  %v3444_v24 = vcombine.high %v3436_v8, %v3436_v8  ;;  %v7480_v28 = vrot.slane %v3436_v8, 9  ;;  %v8585_v6 = vld [vmem:[#allocation6 + $0xe8] sm:$0xff]  }
 0x2e4   : > { %v4229_v54 = vmax.f32 %v3394_v9, %v7471_v19  ;;  %v4324_v22 = vmax.f32 %v4228_v55, %v4236_v15  ;;  %v3445_v27 = vcombine.high %v3443_v18, %v3443_v18  ;;  %v3059_v17 = vmax.f32 %v2983_v14, 0.0  ;;  %v8589_v14 = vld [vmem:[#allocation6 + $0xd8] sm:$0xff]  }
 0x2e5   : > { %v4323_v25 = vmax.f32 %v4227_v20, %v4235_v11  ;;  %v4549_v29 = vrot.slane %v4322_v21, %v9767_v12  ;;  %v7481_v60 = vrot.slane %v3444_v24, 9  ;;  %v7482_v23 = vrot.slane %v3443_v18, 9  ;;  %8257 = vmatpush3.bf16.msra.mxu1 %v8584_v5  ;;  %v8587_v11 = vld [vmem:[#allocation6 + $0xe0] sm:$0xff]   ;;  %v8590_v19 = vld [vmem:[#allocation6 + $0x98] sm:$0xff]   ;;  %v8591_v20 = vld [vmem:[#allocation6 + $0xd0] sm:$0xff]  }
 0x2e6   : > { %v4325_v13 = vmax.f32 %v4229_v54, %v4237_v7  ;;  %v4557_v31 = vrot.slane %v4324_v22, %v9767_v12  ;;  %v3395_v3 = vcombine.high %v3059_v17, %v3059_v17  ;;  %v3402_v1 = vrot.slane %v3059_v17, %v9746_v39  ;;  %8258 = vmatprep.subr.bf16.mxu1 %v8585_v6 }
 0x2e7   : > { %v4553_v30 = vrot.slane %v4323_v25, %v9767_v12  ;;  %v7483_v42 = vrot.slane %v3445_v27, 9  ;;  %v4238_v32 = vmax.f32 %v3436_v8, %v7480_v28  ;;  %v4239_v38 = vmax.f32 %v3444_v24, %v7481_v60 }
 0x2e8   : > { %v3409_v36 = vrot.slane %v3395_v3, %v9746_v39  ;;  %v3410_v37 = vcombine.high %v3402_v1, %v3402_v1  ;;  %v7472_v35 = vrot.slane %v3402_v1, 9  ;;  %v4561_v40 = vrot.slane %v4325_v13, %v9767_v12  ;;  %v8592_v13 = vld [vmem:[#allocation6 + $0x90] sm:$0xff]  }
 0x2e9   : > { %v4709_v34 = vsel %vm4674_vm12, %v4553_v30, %v4549_v29  ;;  %v4240_v45 = vmax.f32 %v3443_v18, %v7482_v23  ;;  %v4241_v53 = vmax.f32 %v3445_v27, %v7483_v42  ;;  %8259 = vmatpush3.bf16.msra.mxu1 %v8586_v10  ;;  %v8588_v18 = vld [vmem:[#allocation6 + $0xa0] sm:$0xff]   ;;  %v8596_v29 = vld [vmem:[#allocation6 + $0xc8] sm:$0xff]   ;;  %v10178_v23 = vld [vmem:[%s10487_s2] ss:$0 sm:$0xff] }
 0x2ea   : > { %v4710_v33 = vsel %vm4676_vm13, %v4557_v31, %v4709_v34  ;;  %v3411_v61 = vcombine.high %v3409_v36, %v3409_v36  ;;  %v7473_v26 = vrot.slane %v3410_v37, 9  ;;  %v7474_v43 = vrot.slane %v3409_v36, 9  ;;  %8260 = vmatprep.subr.bf16.mxu1 %v8587_v11  ;;  %v8597_v30 = vld [vmem:[#allocation6 + $0x88] sm:$0xff]   ;;  %v8602_v34 = vld [vmem:[#allocation6 + $0x80] sm:$0xff]  }
 0x2eb   : > { %v4230_v44 = vmax.f32 %v3402_v1, %v7472_v35  ;;  %v4711_v56 = vsel %vm10497_vm4, %v4561_v40, %v4710_v33  ;;  %v8601_v1 = vld [vmem:[#allocation6 + $0xc0] sm:$0xff]  }
 0x2ec   : > { %v7475_v46 = vrot.slane %v3411_v61, 9  ;;  %v4231_v0 = vmax.f32 %v3410_v37, %v7473_v26  ;;  %v4232_v49 = vmax.f32 %v3409_v36, %v7474_v43 }
 0x2ed   : > { %v4326_v48 = vmax.f32 %v4230_v44, %v4238_v32  ;;  %8261 = vmatpush3.bf16.msra.mxu1 %v8588_v18 }
 0x2ee   : > { %v4233_v57 = vmax.f32 %v3411_v61, %v7475_v46  ;;  %v4327_v58 = vmax.f32 %v4231_v0, %v4239_v38  ;;  %v4328_v16 = vmax.f32 %v4232_v49, %v4240_v45  ;;  %8262 = vmatprep.subr.bf16.mxu1 %v8589_v14 }
 0x2ef   : > { %v4565_v59 = vrot.slane %v4326_v48, %v9767_v12 }
 0x2f0   : > { %v4329_v62 = vmax.f32 %v4233_v57, %v4241_v53  ;;  %v4569_v52 = vrot.slane %v4327_v58, %v9767_v12  ;;  %v4573_v47 = vrot.slane %v4328_v16, %v9767_v12 }
 0x2f1   : > { %v4712_v2 = vsel %vm4680_vm15, %v4565_v59, %v4711_v56  ;;  %8263 = vmatpush3.bf16.msra.mxu1 %v8590_v19 }
 0x2f2   : > { %v4577_v8 = vrot.slane %v4329_v62, %v9767_v12  ;;  %v4713_v9 = vsel %vm4682_vm0, %v4569_v52, %v4712_v2  ;;  %8264 = vmatprep.subr.bf16.mxu1 %v8591_v20 }
 0x2f3   : > { %v4714_v63 = vsel %vm4684_vm2, %v4573_v47, %v4713_v9 }
 0x2f4   : > { %v4715_v51 = vsel %vm4686_vm14, %v4577_v8, %v4714_v63 }
 0x2f5   : > { %4750 = vst [vmem:[#allocation4 + $0x80] sm:$0xff] %v4715_v51  ;;  %v8056_v15 = vpack.c.bf16 %v4715_v51, %v4715_v51  ;;  %8265 = vmatpush3.bf16.msra.mxu1 %v8592_v13 }
 0x2f6   : > { %8266 = vmatprep.subr.bf16.mxu1 %v8596_v29 }
 0x2f7   : > { %4847 = vst [vmem:[#allocation5 + $0xb8] sm:$0xf] %v8056_v15  ;;  %4990 = vst [vmem:[#allocation5 + $0xa0] sm:$0xf] %v8056_v15 }
 0x2f9   : > { %8267 = vmatpush3.bf16.msra.mxu1 %v8597_v30 }
 0x2fa   : > { %8268 = vmatprep.subr.bf16.mxu1 %v8601_v1 }
 0x2fc   : > { %v4759_v55 = vld [vmem:[#allocation4 + $0x7f] sm:$0xff] }
 0x2fd   : > { %v4998_v21 = vld [vmem:[#allocation4 + $0x81] sm:$0xff]  ;;  %v8048_v54 = vpack.c.bf16 %v4759_v55, %v4759_v55  ;;  %8269 = vmatpush3.bf16.msra.mxu1 %v8602_v34 }
 0x2fe   : > { %v5142_v7 = vld [vmem:[#allocation4 + $0x81] sm:$0xff]  ;;  %v8087_v25 = vpack.c.bf16 %v4998_v21, %v4998_v21 }
 0x2ff   : > { %v8110_v22 = vpack.c.bf16 %v5142_v7, %v5142_v7  ;;  %v5046_v24 = vld [vmem:[#allocation4 + $0x7f] sm:$0xff]  ;;  %4799 = vst [vmem:[#allocation5 + $0xb4] sm:$0xf] %v8048_v54  ;;  %4942 = vst [vmem:[#allocation5 + $0x9c] sm:$0xf] %v8048_v54 }
 0x300   : > { %v5094_v27 = vld [vmem:[#allocation4 + $0x80] sm:$0xff]  ;;  %v8094_v28 = vpack.c.bf16 %v5046_v24, %v5046_v24  ;;  %5038 = vst [vmem:[#allocation5 + $0xa4] sm:$0xf] %v8087_v25  ;;  %4895 = vst [vmem:[#allocation5 + $0xbc] sm:$0xf] %v8087_v25 }
 0x301   : > { %v8102_v17 = vpack.c.bf16 %v5094_v27, %v5094_v27  ;;  %5182 = vst [vmem:[#allocation5 + $0x8c] sm:$0xf] %v8110_v22  ;;  %v8575_v31 = vld [vmem:[#allocation5 + $0x94] ss:$36 sps:$4 sm:$0xff]  }
 0x302   : > { %5086 = vst [vmem:[#allocation5 + $0x84] sm:$0xf] %v8094_v28  ;;  %6042 = vmatprep.mubr.bf16.mxu1 %v8575_v31 }
 0x303   : > { %5134 = vst [vmem:[#allocation5 + $0x88] sm:$0xf] %v8102_v17 }
 0x306   : > { %v8577_v3 = vld [vmem:[#allocation5 + $0x90] ss:$36 sps:$4 sm:$0xff]  }
 0x307   : > { %6043 = vmatmul.mubr.bf16.gmra.mxu1 %v8577_v3 }
 0x315   : > { %v8414_v60 = vpop.f32.mrf.mxu0 }
 0x316   : > { %v3004_v36 = vadd.f32 %v10178_v23, %v8414_v60 }
 0x317   : > { %v2995_v37 = vpop.f32.mrf.mxu0 }
 0x318   : > { %v3064_v35 = vmax.f32 %v3004_v36, 0.0  ;;  %v2996_v40 = vadd.f32 %v10178_v23, %v2995_v37 }
 0x319   : > { %v8415_v33 = vpop.f32.mrf.mxu0 }
 0x31a   : > { %v3480_v42 = vcombine.high %v3064_v35, %v3064_v35  ;;  %v3487_v32 = vrot.slane %v3064_v35, %v9746_v39  ;;  %v3062_v61 = vmax.f32 %v2996_v40, 0.0  ;;  %v3007_v26 = vadd.f32 %v10178_v23, %v8415_v33 }
 0x31b   : > { %v2998_v58 = vpop.f32.mrf.mxu0 }
 0x31c   : > { %v3494_v43 = vrot.slane %v3480_v42, %v9746_v39  ;;  %v3495_v44 = vcombine.high %v3487_v32, %v3487_v32  ;;  %v7492_v38 = vrot.slane %v3487_v32, 9  ;;  %v3446_v45 = vcombine.high %v3062_v61, %v3062_v61 }
 0x31d   : > { %v3453_v46 = vrot.slane %v3062_v61, %v9746_v39  ;;  %v3065_v0 = vmax.f32 %v3007_v26, 0.0  ;;  %v2999_v9 = vadd.f32 %v10178_v23, %v2998_v58 }
 0x31e   : > { %v3496_v49 = vcombine.high %v3494_v43, %v3494_v43  ;;  %v7493_v48 = vrot.slane %v3495_v44, 9  ;;  %v7494_v50 = vrot.slane %v3494_v43, 9  ;;  %v3460_v53 = vrot.slane %v3446_v45, %v9746_v39 }
 0x31f   : > { %v3461_v56 = vcombine.high %v3453_v46, %v3453_v46  ;;  %v7484_v41 = vrot.slane %v3453_v46, 9  ;;  %v3497_v57 = vcombine.high %v3065_v0, %v3065_v0  ;;  %v4250_v59 = vmax.f32 %v3487_v32, %v7492_v38 }
 0x320   : > { %v7495_v16 = vrot.slane %v3496_v49, 9  ;;  %v3504_v62 = vrot.slane %v3065_v0, %v9746_v39  ;;  %v3462_v52 = vcombine.high %v3460_v53, %v3460_v53  ;;  %v7486_v2 = vrot.slane %v3460_v53, 9  ;;  %v8611_v0 = vld [vmem:[#allocation6 + $0x238] sm:$0xff]  }
 0x321   : > { %v7485_v47 = vrot.slane %v3461_v56, 9  ;;  %v4242_v4 = vmax.f32 %v3453_v46, %v7484_v41  ;;  %v4251_v5 = vmax.f32 %v3495_v44, %v7493_v48  ;;  %v4252_v6 = vmax.f32 %v3494_v43, %v7494_v50  ;;  %v8609_v46 = vld [vmem:[#allocation6 + $0x1f8] sm:$0xff]   ;;  %8424 = vmatprep.subr.bf16.mxu0 %v8611_v0 }
 0x322   : > { %v3511_v8 = vrot.slane %v3497_v57, %v9746_v39  ;;  %v7487_v63 = vrot.slane %v3462_v52, 9  ;;  %v4244_v51 = vmax.f32 %v3460_v53, %v7486_v2  ;;  %v4253_v15 = vmax.f32 %v3496_v49, %v7495_v16  ;;  %8334 = vmatprep.subr.bf16.mxu1 %v8609_v46  ;;  %8425 = vmatpush3.bf16.msra.mxu0 %v8611_v0  ;;  %v8614_v16 = vld [vmem:[#allocation6 + $0x230] sm:$0xff]  }
 0x323   : > { %v4243_v10 = vmax.f32 %v3461_v56, %v7485_v47  ;;  %v4330_v11 = vmax.f32 %v4242_v4, %v4250_v59  ;;  %v3512_v20 = vcombine.high %v3504_v62, %v3504_v62  ;;  %v7496_v21 = vrot.slane %v3504_v62, 9  ;;  %8426 = vmatprep.subr.bf16.mxu0 %v8614_v16 }
 0x324   : > { %v4245_v18 = vmax.f32 %v3462_v52, %v7487_v63  ;;  %v4332_v19 = vmax.f32 %v4244_v51, %v4252_v6  ;;  %v3513_v55 = vcombine.high %v3511_v8, %v3511_v8  ;;  %v3063_v7 = vmax.f32 %v2999_v9, 0.0  ;;  %v8617_v52 = vld [vmem:[#allocation6 + $0x228] sm:$0xff]   ;;  %v8623_v6 = vld [vmem:[#allocation6 + $0x218] sm:$0xff]   ;;  %v8626_v9 = vld [vmem:[#allocation6 + $0x210] sm:$0xff]  }
 0x325   : > { %v4331_v14 = vmax.f32 %v4243_v10, %v4251_v5  ;;  %v4581_v25 = vrot.slane %v4330_v11, %v9767_v12  ;;  %v7497_v13 = vrot.slane %v3512_v20, 9  ;;  %v7498_v29 = vrot.slane %v3511_v8, 9  ;;  %v8620_v5 = vld [vmem:[#allocation6 + $0x220] sm:$0xff]  }
 0x326   : > { %v4333_v54 = vmax.f32 %v4245_v18, %v4253_v15  ;;  %v4589_v24 = vrot.slane %v4332_v19, %v9767_v12  ;;  %v3463_v27 = vcombine.high %v3063_v7, %v3063_v7  ;;  %v3470_v28 = vrot.slane %v3063_v7, %v9746_v39  ;;  %8427 = vmatpush3.bf16.msra.mxu0 %v8614_v16 }
 0x327   : > { %v4585_v22 = vrot.slane %v4331_v14, %v9767_v12  ;;  %v7499_v60 = vrot.slane %v3513_v55, 9  ;;  %v4254_v36 = vmax.f32 %v3504_v62, %v7496_v21  ;;  %v4255_v42 = vmax.f32 %v3512_v20, %v7497_v13  ;;  %8428 = vmatprep.subr.bf16.mxu0 %v8617_v52  ;;  %v5146_v14 = vld [vmem:[#allocation4 + $0xe1] sm:$0xff] }
 0x328   : > { %v3477_v30 = vrot.slane %v3463_v27, %v9746_v39  ;;  %v3478_v31 = vcombine.high %v3470_v28, %v3470_v28  ;;  %v7488_v3 = vrot.slane %v3470_v28, 9  ;;  %v4593_v1 = vrot.slane %v4333_v54, %v9767_v12  ;;  %v5050_v20 = vld [vmem:[#allocation4 + $0xdf] sm:$0xff] }
 0x329   : > { %v4716_v17 = vsel %vm4674_vm12, %v4585_v22, %v4581_v25  ;;  %v4256_v32 = vmax.f32 %v3511_v8, %v7498_v29  ;;  %v4257_v38 = vmax.f32 %v3513_v55, %v7499_v60  ;;  %v10207_v8 = vpop.f32.mrf.mxu1  ;;  %v8657_v55 = vld [vmem:[#allocation4] sm:$0xff]  ;;  %v8114_v7 = vpack.c.bf16 %v5146_v14, %v5146_v14  ;;  %v8634_v27 = vld [vmem:[#allocation6 + $0x208] sm:$0xff]  }
 0x32a   : > { %v4717_v34 = vsel %vm4676_vm13, %v4589_v24, %v4716_v17  ;;  %v3479_v37 = vcombine.high %v3477_v30, %v3477_v30  ;;  %v7489_v35 = vrot.slane %v3478_v31, 9  ;;  %v7490_v40 = vrot.slane %v3477_v30, 9  ;;  %8429 = vmatpush3.bf16.msra.mxu0 %v8617_v52 }
 0x32b   : > { %v4246_v33 = vmax.f32 %v3470_v28, %v7488_v3  ;;  %v4718_v45 = vsel %vm10498_vm5, %v4593_v1, %v4717_v34  ;;  %8430 = vmatprep.subr.bf16.mxu0 %v8620_v5  ;;  %v8106_v21 = vpack.c.bf16 %v8657_v55, %v8657_v55  ;;  %v8098_v25 = vpack.c.bf16 %v5050_v20, %v5050_v20  ;;  %v10209_v22 = vpop.f32.mrf.mxu1 }
 0x32c   : > { %v7491_v61 = vrot.slane %v3479_v37, 9  ;;  %v4247_v26 = vmax.f32 %v3478_v31, %v7489_v35  ;;  %v4248_v43 = vmax.f32 %v3477_v30, %v7490_v40  ;;  %5186 = vst [vmem:[#allocation5 + $0x11c] sm:$0xf] %v8114_v7  ;;  %v8641_v30 = vld [vmem:[#allocation6 + $0x200] sm:$0xff]  }
 0x32d   : > { %v4334_v44 = vmax.f32 %v4246_v33, %v4254_v36  ;;  %5138 = vst [vmem:[#allocation5 + $0x118] sm:$0xf] %v8106_v21  ;;  %5090 = vst [vmem:[#allocation5 + $0x114] sm:$0xf] %v8098_v25  ;;  %v10211_v24 = vpop.f32.mrf.mxu1 }
 0x32e   : > { %v4249_v49 = vmax.f32 %v3479_v37, %v7491_v61  ;;  %v4335_v48 = vmax.f32 %v4247_v26, %v4255_v42  ;;  %v4336_v50 = vmax.f32 %v4248_v43, %v4256_v32  ;;  %8431 = vmatpush3.bf16.msra.mxu0 %v8620_v5 }
 0x32f   : > { %v4597_v53 = vrot.slane %v4334_v44, %v9767_v12  ;;  %8432 = vmatprep.subr.bf16.mxu0 %v8623_v6  ;;  %v10213_v13 = vpop.f32.mrf.mxu1 }
 0x330   : > { %v4337_v56 = vmax.f32 %v4249_v49, %v4257_v38  ;;  %v4601_v41 = vrot.slane %v4335_v48, %v9767_v12  ;;  %v4605_v57 = vrot.slane %v4336_v50, %v9767_v12 }
 0x331   : > { %v4719_v58 = vsel %vm4680_vm15, %v4597_v53, %v4718_v45 }
 0x332   : > { %v4609_v59 = vrot.slane %v4337_v56, %v9767_v12  ;;  %v4720_v62 = vsel %vm4682_vm0, %v4601_v41, %v4719_v58  ;;  %8433 = vmatpush3.bf16.msra.mxu0 %v8623_v6 }
 0x333   : > { %v4721_v47 = vsel %vm4684_vm2, %v4605_v57, %v4720_v62  ;;  %8434 = vmatprep.subr.bf16.mxu0 %v8626_v9 }
 0x334   : > { %v4722_v2 = vsel %vm4686_vm14, %v4609_v59, %v4721_v47 }
 0x335   : > { %4751 = vst [vmem:[#allocation4 + $0x98] sm:$0xff] %v4722_v2  ;;  %v8080_v4 = vpack.c.bf16 %v4722_v2, %v4722_v2 }
 0x336   : > { %8435 = vmatpush3.bf16.msra.mxu0 %v8626_v9 }
 0x337   : > { %4991 = vst [vmem:[#allocation5 + $0xc4] sm:$0xf] %v8080_v4  ;;  %4848 = vst [vmem:[#allocation5 + $0xdc] sm:$0xf] %v8080_v4  ;;  %8436 = vmatprep.subr.bf16.mxu0 %v8634_v27 }
 0x33a   : > { %8437 = vmatpush3.bf16.msra.mxu0 %v8634_v27 }
 0x33b   : > { %8438 = vmatprep.subr.bf16.mxu0 %v8641_v30 }
 0x33c   : > { %v4999_v63 = vld [vmem:[#allocation4 + $0x99] sm:$0xff] }
 0x33d   : > { %v4760_v10 = vld [vmem:[#allocation4 + $0x97] sm:$0xff]  ;;  %v8088_v11 = vpack.c.bf16 %v4999_v63, %v4999_v63 }
 0x33e   : > { %v5143_v51 = vld [vmem:[#allocation4 + $0x99] sm:$0xff]  ;;  %v8049_v15 = vpack.c.bf16 %v4760_v10, %v4760_v10  ;;  %v8580_v17 = vld [vmem:[#allocation5 + $0xa0] ss:$36 sps:$4 sm:$0xff]   ;;  %8439 = vmatpush3.bf16.msra.mxu0 %v8641_v30 }
 0x33f   : > { %v8111_v18 = vpack.c.bf16 %v5143_v51, %v5143_v51  ;;  %v5095_v19 = vld [vmem:[#allocation4 + $0x98] sm:$0xff]  ;;  %5039 = vst [vmem:[#allocation5 + $0xc8] sm:$0xf] %v8088_v11  ;;  %4896 = vst [vmem:[#allocation5 + $0xe0] sm:$0xf] %v8088_v11 }
 0x340   : > { %v8103_v54 = vpack.c.bf16 %v5095_v19, %v5095_v19  ;;  %4800 = vst [vmem:[#allocation5 + $0xd8] sm:$0xf] %v8049_v15  ;;  %4943 = vst [vmem:[#allocation5 + $0xc0] sm:$0xf] %v8049_v15 }
 0x341   : > { %5183 = vst [vmem:[#allocation5 + $0xb0] sm:$0xf] %v8111_v18  ;;  %5087 = vst [vmem:[#allocation5 + $0xa8] sm:$0xf] %v8049_v15 }
 0x342   : > { %5135 = vst [vmem:[#allocation5 + $0xac] sm:$0xf] %v8103_v54 }
 0x346   : > { %v8578_v28 = vld [vmem:[#allocation5 + $0xa4] ss:$36 sps:$4 sm:$0xff]  }
 0x347   : > { %6172 = vmatprep.mubr.bf16.mxu0 %v8578_v28  ;;  %v8236_v29 = vpop.f32.mrf.mxu1 }
 0x348   : > { %6173 = vmatmul.mubr.bf16.gmra.mxu0 %v8580_v17 }
 0x349   : > { %v8237_v31 = vpop.f32.mrf.mxu1 }
 0x34a   : > { %v10215_v3 = vadd.f32 %v8237_v31, %v8236_v29 }
 0x351   : > { %v8418_v1 = vpop.f32.mrf.mxu0 }
 0x352   : > { %v3020_v34 = vadd.f32 %v10178_v23, %v8418_v1 }
 0x353   : > { %v3011_v60 = vpop.f32.mrf.mxu0 }
 0x354   : > { %v3068_v36 = vmax.f32 %v3020_v34, 0.0  ;;  %v3012_v37 = vadd.f32 %v10178_v23, %v3011_v60 }
 0x355   : > { %v8419_v35 = vpop.f32.mrf.mxu0 }
 0x356   : > { %v3548_v40 = vcombine.high %v3068_v36, %v3068_v36  ;;  %v3555_v33 = vrot.slane %v3068_v36, %v9746_v39  ;;  %v3066_v42 = vmax.f32 %v3012_v37, 0.0  ;;  %v3023_v32 = vadd.f32 %v10178_v23, %v8419_v35 }
 0x357   : > { %v3014_v41 = vpop.f32.mrf.mxu0 }
 0x358   : > { %v3562_v61 = vrot.slane %v3548_v40, %v9746_v39  ;;  %v3563_v26 = vcombine.high %v3555_v33, %v3555_v33  ;;  %v7508_v43 = vrot.slane %v3555_v33, 9  ;;  %v3514_v44 = vcombine.high %v3066_v42, %v3066_v42 }
 0x359   : > { %v3521_v38 = vrot.slane %v3066_v42, %v9746_v39  ;;  %v3069_v45 = vmax.f32 %v3023_v32, 0.0  ;;  %v3015_v6 = vadd.f32 %v10178_v23, %v3014_v41 }
 0x35a   : > { %v3564_v46 = vcombine.high %v3562_v61, %v3562_v61  ;;  %v7509_v0 = vrot.slane %v3563_v26, 9  ;;  %v7510_v49 = vrot.slane %v3562_v61, 9  ;;  %v3528_v48 = vrot.slane %v3514_v44, %v9746_v39 }
 0x35b   : > { %v3529_v50 = vcombine.high %v3521_v38, %v3521_v38  ;;  %v7500_v53 = vrot.slane %v3521_v38, 9  ;;  %v3565_v56 = vcombine.high %v3069_v45, %v3069_v45  ;;  %v4266_v58 = vmax.f32 %v3555_v33, %v7508_v43 }
 0x35c   : > { %v7511_v57 = vrot.slane %v3564_v46, 9  ;;  %v3572_v16 = vrot.slane %v3069_v45, %v9746_v39  ;;  %v3530_v59 = vcombine.high %v3528_v48, %v3528_v48  ;;  %v7502_v52 = vrot.slane %v3528_v48, 9 }
 0x35d   : > { %v7501_v62 = vrot.slane %v3529_v50, 9  ;;  %v4258_v47 = vmax.f32 %v3521_v38, %v7500_v53  ;;  %v4267_v2 = vmax.f32 %v3563_v26, %v7509_v0  ;;  %v4268_v4 = vmax.f32 %v3562_v61, %v7510_v49 }
 0x35e   : > { %v3579_v5 = vrot.slane %v3565_v56, %v9746_v39  ;;  %v7503_v9 = vrot.slane %v3530_v59, 9  ;;  %v4260_v10 = vmax.f32 %v3528_v48, %v7502_v52  ;;  %v4269_v11 = vmax.f32 %v3564_v46, %v7511_v57 }
 0x35f   : > { %v4259_v63 = vmax.f32 %v3529_v50, %v7501_v62  ;;  %v4338_v51 = vmax.f32 %v4258_v47, %v4266_v58  ;;  %v3580_v19 = vcombine.high %v3572_v16, %v3572_v16  ;;  %v7512_v55 = vrot.slane %v3572_v16, 9 }
 0x360   : > { %v4261_v15 = vmax.f32 %v3530_v59, %v7503_v9  ;;  %v4340_v14 = vmax.f32 %v4260_v10, %v4268_v4  ;;  %v3581_v20 = vcombine.high %v3579_v5, %v3579_v5  ;;  %v3067_v21 = vmax.f32 %v3015_v6, 0.0 }
 0x361   : > { %v4339_v18 = vmax.f32 %v4259_v63, %v4267_v2  ;;  %v4613_v54 = vrot.slane %v4338_v51, %v9767_v12  ;;  %v7513_v30 = vrot.slane %v3580_v19, 9  ;;  %v7514_v31 = vrot.slane %v3579_v5, 9  ;;  %v8600_v51 = vld [vmem:[#allocation5 + $0xc] ss:$36 sps:$4 sm:$0xff]  }
 0x362   : > { %v4341_v7 = vmax.f32 %v4261_v15, %v4269_v11  ;;  %v4621_v27 = vrot.slane %v4340_v14, %v9767_v12  ;;  %v3531_v28 = vcombine.high %v3067_v21, %v3067_v21  ;;  %v3538_v17 = vrot.slane %v3067_v21, %v9746_v39  ;;  %v8610_v11 = vld [vmem:[#allocation6 + $0x1b8] sm:$0xff]   ;;  %v8598_v15 = vld [vmem:[#allocation5 + $0x8] ss:$36 sps:$4 sm:$0xff]  }
 0x363   : > { %v4617_v25 = vrot.slane %v4339_v18, %v9767_v12  ;;  %v7515_v35 = vrot.slane %v3581_v20, 9  ;;  %v4270_v40 = vmax.f32 %v3572_v16, %v7512_v55  ;;  %v4271_v26 = vmax.f32 %v3580_v19, %v7513_v30  ;;  %v8612_v18 = vld [vmem:[#allocation6 + $0x1f0] sm:$0xff]   ;;  %v8615_v55 = vld [vmem:[#allocation6 + $0x1e8] sm:$0xff]  }
 0x364   : > { %v3545_v1 = vrot.slane %v3531_v28, %v9746_v39  ;;  %v3546_v34 = vcombine.high %v3538_v17, %v3538_v17  ;;  %v7504_v60 = vrot.slane %v3538_v17, 9  ;;  %v4625_v36 = vrot.slane %v4341_v7, %v9767_v12  ;;  %v8603_v14 = vld [vmem:[#allocation5 + $0x54] ss:$36 sps:$4 sm:$0xff]  }
 0x365   : > { %v4723_v29 = vsel %vm4674_vm12, %v4617_v25, %v4613_v54  ;;  %v4272_v43 = vmax.f32 %v3579_v5, %v7514_v31  ;;  %v4273_v0 = vmax.f32 %v3581_v20, %v7515_v35  ;;  %v8613_v19 = vld [vmem:[#allocation6 + $0x1b0] sm:$0xff]  }
 0x366   : > { %v4724_v37 = vsel %vm4676_vm13, %v4621_v27, %v4723_v29  ;;  %v3547_v33 = vcombine.high %v3545_v1, %v3545_v1  ;;  %v7505_v42 = vrot.slane %v3546_v34, 9  ;;  %v7506_v32 = vrot.slane %v3545_v1, 9  ;;  %v8616_v27 = vld [vmem:[#allocation6 + $0x1a8] sm:$0xff]   ;;  %v8605_v28 = vld [vmem:[#allocation5 + $0x50] ss:$36 sps:$4 sm:$0xff]   ;;  %v8618_v29 = vld [vmem:[#allocation6 + $0x1e0] sm:$0xff]  }
 0x367   : > { %v4262_v61 = vmax.f32 %v3538_v17, %v7504_v60  ;;  %v4725_v49 = vsel %vm10499_vm6, %v4625_v36, %v4724_v37 }
 0x368   : > { %v7507_v44 = vrot.slane %v3547_v33, 9  ;;  %v4263_v38 = vmax.f32 %v3546_v34, %v7505_v42  ;;  %v4264_v45 = vmax.f32 %v3545_v1, %v7506_v32  ;;  %v8606_v1 = vld [vmem:[#allocation5 + $0x9c] ss:$36 sps:$4 sm:$0xff]  }
 0x369   : > { %v4342_v46 = vmax.f32 %v4262_v61, %v4270_v40  ;;  %v8621_v61 = vld [vmem:[#allocation6 + $0x1d8] sm:$0xff]  }
 0x36a   : > { %v4265_v48 = vmax.f32 %v3547_v33, %v7507_v44  ;;  %v4343_v50 = vmax.f32 %v4263_v38, %v4271_v26  ;;  %v4344_v53 = vmax.f32 %v4264_v45, %v4272_v43  ;;  %v8619_v33 = vld [vmem:[#allocation6 + $0x1a0] sm:$0xff]  }
 0x36b   : > { %v4629_v56 = vrot.slane %v4342_v46, %v9767_v12 }
 0x36c   : > { %v4345_v41 = vmax.f32 %v4265_v48, %v4273_v0  ;;  %v4633_v57 = vrot.slane %v4343_v50, %v9767_v12  ;;  %v4637_v58 = vrot.slane %v4344_v53, %v9767_v12 }
 0x36d   : > { %v4726_v16 = vsel %vm4680_vm15, %v4629_v56, %v4725_v49  ;;  %v8622_v56 = vld [vmem:[#allocation6 + $0x198] sm:$0xff]  }
 0x36e   : > { %v4641_v59 = vrot.slane %v4345_v41, %v9767_v12  ;;  %v4727_v62 = vsel %vm4682_vm0, %v4633_v57, %v4726_v16 }
 0x36f   : > { %v4728_v52 = vsel %vm4684_vm2, %v4637_v58, %v4727_v62  ;;  %v8624_v62 = vld [vmem:[#allocation6 + $0x1d0] sm:$0xff]  }
 0x370   : > { %v4729_v47 = vsel %vm4686_vm14, %v4641_v59, %v4728_v52  ;;  %v8608_v59 = vld [vmem:[#allocation5 + $0x98] ss:$36 sps:$4 sm:$0xff]  }
 0x371   : > { %4752 = vst [vmem:[#allocation4 + $0xb0] sm:$0xff] %v4729_v47  ;;  %v8058_v2 = vpack.c.bf16 %v4729_v47, %v4729_v47 }
 0x373   : > { %4849 = vst [vmem:[#allocation5 + $0x100] sm:$0xf] %v8058_v2  ;;  %4992 = vst [vmem:[#allocation5 + $0xe8] sm:$0xf] %v8058_v2 }
 0x374   : > { %5136 = vst [vmem:[#allocation5 + $0xd0] sm:$0xf] %v8058_v2 }
 0x378   : > { %v4761_v4 = vld [vmem:[#allocation4 + $0xaf] sm:$0xff] }
 0x379   : > { %v4857_v5 = vld [vmem:[#allocation4 + $0xb1] sm:$0xff]  ;;  %v8050_v6 = vpack.c.bf16 %v4761_v4, %v4761_v4 }
 0x37a   : > { %v8066_v9 = vpack.c.bf16 %v4857_v5, %v4857_v5  ;;  %v8593_v63 = vld [vmem:[#allocation5 + $0xdc] ss:$36 sps:$4 sm:$0xff]  }
 0x37b   : > { %4801 = vst [vmem:[#allocation5 + $0xfc] sm:$0xf] %v8050_v6  ;;  %4944 = vst [vmem:[#allocation5 + $0xe4] sm:$0xf] %v8050_v6  ;;  %6050 = vmatprep.mubr.bf16.mxu1 %v8593_v63 }
 0x37c   : > { %4897 = vst [vmem:[#allocation5 + $0x104] sm:$0xf] %v8066_v9  ;;  %5040 = vst [vmem:[#allocation5 + $0xec] sm:$0xf] %v8066_v9 }
 0x37d   : > { %5184 = vst [vmem:[#allocation5 + $0xd4] sm:$0xf] %v8066_v9  ;;  %5088 = vst [vmem:[#allocation5 + $0xcc] sm:$0xf] %v8050_v6 }
 0x382   : > { %v8595_v10 = vld [vmem:[#allocation5 + $0xd8] ss:$36 sps:$4 sm:$0xff]  }
 0x383   : > { %6051 = vmatmul.mubr.bf16.gmra.mxu1 %v8595_v10 }
 0x384   : > { %6091 = vmatprep.mubr.bf16.mxu1 %v8600_v51  ;;  %v8625_v51 = vld [vmem:[#allocation6 + $0x190] sm:$0xff]  }
 0x38b   : > { %6092 = vmatmul.mubr.bf16.vlgmr.msra.gmra.mxu1 %v8598_v15 }
 0x38c   : > { %6099 = vmatprep.mubr.bf16.mxu1 %v8603_v14  ;;  %8335 = vmatpush3.bf16.msra.mxu1 %v8610_v11 }
 0x38d   : > { %8336 = vmatprep.subr.bf16.mxu1 %v8612_v18 }
 0x390   : > { %8337 = vmatpush3.bf16.msra.mxu1 %v8613_v19  ;;  %v8631_v19 = vld [vmem:[#allocation6 + $0x1c8] sm:$0xff]  }
 0x391   : > { %v8422_v20 = vpop.f32.mrf.mxu0  ;;  %8338 = vmatprep.subr.bf16.mxu1 %v8615_v55 }
 0x392   : > { %v3036_v21 = vadd.f32 %v10178_v23, %v8422_v20 }
 0x393   : > { %v3027_v7 = vpop.f32.mrf.mxu0  ;;  %6100 = vmatmul.mubr.bf16.gmra.mxu1 %v8605_v28 }
 0x394   : > { %v3072_v54 = vmax.f32 %v3036_v21, 0.0  ;;  %v3028_v25 = vadd.f32 %v10178_v23, %v3027_v7  ;;  %6107 = vmatprep.mubr.bf16.mxu1 %v8606_v1  ;;  %8339 = vmatpush3.bf16.msra.mxu1 %v8616_v27  ;;  %v8639_v1 = vld [vmem:[#allocation6 + $0x1c0] sm:$0xff]  }
 0x395   : > { %v8423_v17 = vpop.f32.mrf.mxu0  ;;  %8340 = vmatprep.subr.bf16.mxu1 %v8618_v29 }
 0x396   : > { %v3616_v30 = vcombine.high %v3072_v54, %v3072_v54  ;;  %v3623_v31 = vrot.slane %v3072_v54, %v9746_v39  ;;  %v3070_v34 = vmax.f32 %v3028_v25, 0.0  ;;  %v3039_v60 = vadd.f32 %v10178_v23, %v8423_v17  ;;  %v8633_v17 = vld [vmem:[#allocation6 + $0x188] sm:$0xff]  }
 0x397   : > { %v3030_v49 = vpop.f32.mrf.mxu0 }
 0x398   : > { %v3630_v36 = vrot.slane %v3616_v30, %v9746_v39  ;;  %v3631_v37 = vcombine.high %v3623_v31, %v3623_v31  ;;  %v7524_v35 = vrot.slane %v3623_v31, 9  ;;  %v3582_v40 = vcombine.high %v3070_v34, %v3070_v34  ;;  %8341 = vmatpush3.bf16.msra.mxu1 %v8619_v33 }
 0x399   : > { %v3589_v42 = vrot.slane %v3070_v34, %v9746_v39  ;;  %v3073_v32 = vmax.f32 %v3039_v60, 0.0  ;;  %8342 = vmatprep.subr.bf16.mxu1 %v8621_v61  ;;  %v3031_v4 = vadd.f32 %v10178_v23, %v3030_v49 }
 0x39a   : > { %v3632_v26 = vcombine.high %v3630_v36, %v3630_v36  ;;  %v7525_v43 = vrot.slane %v3631_v37, 9  ;;  %v7526_v44 = vrot.slane %v3630_v36, 9  ;;  %v3596_v38 = vrot.slane %v3582_v40, %v9746_v39 }
 0x39b   : > { %v3597_v45 = vcombine.high %v3589_v42, %v3589_v42  ;;  %v7516_v46 = vrot.slane %v3589_v42, 9  ;;  %v3633_v0 = vcombine.high %v3073_v32, %v3073_v32  ;;  %v4282_v50 = vmax.f32 %v3623_v31, %v7524_v35  ;;  %6108 = vmatmul.mubr.bf16.gmra.mxu1 %v8608_v59 }
 0x39c   : > { %v7527_v48 = vrot.slane %v3632_v26, 9  ;;  %v3640_v53 = vrot.slane %v3073_v32, %v9746_v39  ;;  %v3598_v41 = vcombine.high %v3596_v38, %v3596_v38  ;;  %v7518_v58 = vrot.slane %v3596_v38, 9  ;;  %8343 = vmatpush3.bf16.msra.mxu1 %v8622_v56 }
 0x39d   : > { %v7517_v57 = vrot.slane %v3597_v45, 9  ;;  %v4274_v16 = vmax.f32 %v3589_v42, %v7516_v46  ;;  %v4283_v52 = vmax.f32 %v3631_v37, %v7525_v43  ;;  %v4284_v47 = vmax.f32 %v3630_v36, %v7526_v44  ;;  %8344 = vmatprep.subr.bf16.mxu1 %v8624_v62  ;;  %v8640_v43 = vld [vmem:[#allocation6 + $0x180] sm:$0xff]  }
 0x39e   : > { %v3647_v2 = vrot.slane %v3633_v0, %v9746_v39  ;;  %v7519_v5 = vrot.slane %v3598_v41, 9  ;;  %v4276_v9 = vmax.f32 %v3596_v38, %v7518_v58  ;;  %v4285_v10 = vmax.f32 %v3632_v26, %v7527_v48 }
 0x39f   : > { %v4275_v6 = vmax.f32 %v3597_v45, %v7517_v57  ;;  %v4346_v63 = vmax.f32 %v4274_v16, %v4282_v50  ;;  %v3648_v14 = vcombine.high %v3640_v53, %v3640_v53  ;;  %v7528_v55 = vrot.slane %v3640_v53, 9 }
 0x3a0   : > { %v4277_v11 = vmax.f32 %v3598_v41, %v7519_v5  ;;  %v4348_v18 = vmax.f32 %v4276_v9, %v4284_v47  ;;  %v3649_v20 = vcombine.high %v3647_v2, %v3647_v2  ;;  %v3071_v21 = vmax.f32 %v3031_v4, 0.0  ;;  %8345 = vmatpush3.bf16.msra.mxu1 %v8625_v51  ;;  %v5218_v51 = vld [vmem:[#allocation5 + $0xe0] sm:$0xff] }
 0x3a1   : > { %v4347_v15 = vmax.f32 %v4275_v6, %v4283_v52  ;;  %v4645_v23 = vrot.slane %v4346_v63, %v9767_v12  ;;  %v7529_v30 = vrot.slane %v3648_v14, 9  ;;  %v7530_v31 = vrot.slane %v3647_v2, 9  ;;  %8346 = vmatprep.subr.bf16.mxu1 %v8631_v19 }
 0x3a2   : > { %v4349_v7 = vmax.f32 %v4277_v11, %v4285_v10  ;;  %v4653_v25 = vrot.slane %v4348_v18, %v9767_v12  ;;  %v3599_v27 = vcombine.high %v3071_v21, %v3071_v21  ;;  %v3606_v28 = vrot.slane %v3071_v21, %v9746_v39 }
 0x3a3   : > { %v4649_v54 = vrot.slane %v4347_v15, %v9767_v12  ;;  %v7531_v40 = vrot.slane %v3649_v20, 9  ;;  %v4286_v33 = vmax.f32 %v3640_v53, %v7528_v55  ;;  %v4287_v44 = vmax.f32 %v3648_v14, %v7529_v30  ;;  %v10271_v15 = vpop.f32.mrf.mxu1  ;;  %v8638_v55 = vld [vmem:[#allocation5 + $0x20] ss:$36 sps:$4 sm:$0xff]  }
 0x3a4   : > { %v3613_v34 = vrot.slane %v3599_v27, %v9746_v39  ;;  %v3614_v60 = vcombine.high %v3606_v28, %v3606_v28  ;;  %v7520_v36 = vrot.slane %v3606_v28, 9  ;;  %v4657_v37 = vrot.slane %v4349_v7, %v9767_v12  ;;  %8347 = vmatpush3.bf16.msra.mxu1 %v8633_v17  ;;  %v8642_v27 = vld [vmem:[#allocation5 + $0x68] ss:$36 sps:$4 sm:$0xff]   ;;  %v8645_v17 = vld [vmem:[#allocation5 + $0xb0] ss:$36 sps:$4 sm:$0xff]  }
 0x3a5   : > { %v4730_v29 = vsel %vm4674_vm12, %v4649_v54, %v4645_v23  ;;  %v4288_v38 = vmax.f32 %v3647_v2, %v7530_v31  ;;  %8348 = vmatprep.subr.bf16.mxu1 %v8639_v1  ;;  %v4289_v48 = vmax.f32 %v3649_v20, %v7531_v40  ;;  %v8637_v20 = vld [vmem:[#allocation5 + $0x1c] ss:$36 sps:$4 sm:$0xff]   ;;  %v10273_v21 = vpop.f32.mrf.mxu1  ;;  %v8648_v31 = vld [vmem:[#allocation5 + $0xac] ss:$36 sps:$4 sm:$0xff]  }
 0x3a6   : > { %v4731_v35 = vsel %vm4676_vm13, %v4653_v25, %v4730_v29  ;;  %v3615_v42 = vcombine.high %v3613_v34, %v3613_v34  ;;  %v7521_v32 = vrot.slane %v3614_v60, 9  ;;  %v7522_v61 = vrot.slane %v3613_v34, 9  ;;  %v8635_v23 = vld [vmem:[#allocation5 + $0x18] ss:$36 sps:$4 sm:$0xff]   ;;  %v8646_v29 = vld [vmem:[#allocation5 + $0x60] ss:$36 sps:$4 sm:$0xff]  }
 0x3a7   : > { %v4278_v26 = vmax.f32 %v3606_v28, %v7520_v36  ;;  %v4732_v50 = vsel %vm10500_vm7, %v4657_v37, %v4731_v35  ;;  %v8643_v28 = vld [vmem:[#allocation5 + $0x64] ss:$36 sps:$4 sm:$0xff]  }
 0x3a8   : > { %v7523_v45 = vrot.slane %v3615_v42, 9  ;;  %v4279_v46 = vmax.f32 %v3614_v60, %v7521_v32  ;;  %v4280_v0 = vmax.f32 %v3613_v34, %v7522_v61  ;;  %8349 = vmatpush3.bf16.msra.mxu1 %v8640_v43  ;;  %v8650_v1 = vld [vmem:[#allocation5 + $0xa8] ss:$36 sps:$4 sm:$0xff]   ;;  %v8310_v43 = vpop.f32.mrf.mxu0 }
 0x3a9   : > { %v4350_v49 = vmax.f32 %v4278_v26, %v4286_v33 }
 0x3aa   : > { %v4281_v56 = vmax.f32 %v3615_v42, %v7523_v45  ;;  %v4351_v41 = vmax.f32 %v4279_v46, %v4287_v44  ;;  %v4352_v57 = vmax.f32 %v4280_v0, %v4288_v38  ;;  %v8311_v38 = vpop.f32.mrf.mxu0 }
 0x3ab   : > { %v4661_v53 = vrot.slane %v4350_v49, %v9767_v12 }
 0x3ac   : > { %v4353_v58 = vmax.f32 %v4281_v56, %v4289_v48  ;;  %v4665_v16 = vrot.slane %v4351_v41, %v9767_v12  ;;  %v4669_v59 = vrot.slane %v4352_v57, %v9767_v12  ;;  %v8313_v46 = vpop.f32.mrf.mxu0 }
 0x3ad   : > { %v4733_v62 = vsel %vm4680_vm15, %v4661_v53, %v4732_v50 }
 0x3ae   : > { %v4673_v52 = vrot.slane %v4353_v58, %v9767_v12  ;;  %v4734_v47 = vsel %vm4682_vm0, %v4665_v16, %v4733_v62  ;;  %v8314_v49 = vpop.f32.mrf.mxu0 }
 0x3af   : > { %v4735_v2 = vsel %vm4684_vm2, %v4669_v59, %v4734_v47 }
 0x3b0   : > { %v4736_v4 = vsel %vm4686_vm14, %v4673_v52, %v4735_v2  ;;  %v8316_v50 = vpop.f32.mrf.mxu0 }
 0x3b1   : > { %4753 = vst [vmem:[#allocation4 + $0xc8] sm:$0xff] %v4736_v4  ;;  %v8082_v5 = vpack.c.bf16 %v4736_v4, %v4736_v4 }
 0x3b2   : > { %v8317_v41 = vpop.f32.mrf.mxu0 }
 0x3b3   : > { %4993 = vst [vmem:[#allocation5 + $0x10c] sm:$0xf] %v8082_v5  ;;  %5137 = vst [vmem:[#allocation5 + $0xf4] sm:$0xf] %v8082_v5 }
 0x3b4   : > { %v8319_v53 = vpop.f32.mrf.mxu0 }
 0x3b6   : > { %v8320_v16 = vpop.f32.mrf.mxu0 }
 0x3b8   : > { %v4905_v6 = vld [vmem:[#allocation4 + $0xc7] sm:$0xff] }
 0x3b9   : > { %v5001_v9 = vld [vmem:[#allocation4 + $0xc9] sm:$0xff]  ;;  %v8074_v63 = vpack.c.bf16 %v4905_v6, %v4905_v6 }
 0x3ba   : > { %v8090_v10 = vpack.c.bf16 %v5001_v9, %v5001_v9  ;;  %v8632_v19 = vld [vmem:[#allocation5 + $0xe8] ss:$36 sps:$4 sm:$0xff]   ;;  %v8651_v34 = vld [vmem:[#allocation5 + $0xf4] ss:$36 sps:$4 sm:$0xff]  }
 0x3bb   : > { %4945 = vst [vmem:[#allocation5 + $0x108] sm:$0xf] %v8074_v63  ;;  %5089 = vst [vmem:[#allocation5 + $0xf0] sm:$0xf] %v8074_v63  ;;  %v8232_v63 = vadd.f32 %v10209_v22, %v10207_v8 }
 0x3bc   : > { %5041 = vst [vmem:[#allocation5 + $0x110] sm:$0xf] %v8090_v10  ;;  %5185 = vst [vmem:[#allocation5 + $0xf8] sm:$0xf] %v8090_v10 }
 0x3c2   : > { %v5223_v12 = vld [vmem:[#allocation5 + $0x104] sm:$0xff]  ;;  %v8653_v60 = vld [vmem:[#allocation5 + $0xf0] ss:$36 sps:$4 sm:$0xff]  }
 0x3c3   : > { %v8627_v11 = vld [vmem:[#allocation5 + $0xe4] ss:$36 sps:$4 sm:$0xff]   ;;  %v8629_v18 = vld [vmem:[#allocation5 + $0xec] ss:$36 sps:$4 sm:$0xff]   ;;  %v7634_v14 = vcombine.low %v5218_v51, %v5223_v12  ;;  %v8647_v30 = vld [vmem:[#allocation5 + $0xf8] ss:$36 sps:$4 sm:$0xff]  }
 0x3c4   : > { %6115 = vmatprep.mubr.bf16.mxu1 %v8627_v11  ;;  %6180 = vmatprep.mubr.bf16.mxu0 %v8629_v18  ;;  %v7604_v51 = vld [vmem:[%s10489_s4] ss:$0 sm:$0xff] }
 0x3c5   : > { %6116 = vmatmul.mubr.bf16.gmra.mxu1 %v7634_v14  ;;  %6181 = vmatmul.mubr.bf16.gmra.mxu0 %v8632_v19  ;;  %v6029_v19 = vadd.f32 %v8232_v63, %v7604_v51 }
 0x3c6   : > { %6221 = vmatprep.mubr.bf16.mxu1 %v8637_v20  ;;  %8440 = vmatprep.mubr.bf16.mxu0 %v8638_v55  ;;  %v8235_v20 = vadd.f32 %v10213_v13, %v10211_v24  ;;  %v8241_v24 = vadd.f32 %v10273_v21, %v10271_v15 }
 0x3c7   : > { %v8242_v7 = vpop.f32.mrf.mxu1 }
 0x3c8   : > { %v6040_v63 = vadd.f32 %v8241_v24, %v7604_v51 }
 0x3c9   : > { %v8243_v54 = vpop.f32.mrf.mxu1 }
 0x3ca   : > { %v10275_v25 = vadd.f32 %v8243_v54, %v8242_v7 }
 0x3cb   : > { %v10277_v36 = vpop.f32.mrf.mxu1 }
 0x3cd   : > { %6222 = vmatmul.mubr.bf16.vlgmr.msra.gmra.mxu1 %v8635_v23  ;;  %8441 = vmatmul.mubr.bf16.vlgmr.msra.gmra.mxu0 %v8642_v27  ;;  %v10279_v37 = vpop.f32.mrf.mxu1  ;;  %v6032_v27 = vadd.f32 %v8235_v20, %v7604_v51 }
 0x3ce   : > { %6229 = vmatprep.mubr.bf16.mxu1 %v8643_v28  ;;  %8444 = vmatprep.mubr.bf16.mxu0 %v8645_v17  ;;  %v8312_v28 = vadd.f32 %v8311_v38, %v8310_v43  ;;  %v8247_v15 = vadd.f32 %v10279_v37, %v10277_v36 }
 0x3d5   : > { %6230 = vmatmul.mubr.bf16.gmra.mxu1 %v8646_v29  ;;  %8445 = vmatmul.mubr.bf16.gmra.mxu0 %v8647_v30 }
 0x3d6   : > { %6237 = vmatprep.mubr.bf16.mxu1 %v8648_v31 }
 0x3dd   : > { %6238 = vmatmul.mubr.bf16.gmra.mxu1 %v8650_v1 }
 0x3de   : > { %6245 = vmatprep.mubr.bf16.mxu1 %v8651_v34 }
 0x3e5   : > { %6246 = vmatmul.mubr.bf16.gmra.mxu1 %v8653_v60 }
 0x408   : > { %v10285_v62 = vpop.f32.mrf.mxu0 }
 0x40a   : > { %v8323_v47 = vpop.f32.mrf.mxu0 }
 0x40c   : > { %v10287_v4 = vpop.f32.mrf.mxu0 }
 0x40e   : > { %v10289_v6 = vpop.f32.mrf.mxu0 }
 0x443   : > { %v8248_v35 = vpop.f32.mrf.mxu1 }
 0x445   : > { %v8249_v40 = vpop.f32.mrf.mxu1 }
 0x446   : > { %v10281_v33 = vadd.f32 %v8249_v40, %v8248_v35  ;;  %v8315_v35 = vadd.f32 %v8314_v49, %v8313_v46  ;;  %v8318_v46 = vadd.f32 %v8317_v41, %v8316_v50 }
 0x447   : > { %v8251_v42 = vpop.f32.mrf.mxu1 }
 0x448   : > { %v10325_v36 = vadd.f32 %v10281_v33, %v7604_v51 }
 0x449   : > { %v8252_v32 = vpop.f32.mrf.mxu1 }
 0x44a   : > { %v10283_v61 = vadd.f32 %v8252_v32, %v8251_v42  ;;  %v6037_v42 = vadd.f32 %v10215_v3, %v7604_v51  ;;  %v8321_v3 = vadd.f32 %v8320_v16, %v8319_v53 }
 0x44b   : > { %v8270_v26 = vpop.f32.mrf.mxu1 }
 0x44d   : > { %v8271_v44 = vpop.f32.mrf.mxu1 }
 0x44e   : > { %v8272_v11 = vadd.f32 %v8271_v44, %v8270_v26 }
 0x44f   : > { %v8273_v45 = vpop.f32.mrf.mxu1 }
 0x450   : > { %v6094_v22 = vadd.f32 %v8272_v11, %v6029_v19  ;;  %v6045_v11 = vadd.f32 %v10275_v25, %v7604_v51  ;;  %v6048_v25 = vadd.f32 %v8247_v15, %v7604_v51 }
 0x451   : > { %v8274_v0 = vpop.f32.mrf.mxu1 }
 0x452   : > { %v8275_v7 = vadd.f32 %v8274_v0, %v8273_v45  ;;  %v6159_v1 = vadd.f32 %v8312_v28, %v6094_v22 }
 0x453   : > { %v8276_v48 = vpop.f32.mrf.mxu1 }
 0x454   : > { %v6097_v30 = vadd.f32 %v8275_v7, %v6032_v27  ;;  %v8324_v27 = vadd.f32 %v8323_v47, %v10285_v62 }
 0x455   : > { %v8277_v56 = vpop.f32.mrf.mxu1 }
 0x456   : > { %v8278_v13 = vadd.f32 %v8277_v56, %v8276_v48  ;;  %v6162_v0 = vadd.f32 %v8315_v35, %v6097_v30 }
 0x457   : > { %v8279_v57 = vpop.f32.mrf.mxu1 }
 0x458   : > { %v6102_v21 = vadd.f32 %v8278_v13, %v6037_v42 }
 0x459   : > { %v8280_v58 = vpop.f32.mrf.mxu1 }
 0x45a   : > { %v8281_v32 = vadd.f32 %v8280_v58, %v8279_v57  ;;  %v6167_v37 = vadd.f32 %v8318_v46, %v6102_v21 }
 0x45b   : > { %v8282_v59 = vpop.f32.mrf.mxu1 }
 0x45c   : > { %v6105_v57 = vadd.f32 %v8281_v32, %v6040_v63 }
 0x45d   : > { %v8283_v52 = vpop.f32.mrf.mxu1 }
 0x45e   : > { %v8284_v26 = vadd.f32 %v8283_v52, %v8282_v59 }
 0x45f   : > { %v8285_v2 = vpop.f32.mrf.mxu1 }
 0x460   : > { %v6110_v58 = vadd.f32 %v8284_v26, %v6045_v11 }
 0x461   : > { %v8286_v5 = vpop.f32.mrf.mxu1 }
 0x462   : > { %v8287_v59 = vadd.f32 %v8286_v5, %v8285_v2  ;;  %v10329_v5 = vadd.f32 %v10283_v61, %v7604_v51 }
 0x485   : > { %v10291_v9 = vpop.f32.mrf.mxu1  ;;  %v10295_v10 = vpop.f32.mrf.mxu0 }
 0x487   : > { %v10300_v12 = vpop.f32.mrf.mxu1  ;;  %v10302_v18 = vpop.f32.mrf.mxu0 }
 0x489   : > { %v10304_v14 = vpop.f32.mrf.mxu1  ;;  %v10308_v55 = vpop.f32.mrf.mxu0 }
 0x48b   : > { %v10310_v8 = vpop.f32.mrf.mxu1  ;;  %v10312_v23 = vpop.f32.mrf.mxu0 }
 0x48c   : > { %v10340_v61 = vadd.f32 %v10310_v8, %v10304_v14 }
 0x48d   : > { %v8350_v54 = vpop.f32.mrf.mxu1  ;;  %v8442_v17 = vpop.f32.mrf.mxu0 }
 0x48f   : > { %v8351_v29 = vpop.f32.mrf.mxu1  ;;  %v6288_v34 = vpop.f32.mrf.mxu0 }
 0x490   : > { %v8352_v31 = vadd.f32 %v8351_v29, %v8350_v54  ;;  %v6170_v29 = vadd.f32 %v8321_v3, %v6105_v57 }
 0x491   : > { %v8353_v60 = vpop.f32.mrf.mxu1  ;;  %v10317_v44 = vpop.f32.mrf.mxu0 }
 0x492   : > { %v6224_v40 = vadd.f32 %v8352_v31, %v6159_v1  ;;  %v6175_v31 = vadd.f32 %v8324_v27, %v6110_v58  ;;  %v10331_v1 = vadd.f32 %v8287_v59, %v6048_v25 }
 0x493   : > { %v8354_v43 = vpop.f32.mrf.mxu1  ;;  %v6291_v52 = vpop.f32.mrf.mxu0 }
 0x494   : > { %v6289_v38 = vadd.f32 %v6288_v34, %v6224_v40  ;;  %v8355_v45 = vadd.f32 %v8354_v43, %v8353_v60  ;;  %v10336_v40 = vadd.f32 %v10300_v12, %v10291_v9 }
 0x495   : > { %v8356_v48 = vpop.f32.mrf.mxu1  ;;  %v10348_v27 = vpop.f32.mrf.mxu0 }
 0x496   : > { %v6319_v49 = vmax.f32 %v6289_v38, 0.0  ;;  %v6227_v56 = vadd.f32 %v8355_v45, %v6162_v0 }
 0x497   : > { %v8357_v19 = vpop.f32.mrf.mxu1 }
 0x498   : > { %v6335_v20 = vcombine.high %v6319_v49, %v6319_v49  ;;  %v6342_v22 = vrot.slane %v6319_v49, %v9746_v39  ;;  %v6292_v7 = vadd.f32 %v6291_v52, %v6227_v56  ;;  %v8358_v54 = vadd.f32 %v8357_v19, %v8356_v48 }
 0x499   : > { %v8359_v50 = vpop.f32.mrf.mxu1 }
 0x49a   : > { %v6349_v41 = vrot.slane %v6335_v20, %v9746_v39  ;;  %v6350_v53 = vcombine.high %v6342_v22, %v6342_v22  ;;  %v7713_v16 = vrot.slane %v6342_v22, 9  ;;  %v6320_v2 = vmax.f32 %v6292_v7, 0.0 }
 0x49b   : > { %v6232_v28 = vadd.f32 %v8358_v54, %v6167_v37  ;;  %v8360_v30 = vpop.f32.mrf.mxu1 }
 0x49c   : > { %v6351_v62 = vcombine.high %v6349_v41, %v6349_v41  ;;  %v7714_v47 = vrot.slane %v6350_v53, 9  ;;  %v7715_v33 = vrot.slane %v6349_v41, 9  ;;  %v6352_v34 = vcombine.high %v6320_v2, %v6320_v2 }
 0x49d   : > { %v6359_v24 = vrot.slane %v6320_v2, %v9746_v39  ;;  %v6297_v13 = vadd.f32 %v8442_v17, %v6232_v28  ;;  %v8361_v60 = vadd.f32 %v8360_v30, %v8359_v50  ;;  %v8362_v35 = vpop.f32.mrf.mxu1  ;;  %v6599_v42 = vmax.f32 %v6342_v22, %v7713_v16 }
 0x49e   : > { %v7716_v51 = vrot.slane %v6351_v62, 9  ;;  %v6366_v32 = vrot.slane %v6352_v34, %v9746_v39  ;;  %v6600_v0 = vmax.f32 %v6350_v53, %v7714_v47  ;;  %v6601_v17 = vmax.f32 %v6349_v41, %v7715_v33 }
 0x49f   : > { %v6367_v26 = vcombine.high %v6359_v24, %v6359_v24  ;;  %v7717_v43 = vrot.slane %v6359_v24, 9  ;;  %v6321_v38 = vmax.f32 %v6297_v13, 0.0  ;;  %v8363_v45 = vpop.f32.mrf.mxu1  ;;  %v6235_v11 = vadd.f32 %v8361_v60, %v6170_v29 }
 0x4a0   : > { %v6602_v63 = vmax.f32 %v6351_v62, %v7716_v51  ;;  %v6368_v15 = vcombine.high %v6366_v32, %v6366_v32  ;;  %v7719_v9 = vrot.slane %v6366_v32, 9  ;;  %v8364_v46 = vadd.f32 %v8363_v45, %v8362_v35  ;;  %v6304_v35 = vpop.f32.mrf.mxu0 }
 0x4a1   : > { %v7718_v21 = vrot.slane %v6367_v26, 9  ;;  %v6603_v12 = vmax.f32 %v6359_v24, %v7717_v43  ;;  %v6369_v48 = vcombine.high %v6321_v38, %v6321_v38  ;;  %v6376_v14 = vrot.slane %v6321_v38, %v9746_v39  ;;  %v10345_v49 = vpop.f32.mrf.mxu1 }
 0x4a2   : > { %v6300_v8 = vadd.f32 %v10317_v44, %v6235_v11  ;;  %v7720_v56 = vrot.slane %v6368_v15, 9  ;;  %v6605_v57 = vmax.f32 %v6366_v32, %v7719_v9  ;;  %v6240_v41 = vadd.f32 %v8364_v46, %v6175_v31 }
 0x4a3   : > { %v6604_v3 = vmax.f32 %v6367_v26, %v7718_v21  ;;  %v6631_v58 = vmax.f32 %v6599_v42, %v6603_v12  ;;  %v6383_v59 = vrot.slane %v6369_v48, %v9746_v39  ;;  %v6384_v52 = vcombine.high %v6376_v14, %v6376_v14  ;;  %v10350_v53 = vpop.f32.mrf.mxu1 }
 0x4a4   : > { %v7721_v19 = vrot.slane %v6376_v14, 9  ;;  %v6322_v20 = vmax.f32 %v6300_v8, 0.0  ;;  %v6606_v22 = vmax.f32 %v6368_v15, %v7720_v56  ;;  %v6633_v54 = vmax.f32 %v6601_v17, %v6605_v57 }
 0x4a5   : > { %v6632_v7 = vmax.f32 %v6600_v0, %v6604_v3  ;;  %v6647_v25 = vpack.c.bf16 %v6631_v58, %v6631_v58  ;;  %v6385_v37 = vcombine.high %v6383_v59, %v6383_v59  ;;  %v7722_v44 = vrot.slane %v6384_v52, 9  ;;  %v10358_v26 = vpop.f32.mrf.mxu1 }
 0x4a6   : > { %v7723_v50 = vrot.slane %v6383_v59, 9  ;;  %v6634_v16 = vmax.f32 %v6602_v63, %v6606_v22  ;;  %v6649_v28 = vpack.c.bf16 %v6633_v54, %v6633_v54  ;;  %v6607_v62 = vmax.f32 %v6376_v14, %v7721_v19 }
 0x4a7   : > { %v6648_v2 = vpack.c.bf16 %v6632_v7, %v6632_v7  ;;  %v6685_v29 = vrot.slane %v6647_v25, %v9746_v39  ;;  %v7724_v30 = vrot.slane %v6385_v37, 9  ;;  %v6608_v47 = vmax.f32 %v6384_v52, %v7722_v44  ;;  %v8369_v3 = vpop.f32.mrf.mxu1 }
 0x4a8   : > { %v6386_v33 = vcombine.high %v6322_v20, %v6322_v20  ;;  %v6650_v34 = vpack.c.bf16 %v6634_v16, %v6634_v16  ;;  %v6699_v13 = vrot.slane %v6649_v28, %v9746_v39  ;;  %v6609_v60 = vmax.f32 %v6383_v59, %v7723_v50 }
 0x4a9   : > { %v6692_v24 = vrot.slane %v6648_v2, %v9746_v39  ;;  %v6797_v31 = vrot.slane %v6685_v29, %v9746_v39  ;;  %v6393_v51 = vrot.slane %v6322_v20, %v9746_v39  ;;  %v6305_v32 = vadd.f32 %v6304_v35, %v6240_v41  ;;  %v8371_v28 = vpop.f32.mrf.mxu1 }
 0x4aa   : > { %v6400_v42 = vrot.slane %v6386_v33, %v9746_v39  ;;  %v6706_v43 = vrot.slane %v6650_v34, %v9746_v39  ;;  %v6811_v45 = vrot.slane %v6699_v13, %v9746_v39  ;;  %v6610_v0 = vmax.f32 %v6385_v37, %v7724_v30 }
 0x4ab   : > { %v6804_v38 = vrot.slane %v6692_v24, %v9746_v39  ;;  %v6401_v17 = vcombine.high %v6393_v51, %v6393_v51  ;;  %v7725_v11 = vrot.slane %v6393_v51, 9  ;;  %v6323_v48 = vmax.f32 %v6305_v32, 0.0 }
 0x4ac   : > { %v6402_v63 = vcombine.high %v6400_v42, %v6400_v42  ;;  %v7727_v15 = vrot.slane %v6400_v42, 9  ;;  %v6818_v21 = vrot.slane %v6706_v43, %v9746_v39  ;;  %v6905_v12 = vunpack.c.l.b16 %v6811_v45 }
 0x4ad   : > { %v6904_v9 = vunpack.c.l.b16 %v6804_v38  ;;  %v7726_v14 = vrot.slane %v6401_v17, 9  ;;  %v6611_v46 = vmax.f32 %v6393_v51, %v7725_v11  ;;  %v6903_v57 = vunpack.c.l.b16 %v6797_v31  ;;  %v8372_v51 = vpop.f32.mrf.mxu1 }
 0x4ae   : > { %v7728_v8 = vrot.slane %v6402_v63, 9  ;;  %v6613_v56 = vmax.f32 %v6400_v42, %v7727_v15  ;;  %v6906_v58 = vunpack.c.l.b16 %v6818_v21  ;;  %v6921_v52 = vrot.slane %v6905_v12, 6 }
 0x4af   : > { %v6919_v59 = vrot.slane %v6904_v9, 7  ;;  %v6612_v19 = vmax.f32 %v6401_v17, %v7726_v14  ;;  %v6635_v22 = vmax.f32 %v6607_v62, %v6611_v46  ;;  %v6118_v54 = vadd.f32 %v10336_v40, %v10325_v36 }
 0x4b0   : > { %v6614_v20 = vmax.f32 %v6402_v63, %v7728_v8  ;;  %v6637_v7 = vmax.f32 %v6609_v60, %v6613_v56  ;;  %v6923_v37 = vrot.slane %v6906_v58, 5  ;;  %v6403_v44 = vcombine.high %v6323_v48, %v6323_v48 }
 0x4b1   : > { %v6920_v25 = vsel %vm4674_vm12, %v6919_v59, %v6903_v57  ;;  %v6636_v41 = vmax.f32 %v6608_v47, %v6612_v19  ;;  %v6651_v2 = vpack.c.bf16 %v6635_v22, %v6635_v22  ;;  %v6121_v29 = vadd.f32 %v10340_v61, %v10329_v5 }
 0x4b2   : > { %v6922_v50 = vsel %vm4676_vm13, %v6921_v52, %v6920_v25  ;;  %v6638_v16 = vmax.f32 %v6610_v0, %v6614_v20  ;;  %v6653_v62 = vpack.c.bf16 %v6637_v7, %v6637_v7  ;;  %v6410_v33 = vrot.slane %v6323_v48, %v9746_v39 }
 0x4b3   : > { %v6924_v30 = vsel %vm10501_vm8, %v6923_v37, %v6922_v50  ;;  %v6652_v36 = vpack.c.bf16 %v6636_v41, %v6636_v41  ;;  %v6713_v24 = vrot.slane %v6651_v2, %v9746_v39  ;;  %v8327_v13 = vadd.f32 %v10289_v6, %v10287_v4 }
 0x4b4   : > { %v6943_v34 = vpack.c.b16 %v6924_v30, %v6924_v30  ;;  %v6654_v40 = vpack.c.bf16 %v6638_v16, %v6638_v16  ;;  %v8330_v47 = vadd.f32 %v10302_v18, %v10295_v10  ;;  %v8333_v60 = vadd.f32 %v10312_v23, %v10308_v55  ;;  %v8447_v55 = vpop.f32.mrf.mxu0 }
 0x4b5   : > { %v6727_v5 = vrot.slane %v6653_v62, %v9746_v39  ;;  %v6720_v61 = vrot.slane %v6652_v36, %v9746_v39  ;;  %v6417_v31 = vrot.slane %v6403_v44, %v9746_v39  ;;  %v6178_v18 = vadd.f32 %v8327_v13, %v10331_v1 }
 0x4b6   : > { %v6734_v35 = vrot.slane %v6654_v40, %v9746_v39  ;;  %7745 = vst.sshfl [vmem:[%s10386_s10] sm:$0x3 pattern:$0x76325410] %v6943_v34  ;;  %v6183_v4 = vadd.f32 %v8330_v47, %v6118_v54  ;;  %v6186_v6 = vadd.f32 %v8333_v60, %v6121_v29  ;;  %v6825_v23 = vrot.slane %v6713_v24, %v9746_v39  ;;  %v6307_v56 = vpop.f32.mrf.mxu0 }
 0x4b7   : > { %v6839_v10 = vrot.slane %v6727_v5, %v9746_v39  ;;  %v6832_v42 = vrot.slane %v6720_v61, %v9746_v39  ;;  %v6418_v43 = vcombine.high %v6410_v33, %v6410_v33  ;;  %v8367_v45 = vadd.f32 %v10350_v53, %v10345_v49 }
 0x4b8   : > { %v6846_v32 = vrot.slane %v6734_v35, %v9746_v39  ;;  %v8370_v0 = vadd.f32 %v8369_v3, %v10358_v26  ;;  %v8373_v17 = vadd.f32 %v8372_v51, %v8371_v28  ;;  %v6419_v15 = vcombine.high %v6417_v31, %v6417_v31 }
 0x4b9   : > { %v6909_v38 = vunpack.c.l.b16 %v6839_v10  ;;  %v6908_v63 = vunpack.c.l.b16 %v6832_v42  ;;  %v7729_v21 = vrot.slane %v6410_v33, 9  ;;  %v6243_v9 = vadd.f32 %v8367_v45, %v6178_v18 }
 0x4ba   : > { %v6910_v11 = vunpack.c.l.b16 %v6846_v32  ;;  %v6248_v12 = vadd.f32 %v8370_v0, %v6183_v4  ;;  %v6251_v48 = vadd.f32 %v8373_v17, %v6186_v6  ;;  %v6907_v14 = vunpack.c.l.b16 %v6825_v23 }
 0x4bb   : > { %v6927_v1 = vrot.slane %v6909_v38, 6  ;;  %v6925_v8 = vrot.slane %v6908_v63, 7  ;;  %v7730_v57 = vrot.slane %v6418_v43, 9  ;;  %v6308_v58 = vadd.f32 %v6307_v56, %v6243_v9 }
 0x4bc   : > { %v6929_v46 = vrot.slane %v6910_v11, 5  ;;  %v6313_v59 = vadd.f32 %v10348_v27, %v6248_v12  ;;  %v6316_v49 = vadd.f32 %v8447_v55, %v6251_v48  ;;  %v7731_v26 = vrot.slane %v6417_v31, 9 }
 0x4bd   : > { %v6926_v53 = vsel %vm4674_vm12, %v6925_v8, %v6907_v14  ;;  %v6324_v52 = vmax.f32 %v6308_v58, 0.0  ;;  %v7732_v7 = vrot.slane %v6419_v15, 9  ;;  %v6615_v54 = vmax.f32 %v6410_v33, %v7729_v21 }
 0x4be   : > { %v6928_v3 = vsel %vm4676_vm13, %v6927_v1, %v6926_v53  ;;  %v6325_v19 = vmax.f32 %v6313_v59, 0.0  ;;  %v6326_v20 = vmax.f32 %v6316_v49, 0.0  ;;  %v6616_v25 = vmax.f32 %v6418_v43, %v7730_v57 }
 0x4bf   : > { %v6930_v22 = vsel %vm10502_vm9, %v6929_v46, %v6928_v3  ;;  %v6420_v44 = vcombine.high %v6324_v52, %v6324_v52  ;;  %v6427_v50 = vrot.slane %v6324_v52, %v9746_v39  ;;  %v6617_v41 = vmax.f32 %v6417_v31, %v7731_v26 }
 0x4c0   : > { %v6944_v37 = vpack.c.b16 %v6930_v22, %v6930_v22  ;;  %v6437_v27 = vcombine.high %v6325_v19, %v6325_v19  ;;  %v6444_v16 = vrot.slane %v6325_v19, %v9746_v39  ;;  %v6454_v2 = vcombine.high %v6326_v20, %v6326_v20 }
 0x4c1   : > { %v6461_v28 = vrot.slane %v6326_v20, %v9746_v39  ;;  %v6434_v29 = vrot.slane %v6420_v44, %v9746_v39  ;;  %v6435_v30 = vcombine.high %v6427_v50, %v6427_v50  ;;  %v7733_v62 = vrot.slane %v6427_v50, 9 }
 0x4c2   : > { %v6451_v34 = vrot.slane %v6437_v27, %v9746_v39  ;;  %7746 = vst.sshfl [vmem:[%s10386_s10 + $0x2] sm:$0x3 pattern:$0x76325410] %v6944_v37  ;;  %v6618_v33 = vmax.f32 %v6419_v15, %v7732_v7  ;;  %v6452_v36 = vcombine.high %v6444_v16, %v6444_v16  ;;  %v7737_v40 = vrot.slane %v6444_v16, 9 }
 0x4c3   : > { %v6468_v24 = vrot.slane %v6454_v2, %v9746_v39  ;;  %v6436_v13 = vcombine.high %v6434_v29, %v6434_v29  ;;  %v7734_v47 = vrot.slane %v6435_v30, 9  ;;  %v7735_v60 = vrot.slane %v6434_v29, 9 }
 0x4c4   : > { %v6619_v5 = vmax.f32 %v6427_v50, %v7733_v62  ;;  %v6453_v61 = vcombine.high %v6451_v34, %v6451_v34  ;;  %v7738_v35 = vrot.slane %v6452_v36, 9  ;;  %v7739_v31 = vrot.slane %v6451_v34, 9 }
 0x4c5   : > { %v6469_v51 = vcombine.high %v6461_v28, %v6461_v28  ;;  %v7736_v4 = vrot.slane %v6436_v13, 9  ;;  %v6620_v6 = vmax.f32 %v6435_v30, %v7734_v47  ;;  %v6621_v10 = vmax.f32 %v6434_v29, %v7735_v60 }
 0x4c6   : > { %v6639_v18 = vmax.f32 %v6615_v54, %v6619_v5  ;;  %v7740_v55 = vrot.slane %v6453_v61, 9  ;;  %v6623_v23 = vmax.f32 %v6444_v16, %v7737_v40  ;;  %v6624_v42 = vmax.f32 %v6452_v36, %v7738_v35 }
 0x4c7   : > { %v6470_v32 = vcombine.high %v6468_v24, %v6468_v24  ;;  %v6622_v43 = vmax.f32 %v6436_v13, %v7736_v4  ;;  %v6640_v38 = vmax.f32 %v6616_v25, %v6620_v6  ;;  %v6641_v45 = vmax.f32 %v6617_v41, %v6621_v10 }
 0x4c8   : > { %v6655_v0 = vpack.c.bf16 %v6639_v18, %v6639_v18  ;;  %v6625_v17 = vmax.f32 %v6451_v34, %v7739_v31  ;;  %v7741_v63 = vrot.slane %v6461_v28, 9  ;;  %v7742_v11 = vrot.slane %v6469_v51, 9 }
 0x4c9   : > { %v7743_v15 = vrot.slane %v6468_v24, 9  ;;  %v6642_v21 = vmax.f32 %v6618_v33, %v6622_v43  ;;  %v6656_v1 = vpack.c.bf16 %v6640_v38, %v6640_v38  ;;  %v6657_v9 = vpack.c.bf16 %v6641_v45, %v6641_v45 }
 0x4ca   : > { %v6741_v12 = vrot.slane %v6655_v0, %v9746_v39  ;;  %v7744_v48 = vrot.slane %v6470_v32, 9  ;;  %v6627_v14 = vmax.f32 %v6461_v28, %v7741_v63  ;;  %v6628_v8 = vmax.f32 %v6469_v51, %v7742_v11 }
 0x4cb   : > { %v6629_v46 = vmax.f32 %v6468_v24, %v7743_v15  ;;  %v6658_v56 = vpack.c.bf16 %v6642_v21, %v6642_v21  ;;  %v6748_v57 = vrot.slane %v6656_v1, %v9746_v39  ;;  %v6755_v58 = vrot.slane %v6657_v9, %v9746_v39 }
 0x4cc   : > { %v6626_v59 = vmax.f32 %v6453_v61, %v7740_v55  ;;  %v6630_v49 = vmax.f32 %v6470_v32, %v7744_v48  ;;  %v6643_v53 = vmax.f32 %v6623_v23, %v6627_v14  ;;  %v6644_v26 = vmax.f32 %v6624_v42, %v6628_v8 }
 0x4cd   : > { %v6645_v3 = vmax.f32 %v6625_v17, %v6629_v46  ;;  %v6762_v52 = vrot.slane %v6658_v56, %v9746_v39  ;;  %v6853_v19 = vrot.slane %v6741_v12, %v9746_v39  ;;  %v6860_v20 = vrot.slane %v6748_v57, %v9746_v39 }
 0x4ce   : > { %v6867_v22 = vrot.slane %v6755_v58, %v9746_v39  ;;  %v6646_v7 = vmax.f32 %v6626_v59, %v6630_v49  ;;  %v6659_v54 = vpack.c.bf16 %v6643_v53, %v6643_v53  ;;  %v6660_v25 = vpack.c.bf16 %v6644_v26, %v6644_v26 }
 0x4cf   : > { %v6661_v37 = vpack.c.bf16 %v6645_v3, %v6645_v3  ;;  %v6874_v44 = vrot.slane %v6762_v52, %v9746_v39  ;;  %v6912_v50 = vunpack.c.l.b16 %v6860_v20  ;;  %v6911_v29 = vunpack.c.l.b16 %v6853_v19 }
 0x4d0   : > { %v6913_v27 = vunpack.c.l.b16 %v6867_v22  ;;  %v6662_v41 = vpack.c.bf16 %v6646_v7, %v6646_v7  ;;  %v6769_v16 = vrot.slane %v6659_v54, %v9746_v39  ;;  %v6776_v2 = vrot.slane %v6660_v25, %v9746_v39 }
 0x4d1   : > { %v6783_v28 = vrot.slane %v6661_v37, %v9746_v39  ;;  %v6914_v30 = vunpack.c.l.b16 %v6874_v44  ;;  %v6931_v62 = vrot.slane %v6912_v50, 7 }
 0x4d2   : > { %v6933_v34 = vrot.slane %v6913_v27, 6  ;;  %v6790_v33 = vrot.slane %v6662_v41, %v9746_v39  ;;  %v6881_v36 = vrot.slane %v6769_v16, %v9746_v39  ;;  %v6888_v40 = vrot.slane %v6776_v2, %v9746_v39 }
 0x4d3   : > { %v6895_v24 = vrot.slane %v6783_v28, %v9746_v39  ;;  %v6932_v13 = vsel %vm4674_vm12, %v6931_v62, %v6911_v29  ;;  %v6935_v47 = vrot.slane %v6914_v30, 5 }
 0x4d4   : > { %v6934_v60 = vsel %vm4676_vm13, %v6933_v34, %v6932_v13  ;;  %v6902_v5 = vrot.slane %v6790_v33, %v9746_v39  ;;  %v6916_v61 = vunpack.c.l.b16 %v6888_v40  ;;  %v6915_v4 = vunpack.c.l.b16 %v6881_v36 }
 0x4d5   : > { %v6936_v35 = vsel %vm10503_vm10, %v6935_v47, %v6934_v60  ;;  %v6917_v31 = vunpack.c.l.b16 %v6895_v24 }
 0x4d6   : > { %v6945_v51 = vpack.c.b16 %v6936_v35, %v6936_v35  ;;  %v6918_v6 = vunpack.c.l.b16 %v6902_v5  ;;  %v6937_v10 = vrot.slane %v6916_v61, 7 }
 0x4d7   : > { %v6939_v18 = vrot.slane %v6917_v31, 6 }
 0x4d8   : > { %v6938_v55 = vsel %vm4674_vm12, %v6937_v10, %v6915_v4  ;;  %v6941_v23 = vrot.slane %v6918_v6, 5  ;;  %7747 = vst.sshfl [vmem:[%s10386_s10 + $0x4] sm:$0x3 pattern:$0x76325410] %v6945_v51 }
 0x4d9   : > { %v6940_v39 = vsel %vm4676_vm13, %v6939_v18, %v6938_v55 }
 0x4da   : > { %v6942_v42 = vsel %vm10504_vm11, %v6941_v23, %v6940_v39 }
 0x4db   : > { %v6946_v32 = vpack.c.b16 %v6942_v42, %v6942_v42 }
 0x4dd   : > { %7748 = vst.sshfl [vmem:[%s10386_s10 + $0x6] sm:$0x3 pattern:$0x76325410] %v6946_v32 }
 0x4de   : > { %8697 = shalt.err (!%p8694_p0)
}
 0x4df   : > { %s8698_s30 = scalar_lea.hbm %s10436_s16, 128  ;;  %s8702_s8 = scalar_lea.hbm %s10490_s5, 256 }
 0x4e0   : > { %p8699_p1 = scmp.ne.s32.totalorder %s10436_s16, %s8698_s30  ;;  %p8703_p4 = scmp.lt.s32.totalorder %s10436_s16, %s10490_s5 }
 0x4e1   : > { %p8704_p7 = scmp.lt.s32.totalorder %s8702_s8, %s8698_s30 }
 0x4e2   : > { %p8700_p2 = pnand %p8699_p1, %p8833_p5 }
 0x4e3   : > { %p8705_p6 = por %p8704_p7, %p8703_p4 }
 0x4e4   : > { %p8701_p3 = pneg %p8700_p2 }
 0x4e6   : > { %p8706_p8 = pnand %p8705_p6, %p8701_p3 }
 0x4e8   : > { %8709 = shalt.err (!%p8706_p8)
}
 0x4e9   : > { %s8764_s11 = smov 2  }
 0x4ea   : > { %8453 = dma.vmem_to_hbm [thread:$0]  (%p8833_p5), %s10438_s12, 128, %s10436_s16, %s10443_s22, %s8761_s13, %s8761_s13, %s8764_s11  }
 0x4eb PF: > { %p8465_p9 = scmp.ge.s32.totalorder %s8748_s21, 2  ;;  %s7012_s14 = sand.u32 1, %s8736_s18  }
 0x4ec   : > { %p10505_p10 = scmp.ne.s32.totalorder %s10493_s29, 0  ;;  %s7013_s15 = scalar_lea.sflag [#allocation8], %s7012_s14 }
 0x4ee   : > { %p8460_p11 = pnand %p8465_p9, %p10505_p10 }
 0x4f0   : > { %p8461_p12 = pneg %p8460_p11 }
 0x4f2   : > { %8731 = dma.done.wait (%p8461_p12), %s7013_s15, 128  }
 0x4f3   : > { %8733 = vsyncadd (%p8461_p12), %s7013_s15, 4294967168  ;;  %p16_p13 = scmp.ge.s32.totalorder %s8820_s24, 4   ;;  %s10506_s18 = smov %s8740_s19 }
 0x4f4   : > { %s10507_s19 = smov %s8744_s20  ;;  %s10508_s20 = smov %s8831_s27 }
 0x4f5   : > { %s10509_s21 = smov %s8820_s24  ;;  %18 = sbr.rel (!%p16_p13) target bundleno = 4 (0x4), region = 84 }
 0x4fa   :  { %7018 = vsyncpa [#allocation7], 1 }
 0x4fb   :  { %7020 = vsyncpa [#allocation7 + $0x1], 1 }
 0x4fc   :  { %7021 = vsyncpa [#allocation8], 1 }
 0x4fd   :  { %7023 = vsyncpa [#allocation8 + $0x1], 1 }

</bundles_post_ra>
